<compile_context>
chip_gen: v7x
topology: tpu7x:2x2x1
jax: 0.10.0
libtpu: 0.0.40
codegen_flags: <defaults>
</compile_context>

<pallas_src>
import functools

import jax
import jax.numpy as jnp
from jax.experimental import pallas as pl
from jax.experimental.pallas import tpu as pltpu

# Lane-aligned (multiple-of-128) padded dimensions.
D_IN = 896    # 784  -> 896
D_H1 = 1024   # 1000 -> 1024
D_H2 = 512    # 500  -> 512
D_H3 = 256    # 250  -> 256


def _round_up(n, m):
    return ((n + m - 1) // m) * m


def encoder_kernel(x_ref,
                   w1_ref, b1_ref,
                   w2_ref, b2_ref,
                   w3_ref, b3_ref,
                   w4_ref, b4_ref,
                   o_ref):
    # layer1: Linear(896 -> 1024) + ReLU (bf16 operands, f32 MXU accumulate)
    h = jnp.dot(x_ref[...], w1_ref[...], preferred_element_type=jnp.float32)
    h = jnp.maximum(h + b1_ref[...], 0.0).astype(jnp.bfloat16)
    # layer2: Linear(1024 -> 512) + ReLU
    h = jnp.dot(h, w2_ref[...], preferred_element_type=jnp.float32)
    h = jnp.maximum(h + b2_ref[...], 0.0).astype(jnp.bfloat16)
    # layer3: Linear(512 -> 256) + ReLU
    h = jnp.dot(h, w3_ref[...], preferred_element_type=jnp.float32)
    h = jnp.maximum(h + b3_ref[...], 0.0).astype(jnp.bfloat16)
    # layer4: Linear(256 -> padded n_components), no activation
    out = jnp.dot(h, w4_ref[...], preferred_element_type=jnp.float32)
    o_ref[...] = (out + b4_ref[...]).astype(o_ref.dtype)


@jax.jit
def encoder_forward(x, params):
    """x: (B, 1, 28, 28) float32 (NCHW). params: dict of (in,out) f32 weights and (1,out) f32 biases."""
    B = x.shape[0]
    n_components = params["b4"].shape[1]
    d_out = _round_up(max(n_components, 128), 128)

    x2d = x.reshape(B, 28 * 28)  # same as torch x.view(-1, 784)

    # Batch tile: 256 for big batches (full MXU M on v6e/v7x), otherwise the
    # smallest (8-aligned) tile that covers the batch.  Resident set stays
    # far under v7x's 64 MiB VMEM either way (~3.5 MiB weights + small acts).
    TM = 256 if B >= 256 else max(8, _round_up(B, 8))
    B_pad = _round_up(B, TM)

    x_p = jnp.pad(x2d.astype(jnp.bfloat16),
                  ((0, B_pad - B), (0, D_IN - 784)))

    def pad_w(w, rows, cols):
        return jnp.pad(w.astype(jnp.bfloat16),
                       ((0, rows - w.shape[0]), (0, cols - w.shape[1])))

    def pad_b(b, cols):
        return jnp.pad(b.astype(jnp.float32), ((0, 0), (0, cols - b.shape[1])))

    w1 = pad_w(params["w1"], D_IN, D_H1); b1 = pad_b(params["b1"], D_H1)
    w2 = pad_w(params["w2"], D_H1, D_H2); b2 = pad_b(params["b2"], D_H2)
    w3 = pad_w(params["w3"], D_H2, D_H3); b3 = pad_b(params["b3"], D_H3)
    w4 = pad_w(params["w4"], D_H3, d_out); b4 = pad_b(params["b4"], d_out)

    def resident(shape):
        # Same block index every grid step -> weight/bias stays in VMEM, DMA'd once.
        return pl.BlockSpec(shape, lambda i: (0, 0))

    flops = 2 * B_pad * (D_IN * D_H1 + D_H1 * D_H2 + D_H2 * D_H3 + D_H3 * d_out)
    bytes_w = 2 * (D_IN * D_H1 + D_H1 * D_H2 + D_H2 * D_H3 + D_H3 * d_out)
    bytes_b = 4 * (D_H1 + D_H2 + D_H3 + d_out)
    bytes_io = 2 * B_pad * D_IN + 4 * B_pad * d_out
    cost = pl.CostEstimate(flops=flops, transcendentals=0,
                           bytes_accessed=bytes_w + bytes_b + bytes_io)

    out_p = pl.pallas_call(
        encoder_kernel,
        out_shape=jax.ShapeDtypeStruct((B_pad, d_out), jnp.float32),
        grid=(B_pad // TM,),
        in_specs=[
            pl.BlockSpec((TM, D_IN), lambda i: (i, 0)),
            resident(w1.shape), resident(b1.shape),
            resident(w2.shape), resident(b2.shape),
            resident(w3.shape), resident(b3.shape),
            resident(w4.shape), resident(b4.shape),
        ],
        out_specs=pl.BlockSpec((TM, d_out), lambda i: (i, 0)),
        compiler_params=pltpu.CompilerParams(
            dimension_semantics=("parallel",)),
        cost_estimate=cost,
    )(x_p, w1, b1, w2, b2, w3, b3, w4, b4)

    # Strip batch + lane padding.
    return out_p[:B, :n_components]


def init_params(key, n_components):
    """Deterministic init mirroring nn.Linear default (uniform +-1/sqrt(fan_in)).
    Weights stored as (in_features, out_features) so y = x @ W + b."""
    dims = [(28 * 28, 1000), (1000, 500), (500, 250), (250, n_components)]
    params = {}
    for i, (fan_in, fan_out) in enumerate(dims, start=1):
        key, kw, kb = jax.random.split(key, 3)
        bound = 1.0 / (fan_in ** 0.5)
        params[f"w{i}"] = jax.random.uniform(
            kw, (fan_in, fan_out), jnp.float32, minval=-bound, maxval=bound)
        params[f"b{i}"] = jax.random.uniform(
            kb, (1, fan_out), jnp.float32, minval=-bound, maxval=bound)
    return params


def reference_forward(x, params):
    """Plain-JAX reference using the same bf16-weight / f32-accumulate recipe."""
    B = x.shape[0]
    h = x.reshape(B, 28 * 28).astype(jnp.bfloat16)

    def layer(h, w, b, relu):
        y = jnp.dot(h, w.astype(jnp.bfloat16),
                    preferred_element_type=jnp.float32) + b
        if relu:
            y = jnp.maximum(y, 0.0).astype(jnp.bfloat16)
        return y

    h = layer(h, params["w1"], params["b1"], True)
    h = layer(h, params["w2"], params["b2"], True)
    h = layer(h, params["w3"], params["b3"], True)
    return layer(h, params["w4"], params["b4"], False)


if __name__ == "__main__":
    key = jax.random.PRNGKey(0)
    k_param, k_x = jax.random.split(key)

    n_components = 32
    batch = 2
    params = init_params(k_param, n_components)

    # NCHW input, as the PyTorch module would receive (B, 1, 28, 28) MNIST images.
    x = jax.random.normal(k_x, (batch, 1, 28, 28), dtype=jnp.float32)

    out = encoder_forward(x, params)
    out = jax.block_until_ready(out)

    ref = reference_forward(x, params)
    assert out.shape == (batch, n_components), out.shape
    assert jnp.allclose(out, ref, atol=1e-2, rtol=1e-2), "mismatch vs reference"

    print("KERNEL_OK")
</pallas_src>

<mosaic_0001>
module attributes {stable_mosaic.version = 11 : i64} {
  func.func @encoder_kernel(%arg0: i32, %arg1: memref<8x896xbf16, #tpu.memory_space<vmem>>, %arg2: memref<896x1024xbf16, #tpu.memory_space<vmem>>, %arg3: memref<1x1024xf32, #tpu.memory_space<vmem>>, %arg4: memref<1024x512xbf16, #tpu.memory_space<vmem>>, %arg5: memref<1x512xf32, #tpu.memory_space<vmem>>, %arg6: memref<512x256xbf16, #tpu.memory_space<vmem>>, %arg7: memref<1x256xf32, #tpu.memory_space<vmem>>, %arg8: memref<256x128xbf16, #tpu.memory_space<vmem>>, %arg9: memref<1x128xf32, #tpu.memory_space<vmem>>, %arg10: memref<8x128xf32, #tpu.memory_space<vmem>>) attributes {dimension_semantics = [#tpu.dimension_semantics<parallel>], iteration_bounds = array<i64: 1>, scalar_prefetch = 0 : i64, scratch_operands = 0 : i64, tpu.core_type = #tpu.core_type<tc>, window_params = [{transform_indices = @transform_0, window_bounds = array<i64: 8, 896>}, {pipeline_mode = #tpu.pipeline_mode<synchronous>, transform_indices = @transform_1, window_bounds = array<i64: 896, 1024>}, {pipeline_mode = #tpu.pipeline_mode<synchronous>, transform_indices = @transform_2, window_bounds = array<i64: 1, 1024>}, {pipeline_mode = #tpu.pipeline_mode<synchronous>, transform_indices = @transform_3, window_bounds = array<i64: 1024, 512>}, {pipeline_mode = #tpu.pipeline_mode<synchronous>, transform_indices = @transform_4, window_bounds = array<i64: 1, 512>}, {pipeline_mode = #tpu.pipeline_mode<synchronous>, transform_indices = @transform_5, window_bounds = array<i64: 512, 256>}, {pipeline_mode = #tpu.pipeline_mode<synchronous>, transform_indices = @transform_6, window_bounds = array<i64: 1, 256>}, {pipeline_mode = #tpu.pipeline_mode<synchronous>, transform_indices = @transform_7, window_bounds = array<i64: 256, 128>}, {pipeline_mode = #tpu.pipeline_mode<synchronous>, transform_indices = @transform_8, window_bounds = array<i64: 1, 128>}, {transform_indices = @transform_9, window_bounds = array<i64: 8, 128>}]} {
    %c0 = arith.constant 0 : index
    %c0_0 = arith.constant 0 : index
    %0 = vector.load %arg1[%c0, %c0_0] : memref<8x896xbf16, #tpu.memory_space<vmem>>, vector<8x896xbf16>
    %c0_1 = arith.constant 0 : index
    %c0_2 = arith.constant 0 : index
    %1 = vector.load %arg2[%c0_1, %c0_2] : memref<896x1024xbf16, #tpu.memory_space<vmem>>, vector<896x1024xbf16>
    %cst = arith.constant dense<0.000000e+00> : vector<8x1024xf32>
    %2 = tpu.matmul %0, %1, %cst {dimension_numbers = #tpu.dot_dimension_numbers<[1], [0], [0], [1], [0, 0, 1, 1], [], []>} : vector<8x896xbf16>, vector<896x1024xbf16>, vector<8x1024xf32> -> vector<8x1024xf32>
    %c0_3 = arith.constant 0 : index
    %c0_4 = arith.constant 0 : index
    %3 = vector.load %arg3[%c0_3, %c0_4] : memref<1x1024xf32, #tpu.memory_space<vmem>>, vector<1x1024xf32>
    %4 = vector.broadcast %3 : vector<1x1024xf32> to vector<8x1024xf32>
    %5 = arith.addf %2, %4 : vector<8x1024xf32>
    %cst_5 = arith.constant 0.000000e+00 : f32
    %6 = vector.broadcast %cst_5 : f32 to vector<8x1024xf32>
    %7 = arith.maximumf %5, %6 : vector<8x1024xf32>
    %8 = arith.truncf %7 : vector<8x1024xf32> to vector<8x1024xbf16>
    %c0_6 = arith.constant 0 : index
    %c0_7 = arith.constant 0 : index
    %9 = vector.load %arg4[%c0_6, %c0_7] : memref<1024x512xbf16, #tpu.memory_space<vmem>>, vector<1024x512xbf16>
    %cst_8 = arith.constant dense<0.000000e+00> : vector<8x512xf32>
    %10 = tpu.matmul %8, %9, %cst_8 {dimension_numbers = #tpu.dot_dimension_numbers<[1], [0], [0], [1], [0, 0, 1, 1], [], []>} : vector<8x1024xbf16>, vector<1024x512xbf16>, vector<8x512xf32> -> vector<8x512xf32>
    %c0_9 = arith.constant 0 : index
    %c0_10 = arith.constant 0 : index
    %11 = vector.load %arg5[%c0_9, %c0_10] : memref<1x512xf32, #tpu.memory_space<vmem>>, vector<1x512xf32>
    %12 = vector.broadcast %11 : vector<1x512xf32> to vector<8x512xf32>
    %13 = arith.addf %10, %12 : vector<8x512xf32>
    %cst_11 = arith.constant 0.000000e+00 : f32
    %14 = vector.broadcast %cst_11 : f32 to vector<8x512xf32>
    %15 = arith.maximumf %13, %14 : vector<8x512xf32>
    %16 = arith.truncf %15 : vector<8x512xf32> to vector<8x512xbf16>
    %c0_12 = arith.constant 0 : index
    %c0_13 = arith.constant 0 : index
    %17 = vector.load %arg6[%c0_12, %c0_13] : memref<512x256xbf16, #tpu.memory_space<vmem>>, vector<512x256xbf16>
    %cst_14 = arith.constant dense<0.000000e+00> : vector<8x256xf32>
    %18 = tpu.matmul %16, %17, %cst_14 {dimension_numbers = #tpu.dot_dimension_numbers<[1], [0], [0], [1], [0, 0, 1, 1], [], []>} : vector<8x512xbf16>, vector<512x256xbf16>, vector<8x256xf32> -> vector<8x256xf32>
    %c0_15 = arith.constant 0 : index
    %c0_16 = arith.constant 0 : index
    %19 = vector.load %arg7[%c0_15, %c0_16] : memref<1x256xf32, #tpu.memory_space<vmem>>, vector<1x256xf32>
    %20 = vector.broadcast %19 : vector<1x256xf32> to vector<8x256xf32>
    %21 = arith.addf %18, %20 : vector<8x256xf32>
    %cst_17 = arith.constant 0.000000e+00 : f32
    %22 = vector.broadcast %cst_17 : f32 to vector<8x256xf32>
    %23 = arith.maximumf %21, %22 : vector<8x256xf32>
    %24 = arith.truncf %23 : vector<8x256xf32> to vector<8x256xbf16>
    %c0_18 = arith.constant 0 : index
    %c0_19 = arith.constant 0 : index
    %25 = vector.load %arg8[%c0_18, %c0_19] : memref<256x128xbf16, #tpu.memory_space<vmem>>, vector<256x128xbf16>
    %cst_20 = arith.constant dense<0.000000e+00> : vector<8x128xf32>
    %26 = tpu.matmul %24, %25, %cst_20 {dimension_numbers = #tpu.dot_dimension_numbers<[1], [0], [0], [1], [0, 0, 1, 1], [], []>} : vector<8x256xbf16>, vector<256x128xbf16>, vector<8x128xf32> -> vector<8x128xf32>
    %c0_21 = arith.constant 0 : index
    %c0_22 = arith.constant 0 : index
    %27 = vector.load %arg9[%c0_21, %c0_22] : memref<1x128xf32, #tpu.memory_space<vmem>>, vector<1x128xf32>
    %28 = vector.broadcast %27 : vector<1x128xf32> to vector<8x128xf32>
    %29 = arith.addf %26, %28 : vector<8x128xf32>
    %c0_23 = arith.constant 0 : index
    %c0_24 = arith.constant 0 : index
    %30 = vector.load %arg10[%c0_23, %c0_24] : memref<8x128xf32, #tpu.memory_space<vmem>>, vector<8x128xf32>
    tpu.vector_store %arg10[%c0_23, %c0_24], %29 {strides = array<i32>} : memref<8x128xf32, #tpu.memory_space<vmem>>, vector<8x128xf32>,
    return
  }
  func.func @transform_0(%arg0: i32) -> (i32, i32) {
    %c0_i32 = arith.constant 0 : i32
    %c0_i32_0 = arith.constant 0 : i32
    return %arg0, %c0_i32 : i32, i32
  }
  func.func @transform_1(%arg0: i32) -> (i32, i32) {
    %c0_i32 = arith.constant 0 : i32
    %c0_i32_0 = arith.constant 0 : i32
    %c0_i32_1 = arith.constant 0 : i32
    return %c0_i32, %c0_i32_0 : i32, i32
  }
  func.func @transform_2(%arg0: i32) -> (i32, i32) {
    %c0_i32 = arith.constant 0 : i32
    %c0_i32_0 = arith.constant 0 : i32
    %c0_i32_1 = arith.constant 0 : i32
    return %c0_i32, %c0_i32_0 : i32, i32
  }
  func.func @transform_3(%arg0: i32) -> (i32, i32) {
    %c0_i32 = arith.constant 0 : i32
    %c0_i32_0 = arith.constant 0 : i32
    %c0_i32_1 = arith.constant 0 : i32
    return %c0_i32, %c0_i32_0 : i32, i32
  }
  func.func @transform_4(%arg0: i32) -> (i32, i32) {
    %c0_i32 = arith.constant 0 : i32
    %c0_i32_0 = arith.constant 0 : i32
    %c0_i32_1 = arith.constant 0 : i32
    return %c0_i32, %c0_i32_0 : i32, i32
  }
  func.func @transform_5(%arg0: i32) -> (i32, i32) {
    %c0_i32 = arith.constant 0 : i32
    %c0_i32_0 = arith.constant 0 : i32
    %c0_i32_1 = arith.constant 0 : i32
    return %c0_i32, %c0_i32_0 : i32, i32
  }
  func.func @transform_6(%arg0: i32) -> (i32, i32) {
    %c0_i32 = arith.constant 0 : i32
    %c0_i32_0 = arith.constant 0 : i32
    %c0_i32_1 = arith.constant 0 : i32
    return %c0_i32, %c0_i32_0 : i32, i32
  }
  func.func @transform_7(%arg0: i32) -> (i32, i32) {
    %c0_i32 = arith.constant 0 : i32
    %c0_i32_0 = arith.constant 0 : i32
    %c0_i32_1 = arith.constant 0 : i32
    return %c0_i32, %c0_i32_0 : i32, i32
  }
  func.func @transform_8(%arg0: i32) -> (i32, i32) {
    %c0_i32 = arith.constant 0 : i32
    %c0_i32_0 = arith.constant 0 : i32
    %c0_i32_1 = arith.constant 0 : i32
    return %c0_i32, %c0_i32_0 : i32, i32
  }
  func.func @transform_9(%arg0: i32) -> (i32, i32) {
    %c0_i32 = arith.constant 0 : i32
    %c0_i32_0 = arith.constant 0 : i32
    return %arg0, %c0_i32 : i32, i32
  }
}

</mosaic_0001>

<bundles_post_ra>
// kernel: encoder_forward.1
= control target key start
LH: loop header
LB: loop body
LE: loop exit
PB: predicated region body
PF: predicated region fallthrough
CT: control target
= control target key end

     0   :  { %s10013_s1 = inlined_call_operand.vmem [shape: bf16[896,1024], index: 1, kind: input, shape index: {}]   ;;  %s10014_s0 = inlined_call_operand.vmem [shape: bf16[8,896], index: 0, kind: input, shape index: {}]   ;;  %s10015_s3 = inlined_call_operand.vmem [shape: bf16[1024,512], index: 3, kind: input, shape index: {}]   ;;  %s10016_s2 = inlined_call_operand.vmem [shape: f32[1,1024], index: 2, kind: input, shape index: {}]   ;;  %s10017_s5 = inlined_call_operand.vmem [shape: bf16[512,256], index: 5, kind: input, shape index: {}]   ;;  %s10018_s7 = inlined_call_operand.vmem [shape: bf16[256,128], index: 7, kind: input, shape index: {}]   ;;  %s10019_s4 = inlined_call_operand.vmem [shape: f32[1,512], index: 4, kind: input, shape index: {}]   ;;  %s10020_s6 = inlined_call_operand.vmem [shape: f32[1,256], index: 6, kind: input, shape index: {}]   ;;  %s10021_s8 = inlined_call_operand.vmem [shape: f32[1,128], index: 8, kind: input, shape index: {}]   ;;  %s10022_s9 = inlined_call_operand.vmem [shape: f32[8,128], index: 9, kind: output, shape index: {}]  }
   0x1   :  { %v37_v0 = vld [vmem:[%s10013_s1] sm:$0xff]  ;;  %v7571_v54 = vld [vmem:[%s10014_s0 + $0x8] sm:$0xff] }
   0x2   :  { %v41_v1 = vld [vmem:[%s10013_s1 + $0x20] sm:$0xff]  ;;  %v7591_v61 = vcombine.high %v7571_v54, %v7571_v54 }
   0x3   :  { %v165_v2 = vld [vmem:[%s10013_s1 + $0x400] sm:$0xff]  ;;  %v6028_v3 = vcombine.high %v37_v0, %v41_v1  ;;  %v6027_v5 = vcombine.low %v37_v0, %v41_v1 }
   0x4   :  { %v169_v4 = vld [vmem:[%s10013_s1 + $0x420] sm:$0xff]  ;;  %2865 = vmatprep.mubr.bf16.mxu0 %v7591_v61 }
   0x5   :  { %v45_v6 = vld [vmem:[%s10013_s1 + $0x40] sm:$0xff]  ;;  %v6156_v8 = vcombine.high %v165_v2, %v169_v4  ;;  %v6155_v9 = vcombine.low %v165_v2, %v169_v4  ;;  %2792 = vmatprep.subr.bf16.mxu1 %v6028_v3 }
   0x6   :  { %v49_v7 = vld [vmem:[%s10013_s1 + $0x60] sm:$0xff]  ;;  %2793 = vmatpush1.bf16.msra.mxu1 %v6027_v5 }
   0x7   :  { %v6036_v10 = vcombine.high %v45_v6, %v49_v7  ;;  %v173_v11 = vld [vmem:[%s10013_s1 + $0x440] sm:$0xff]  ;;  %2833 = vmatprep.subr.bf16.mxu0 %v6156_v8  ;;  %v6035_v18 = vcombine.low %v45_v6, %v49_v7 }
   0x8   :  { %v177_v12 = vld [vmem:[%s10013_s1 + $0x460] sm:$0xff]  ;;  %2834 = vmatpush1.bf16.msra.mxu0 %v6155_v9 }
   0x9   :  { %v53_v13 = vld [vmem:[%s10013_s1 + $0x80] sm:$0xff]  ;;  %v6164_v14 = vcombine.high %v173_v11, %v177_v12  ;;  %2794 = vmatprep.subr.bf16.mxu1 %v6036_v10  ;;  %v6163_v19 = vcombine.low %v173_v11, %v177_v12 }
   0xa   :  { %v57_v15 = vld [vmem:[%s10013_s1 + $0xa0] sm:$0xff]  ;;  %2795 = vmatpush1.bf16.msra.mxu1 %v6035_v18 }
   0xb   :  { %v181_v16 = vld [vmem:[%s10013_s1 + $0x480] sm:$0xff]  ;;  %v6044_v20 = vcombine.high %v53_v13, %v57_v15  ;;  %2835 = vmatprep.subr.bf16.mxu0 %v6164_v14  ;;  %v6043_v26 = vcombine.low %v53_v13, %v57_v15 }
   0xc   :  { %v185_v17 = vld [vmem:[%s10013_s1 + $0x4a0] sm:$0xff]  ;;  %2836 = vmatpush1.bf16.msra.mxu0 %v6163_v19 }
   0xd   :  { %v6172_v21 = vcombine.high %v181_v16, %v185_v17  ;;  %v61_v22 = vld [vmem:[%s10013_s1 + $0xc0] sm:$0xff]  ;;  %2796 = vmatprep.subr.bf16.mxu1 %v6044_v20  ;;  %v6171_v27 = vcombine.low %v181_v16, %v185_v17 }
   0xe   :  { %v65_v23 = vld [vmem:[%s10013_s1 + $0xe0] sm:$0xff]  ;;  %2797 = vmatpush1.bf16.msra.mxu1 %v6043_v26 }
   0xf   :  { %v189_v24 = vld [vmem:[%s10013_s1 + $0x4c0] sm:$0xff]  ;;  %v6052_v28 = vcombine.high %v61_v22, %v65_v23  ;;  %2837 = vmatprep.subr.bf16.mxu0 %v6172_v21  ;;  %v6051_v34 = vcombine.low %v61_v22, %v65_v23 }
  0x10   :  { %v193_v25 = vld [vmem:[%s10013_s1 + $0x4e0] sm:$0xff]  ;;  %2838 = vmatpush1.bf16.msra.mxu0 %v6171_v27 }
  0x11   :  { %v6180_v29 = vcombine.high %v189_v24, %v193_v25  ;;  %v69_v30 = vld [vmem:[%s10013_s1 + $0x100] sm:$0xff]  ;;  %2798 = vmatprep.subr.bf16.mxu1 %v6052_v28  ;;  %v6179_v35 = vcombine.low %v189_v24, %v193_v25 }
  0x12   :  { %v73_v31 = vld [vmem:[%s10013_s1 + $0x120] sm:$0xff]  ;;  %2799 = vmatpush1.bf16.msra.mxu1 %v6051_v34 }
  0x13   :  { %v197_v32 = vld [vmem:[%s10013_s1 + $0x500] sm:$0xff]  ;;  %v6060_v36 = vcombine.high %v69_v30, %v73_v31  ;;  %2839 = vmatprep.subr.bf16.mxu0 %v6180_v29  ;;  %v6059_v42 = vcombine.low %v69_v30, %v73_v31 }
  0x14   :  { %v201_v33 = vld [vmem:[%s10013_s1 + $0x520] sm:$0xff]  ;;  %2840 = vmatpush1.bf16.msra.mxu0 %v6179_v35 }
  0x15   :  { %v6188_v37 = vcombine.high %v197_v32, %v201_v33  ;;  %v77_v38 = vld [vmem:[%s10013_s1 + $0x140] sm:$0xff]  ;;  %2800 = vmatprep.subr.bf16.mxu1 %v6060_v36  ;;  %v6187_v43 = vcombine.low %v197_v32, %v201_v33 }
  0x16   :  { %v81_v39 = vld [vmem:[%s10013_s1 + $0x160] sm:$0xff]  ;;  %2801 = vmatpush1.bf16.msra.mxu1 %v6059_v42 }
  0x17   :  { %v205_v40 = vld [vmem:[%s10013_s1 + $0x540] sm:$0xff]  ;;  %v6068_v44 = vcombine.high %v77_v38, %v81_v39  ;;  %2841 = vmatprep.subr.bf16.mxu0 %v6188_v37  ;;  %v6067_v50 = vcombine.low %v77_v38, %v81_v39 }
  0x18   :  { %v209_v41 = vld [vmem:[%s10013_s1 + $0x560] sm:$0xff]  ;;  %2842 = vmatpush1.bf16.msra.mxu0 %v6187_v43 }
  0x19   :  { %v6196_v45 = vcombine.high %v205_v40, %v209_v41  ;;  %v85_v46 = vld [vmem:[%s10013_s1 + $0x180] sm:$0xff]  ;;  %2802 = vmatprep.subr.bf16.mxu1 %v6068_v44  ;;  %v6195_v51 = vcombine.low %v205_v40, %v209_v41 }
  0x1a   :  { %v89_v47 = vld [vmem:[%s10013_s1 + $0x1a0] sm:$0xff]  ;;  %2803 = vmatpush1.bf16.msra.mxu1 %v6067_v50 }
  0x1b   :  { %v213_v48 = vld [vmem:[%s10013_s1 + $0x580] sm:$0xff]  ;;  %v6076_v52 = vcombine.high %v85_v46, %v89_v47  ;;  %2843 = vmatprep.subr.bf16.mxu0 %v6196_v45  ;;  %v6075_v62 = vcombine.low %v85_v46, %v89_v47 }
  0x1c   :  { %v217_v49 = vld [vmem:[%s10013_s1 + $0x5a0] sm:$0xff]  ;;  %2844 = vmatpush1.bf16.msra.mxu0 %v6195_v51 }
  0x1d   :  { %v7566_v53 = vld [vmem:[%s10014_s0] sm:$0xff]  ;;  %v6204_v55 = vcombine.high %v213_v48, %v217_v49  ;;  %2804 = vmatprep.subr.bf16.mxu1 %v6076_v52  ;;  %v6203_v63 = vcombine.low %v213_v48, %v217_v49 }
  0x1e   :  { %v93_v56 = vld [vmem:[%s10013_s1 + $0x1c0] sm:$0xff]  ;;  %v7581_v58 = vcombine.high %v7566_v53, %v7566_v53  ;;  %2805 = vmatpush1.bf16.msra.mxu1 %v6075_v62 }
  0x1f   :  { %v97_v57 = vld [vmem:[%s10013_s1 + $0x1e0] sm:$0xff]  ;;  %2845 = vmatprep.subr.bf16.mxu0 %v6204_v55 }
  0x20   :  { %v221_v59 = vld [vmem:[%s10013_s1 + $0x5c0] sm:$0xff]  ;;  %2824 = vmatprep.mubr.bf16.mxu1 %v7581_v58  ;;  %v6084_v0 = vcombine.high %v93_v56, %v97_v57  ;;  %v6083_v6 = vcombine.low %v93_v56, %v97_v57  ;;  %2846 = vmatpush1.bf16.msra.mxu0 %v6203_v63 }
  0x21   :  { %v225_v60 = vld [vmem:[%s10013_s1 + $0x5e0] sm:$0xff] }
  0x22   :  { %v6212_v1 = vcombine.high %v221_v59, %v225_v60  ;;  %v101_v2 = vld [vmem:[%s10013_s1 + $0x200] sm:$0xff]  ;;  %2806 = vmatprep.subr.bf16.mxu1 %v6084_v0  ;;  %v6211_v7 = vcombine.low %v221_v59, %v225_v60 }
  0x23   :  { %v105_v3 = vld [vmem:[%s10013_s1 + $0x220] sm:$0xff]  ;;  %2807 = vmatpush1.bf16.msra.mxu1 %v6083_v6  ;;  %v38_v6 = vld [vmem:[%s10013_s1 + $0x8] sm:$0xff] }
  0x24   :  { %v229_v4 = vld [vmem:[%s10013_s1 + $0x600] sm:$0xff]  ;;  %v6092_v8 = vcombine.high %v101_v2, %v105_v3  ;;  %2847 = vmatprep.subr.bf16.mxu0 %v6212_v1  ;;  %v6091_v14 = vcombine.low %v101_v2, %v105_v3 }
  0x25   :  { %v233_v5 = vld [vmem:[%s10013_s1 + $0x620] sm:$0xff]  ;;  %2848 = vmatpush1.bf16.msra.mxu0 %v6211_v7  ;;  %v42_v7 = vld [vmem:[%s10013_s1 + $0x28] sm:$0xff] }
  0x26   :  { %v6220_v9 = vcombine.high %v229_v4, %v233_v5  ;;  %v109_v10 = vld [vmem:[%s10013_s1 + $0x240] sm:$0xff]  ;;  %2808 = vmatprep.subr.bf16.mxu1 %v6092_v8  ;;  %v6219_v15 = vcombine.low %v229_v4, %v233_v5 }
  0x27   :  { %v113_v11 = vld [vmem:[%s10013_s1 + $0x260] sm:$0xff]  ;;  %2809 = vmatpush1.bf16.msra.mxu1 %v6091_v14  ;;  %v46_v14 = vld [vmem:[%s10013_s1 + $0x48] sm:$0xff] }
  0x28   :  { %v237_v12 = vld [vmem:[%s10013_s1 + $0x640] sm:$0xff]  ;;  %v6100_v16 = vcombine.high %v109_v10, %v113_v11  ;;  %2849 = vmatprep.subr.bf16.mxu0 %v6220_v9  ;;  %v6099_v22 = vcombine.low %v109_v10, %v113_v11 }
  0x29   :  { %v241_v13 = vld [vmem:[%s10013_s1 + $0x660] sm:$0xff]  ;;  %2850 = vmatpush1.bf16.msra.mxu0 %v6219_v15  ;;  %v50_v15 = vld [vmem:[%s10013_s1 + $0x68] sm:$0xff] }
  0x2a   :  { %v6228_v17 = vcombine.high %v237_v12, %v241_v13  ;;  %v117_v18 = vld [vmem:[%s10013_s1 + $0x280] sm:$0xff]  ;;  %2810 = vmatprep.subr.bf16.mxu1 %v6100_v16  ;;  %v6227_v23 = vcombine.low %v237_v12, %v241_v13  ;;  %v6030_v12 = vcombine.high %v38_v6, %v42_v7  ;;  %v7711_v16 = vcombine.low %v7566_v53, %v7566_v53 }
  0x2b   :  { %v121_v19 = vld [vmem:[%s10013_s1 + $0x2a0] sm:$0xff]  ;;  %2811 = vmatpush1.bf16.msra.mxu1 %v6099_v22  ;;  %v6038_v22 = vcombine.high %v46_v14, %v50_v15 }
  0x2c   :  { %v245_v20 = vld [vmem:[%s10013_s1 + $0x680] sm:$0xff]  ;;  %v6108_v24 = vcombine.high %v117_v18, %v121_v19  ;;  %2851 = vmatprep.subr.bf16.mxu0 %v6228_v17  ;;  %v6107_v30 = vcombine.low %v117_v18, %v121_v19  ;;  %v7722_v19 = vld [vmem:[%s10014_s0 + $0x10] sm:$0xff] }
  0x2d   :  { %v249_v21 = vld [vmem:[%s10013_s1 + $0x6a0] sm:$0xff]  ;;  %2852 = vmatpush1.bf16.msra.mxu0 %v6227_v23 }
  0x2e   :  { %v6236_v25 = vcombine.high %v245_v20, %v249_v21  ;;  %v125_v26 = vld [vmem:[%s10013_s1 + $0x2c0] sm:$0xff]  ;;  %2812 = vmatprep.subr.bf16.mxu1 %v6108_v24  ;;  %v6235_v31 = vcombine.low %v245_v20, %v249_v21  ;;  %v6029_v20 = vcombine.low %v38_v6, %v42_v7  ;;  %v7726_v21 = vcombine.low %v7571_v54, %v7571_v54  ;;  %v54_v24 = vld [vmem:[%s10013_s1 + $0x88] sm:$0xff] }
  0x2f   :  { %v129_v27 = vld [vmem:[%s10013_s1 + $0x2e0] sm:$0xff]  ;;  %2813 = vmatpush1.bf16.msra.mxu1 %v6107_v30 }
  0x30   :  { %v253_v28 = vld [vmem:[%s10013_s1 + $0x6c0] sm:$0xff]  ;;  %v6116_v32 = vcombine.high %v125_v26, %v129_v27  ;;  %2853 = vmatprep.subr.bf16.mxu0 %v6236_v25  ;;  %v6115_v38 = vcombine.low %v125_v26, %v129_v27  ;;  %v58_v25 = vld [vmem:[%s10013_s1 + $0xa8] sm:$0xff]  ;;  %v7736_v26 = vcombine.high %v7722_v19, %v7722_v19 }
  0x31   :  { %v257_v29 = vld [vmem:[%s10013_s1 + $0x6e0] sm:$0xff]  ;;  %2854 = vmatpush1.bf16.msra.mxu0 %v6235_v31  ;;  %v6046_v30 = vcombine.high %v54_v24, %v58_v25 }
  0x32   :  { %v6244_v33 = vcombine.high %v253_v28, %v257_v29  ;;  %v133_v34 = vld [vmem:[%s10013_s1 + $0x300] sm:$0xff]  ;;  %2814 = vmatprep.subr.bf16.mxu1 %v6116_v32  ;;  %v6243_v39 = vcombine.low %v253_v28, %v257_v29  ;;  %v6037_v28 = vcombine.low %v46_v14, %v50_v15  ;;  %v62_v32 = vld [vmem:[%s10013_s1 + $0xc8] sm:$0xff] }
  0x33   :  { %v137_v35 = vld [vmem:[%s10013_s1 + $0x320] sm:$0xff]  ;;  %2815 = vmatpush1.bf16.msra.mxu1 %v6115_v38 }
  0x34   :  { %v261_v36 = vld [vmem:[%s10013_s1 + $0x700] sm:$0xff]  ;;  %v6124_v40 = vcombine.high %v133_v34, %v137_v35  ;;  %2855 = vmatprep.subr.bf16.mxu0 %v6244_v33  ;;  %v6123_v46 = vcombine.low %v133_v34, %v137_v35  ;;  %v66_v33 = vld [vmem:[%s10013_s1 + $0xe8] sm:$0xff] }
  0x35   :  { %v265_v37 = vld [vmem:[%s10013_s1 + $0x720] sm:$0xff]  ;;  %2856 = vmatpush1.bf16.msra.mxu0 %v6243_v39  ;;  %v6054_v38 = vcombine.high %v62_v32, %v66_v33 }
  0x36   :  { %v6252_v41 = vcombine.high %v261_v36, %v265_v37  ;;  %v141_v42 = vld [vmem:[%s10013_s1 + $0x340] sm:$0xff]  ;;  %2816 = vmatprep.subr.bf16.mxu1 %v6124_v40  ;;  %v6251_v47 = vcombine.low %v261_v36, %v265_v37  ;;  %v6045_v36 = vcombine.low %v54_v24, %v58_v25  ;;  %v70_v40 = vld [vmem:[%s10013_s1 + $0x108] sm:$0xff] }
  0x37   :  { %v145_v43 = vld [vmem:[%s10013_s1 + $0x360] sm:$0xff]  ;;  %2817 = vmatpush1.bf16.msra.mxu1 %v6123_v46 }
  0x38   :  { %v269_v44 = vld [vmem:[%s10013_s1 + $0x740] sm:$0xff]  ;;  %v6132_v48 = vcombine.high %v141_v42, %v145_v43  ;;  %2857 = vmatprep.subr.bf16.mxu0 %v6252_v41  ;;  %v6131_v56 = vcombine.low %v141_v42, %v145_v43  ;;  %v74_v41 = vld [vmem:[%s10013_s1 + $0x128] sm:$0xff] }
  0x39   :  { %v273_v45 = vld [vmem:[%s10013_s1 + $0x760] sm:$0xff]  ;;  %2858 = vmatpush1.bf16.msra.mxu0 %v6251_v47  ;;  %v6062_v46 = vcombine.high %v70_v40, %v74_v41 }
  0x3a   :  { %v6260_v49 = vcombine.high %v269_v44, %v273_v45  ;;  %v149_v50 = vld [vmem:[%s10013_s1 + $0x380] sm:$0xff]  ;;  %2818 = vmatprep.subr.bf16.mxu1 %v6132_v48  ;;  %v6259_v57 = vcombine.low %v269_v44, %v273_v45  ;;  %v6053_v44 = vcombine.low %v62_v32, %v66_v33  ;;  %v78_v48 = vld [vmem:[%s10013_s1 + $0x148] sm:$0xff] }
  0x3b   :  { %v153_v51 = vld [vmem:[%s10013_s1 + $0x3a0] sm:$0xff]  ;;  %2819 = vmatpush1.bf16.msra.mxu1 %v6131_v56 }
  0x3c   :  { %v277_v52 = vld [vmem:[%s10013_s1 + $0x780] sm:$0xff]  ;;  %v6140_v59 = vcombine.high %v149_v50, %v153_v51  ;;  %2859 = vmatprep.subr.bf16.mxu0 %v6260_v49  ;;  %v6139_v2 = vcombine.low %v149_v50, %v153_v51  ;;  %v82_v49 = vld [vmem:[%s10013_s1 + $0x168] sm:$0xff] }
  0x3d   :  { %v281_v55 = vld [vmem:[%s10013_s1 + $0x7a0] sm:$0xff]  ;;  %2860 = vmatpush1.bf16.msra.mxu0 %v6259_v57  ;;  %v6070_v56 = vcombine.high %v78_v48, %v82_v49 }
  0x3e   :  { %v6268_v60 = vcombine.high %v277_v52, %v281_v55  ;;  %v157_v62 = vld [vmem:[%s10013_s1 + $0x3c0] sm:$0xff]  ;;  %2820 = vmatprep.subr.bf16.mxu1 %v6140_v59  ;;  %v6267_v3 = vcombine.low %v277_v52, %v281_v55  ;;  %v6061_v52 = vcombine.low %v70_v40, %v74_v41  ;;  %v86_v59 = vld [vmem:[%s10013_s1 + $0x188] sm:$0xff] }
  0x3f   :  { %v161_v63 = vld [vmem:[%s10013_s1 + $0x3e0] sm:$0xff]  ;;  %2821 = vmatpush1.bf16.msra.mxu1 %v6139_v2 }
  0x40   :  { %v285_v0 = vld [vmem:[%s10013_s1 + $0x7c0] sm:$0xff]  ;;  %v6148_v4 = vcombine.high %v157_v62, %v161_v63  ;;  %2861 = vmatprep.subr.bf16.mxu0 %v6268_v60  ;;  %v6147_v10 = vcombine.low %v157_v62, %v161_v63  ;;  %v90_v60 = vld [vmem:[%s10013_s1 + $0x1a8] sm:$0xff] }
  0x41   :  { %v289_v1 = vld [vmem:[%s10013_s1 + $0x7e0] sm:$0xff]  ;;  %2862 = vmatpush1.bf16.msra.mxu0 %v6267_v3  ;;  %v6078_v2 = vcombine.high %v86_v59, %v90_v60 }
  0x42   :  { %v6276_v5 = vcombine.high %v285_v0, %v289_v1  ;;  %v293_v8 = vld [vmem:[%s10013_s1 + $0x800] sm:$0xff]  ;;  %2822 = vmatprep.subr.bf16.mxu1 %v6148_v4  ;;  %v6275_v11 = vcombine.low %v285_v0, %v289_v1  ;;  %v6069_v0 = vcombine.low %v78_v48, %v82_v49  ;;  %v94_v4 = vld [vmem:[%s10013_s1 + $0x1c8] sm:$0xff] }
  0x43   :  { %v297_v9 = vld [vmem:[%s10013_s1 + $0x820] sm:$0xff]  ;;  %2823 = vmatpush1.bf16.msra.mxu1 %v6147_v10 }
  0x44   :  { %2863 = vmatprep.subr.bf16.mxu0 %v6276_v5  ;;  %v6284_v13 = vcombine.high %v293_v8, %v297_v9  ;;  %v301_v17 = vld [vmem:[%s10013_s1 + $0x840] sm:$0xff]  ;;  %v6283_v53 = vcombine.low %v293_v8, %v297_v9  ;;  %2956 = vmatprep.subr.bf16.mxu1 %v6030_v12  ;;  %v98_v5 = vld [vmem:[%s10013_s1 + $0x1e8] sm:$0xff]  ;;  %v6077_v8 = vcombine.low %v86_v59, %v90_v60 }
  0x45   :  { %v305_v18 = vld [vmem:[%s10013_s1 + $0x860] sm:$0xff]  ;;  %2864 = vmatpush1.bf16.msra.mxu0 %v6275_v11  ;;  %v6086_v10 = vcombine.high %v94_v4, %v98_v5  ;;  %v102_v12 = vld [vmem:[%s10013_s1 + $0x208] sm:$0xff] }
  0x46   :  { %2874 = vmatprep.subr.bf16.mxu0 %v6284_v13  ;;  %v6292_v23 = vcombine.high %v301_v17, %v305_v18  ;;  %2825 = vmatmul.mubr.bf16.vlgmr.msra.gmra.mrb[0].mxu1 %v7711_v16  ;;  %v309_v54 = vld [vmem:[%s10013_s1 + $0x880] sm:$0xff]  ;;  %v6291_v29 = vcombine.low %v301_v17, %v305_v18  ;;  %v106_v13 = vld [vmem:[%s10013_s1 + $0x228] sm:$0xff]  ;;  %v6085_v17 = vcombine.low %v94_v4, %v98_v5 }
  0x47   :  { %v313_v27 = vld [vmem:[%s10013_s1 + $0x8a0] sm:$0xff]  ;;  %2957 = vmatpush1.bf16.msra.mxu1 %v6029_v20  ;;  %2988 = vmatprep.mubr.bf16.mxu1 %v7581_v58  ;;  %v6094_v20 = vcombine.high %v102_v12, %v106_v13 }
  0x48   :  { %2866 = vmatmul.mubr.bf16.vlgmr.msra.gmra.mrb[0].mxu0 %v7726_v21  ;;  %2958 = vmatprep.subr.bf16.mxu1 %v6038_v22  ;;  %v6300_v31 = vcombine.high %v309_v54, %v313_v27  ;;  %v317_v34 = vld [vmem:[%s10013_s1 + $0x8c0] sm:$0xff]  ;;  %v6299_v37 = vcombine.low %v309_v54, %v313_v27  ;;  %v110_v22 = vld [vmem:[%s10013_s1 + $0x248] sm:$0xff]  ;;  %v6093_v54 = vcombine.low %v102_v12, %v106_v13 }
  0x49   :  { %2875 = vmatpush1.bf16.msra.mxu0 %v6283_v53  ;;  %2906 = vmatprep.mubr.bf16.mxu0 %v7736_v26  ;;  %v321_v35 = vld [vmem:[%s10013_s1 + $0x8e0] sm:$0xff] }
  0x4a   :  { %2876 = vmatprep.subr.bf16.mxu0 %v6292_v23  ;;  %v6308_v39 = vcombine.high %v317_v34, %v321_v35  ;;  %v325_v42 = vld [vmem:[%s10013_s1 + $0x900] sm:$0xff]  ;;  %v6307_v45 = vcombine.low %v317_v34, %v321_v35  ;;  %v114_v23 = vld [vmem:[%s10013_s1 + $0x268] sm:$0xff] }
  0x4b   :  { %2959 = vmatpush1.bf16.msra.mxu1 %v6037_v28  ;;  %v329_v43 = vld [vmem:[%s10013_s1 + $0x920] sm:$0xff]  ;;  %v6102_v28 = vcombine.high %v110_v22, %v114_v23  ;;  %v6101_v34 = vcombine.low %v110_v22, %v114_v23 }
  0x4c   :  { %2960 = vmatprep.subr.bf16.mxu1 %v6046_v30  ;;  %v6316_v47 = vcombine.high %v325_v42, %v329_v43  ;;  %v333_v50 = vld [vmem:[%s10013_s1 + $0x940] sm:$0xff]  ;;  %v6315_v55 = vcombine.low %v325_v42, %v329_v43  ;;  %v118_v30 = vld [vmem:[%s10013_s1 + $0x288] sm:$0xff] }
  0x4d   :  { %2877 = vmatpush1.bf16.msra.mxu0 %v6291_v29  ;;  %v337_v51 = vld [vmem:[%s10013_s1 + $0x960] sm:$0xff] }
  0x4e   :  { %2878 = vmatprep.subr.bf16.mxu0 %v6300_v31  ;;  %v6324_v57 = vcombine.high %v333_v50, %v337_v51  ;;  %v341_v62 = vld [vmem:[%s10013_s1 + $0x980] sm:$0xff]  ;;  %v6323_v1 = vcombine.low %v333_v50, %v337_v51  ;;  %v122_v31 = vld [vmem:[%s10013_s1 + $0x2a8] sm:$0xff] }
  0x4f   :  { %2961 = vmatpush1.bf16.msra.mxu1 %v6045_v36  ;;  %v345_v63 = vld [vmem:[%s10013_s1 + $0x9a0] sm:$0xff]  ;;  %v6110_v36 = vcombine.high %v118_v30, %v122_v31  ;;  %v6109_v42 = vcombine.low %v118_v30, %v122_v31 }
  0x50   :  { %2962 = vmatprep.subr.bf16.mxu1 %v6054_v38  ;;  %v6332_v3 = vcombine.high %v341_v62, %v345_v63  ;;  %v349_v6 = vld [vmem:[%s10013_s1 + $0x9c0] sm:$0xff]  ;;  %v6331_v9 = vcombine.low %v341_v62, %v345_v63  ;;  %v126_v38 = vld [vmem:[%s10013_s1 + $0x2c8] sm:$0xff] }
  0x51   :  { %2879 = vmatpush1.bf16.msra.mxu0 %v6299_v37  ;;  %v353_v7 = vld [vmem:[%s10013_s1 + $0x9e0] sm:$0xff] }
  0x52   :  { %2880 = vmatprep.subr.bf16.mxu0 %v6308_v39  ;;  %v6340_v11 = vcombine.high %v349_v6, %v353_v7  ;;  %v357_v14 = vld [vmem:[%s10013_s1 + $0xa00] sm:$0xff]  ;;  %v6339_v18 = vcombine.low %v349_v6, %v353_v7  ;;  %v130_v39 = vld [vmem:[%s10013_s1 + $0x2e8] sm:$0xff] }
  0x53   :  { %2963 = vmatpush1.bf16.msra.mxu1 %v6053_v44  ;;  %v361_v15 = vld [vmem:[%s10013_s1 + $0xa20] sm:$0xff]  ;;  %v6118_v44 = vcombine.high %v126_v38, %v130_v39  ;;  %v6117_v50 = vcombine.low %v126_v38, %v130_v39  ;;  %v186_v38 = vld [vmem:[%s10013_s1 + $0x4a8] sm:$0xff] }
  0x54   :  { %2964 = vmatprep.subr.bf16.mxu1 %v6062_v46  ;;  %v6348_v53 = vcombine.high %v357_v14, %v361_v15  ;;  %v365_v24 = vld [vmem:[%s10013_s1 + $0xa40] sm:$0xff]  ;;  %v6347_v27 = vcombine.low %v357_v14, %v361_v15  ;;  %v134_v46 = vld [vmem:[%s10013_s1 + $0x308] sm:$0xff] }
  0x55   :  { %2881 = vmatpush1.bf16.msra.mxu0 %v6307_v45  ;;  %v369_v25 = vld [vmem:[%s10013_s1 + $0xa60] sm:$0xff] }
  0x56   :  { %2882 = vmatprep.subr.bf16.mxu0 %v6316_v47  ;;  %v6356_v29 = vcombine.high %v365_v24, %v369_v25  ;;  %v373_v32 = vld [vmem:[%s10013_s1 + $0xa80] sm:$0xff]  ;;  %v6355_v35 = vcombine.low %v365_v24, %v369_v25  ;;  %v138_v47 = vld [vmem:[%s10013_s1 + $0x328] sm:$0xff] }
  0x57   :  { %2965 = vmatpush1.bf16.msra.mxu1 %v6061_v52  ;;  %v377_v33 = vld [vmem:[%s10013_s1 + $0xaa0] sm:$0xff]  ;;  %v6126_v52 = vcombine.high %v134_v46, %v138_v47  ;;  %v6125_v62 = vcombine.low %v134_v46, %v138_v47  ;;  %v7428_v46 = vmov 0  }
  0x58   :  { %2966 = vmatprep.subr.bf16.mxu1 %v6070_v56  ;;  %v6364_v37 = vcombine.high %v373_v32, %v377_v33  ;;  %v381_v40 = vld [vmem:[%s10013_s1 + $0xac0] sm:$0xff]  ;;  %v6363_v43 = vcombine.low %v373_v32, %v377_v33  ;;  %v142_v56 = vld [vmem:[%s10013_s1 + $0x348] sm:$0xff]  ;;  %v7930_v33 = vcombine.low %v7722_v19, %v7722_v19 }
  0x59   :  { %2883 = vmatpush1.bf16.msra.mxu0 %v6315_v55  ;;  %v385_v41 = vld [vmem:[%s10013_s1 + $0xae0] sm:$0xff] }
  0x5a   :  { %2884 = vmatprep.subr.bf16.mxu0 %v6324_v57  ;;  %v6372_v45 = vcombine.high %v381_v40, %v385_v41  ;;  %v389_v48 = vld [vmem:[%s10013_s1 + $0xb00] sm:$0xff]  ;;  %v6371_v51 = vcombine.low %v381_v40, %v385_v41  ;;  %v146_v57 = vld [vmem:[%s10013_s1 + $0x368] sm:$0xff] }
  0x5b   :  { %2967 = vmatpush1.bf16.msra.mxu1 %v6069_v0  ;;  %v393_v49 = vld [vmem:[%s10013_s1 + $0xb20] sm:$0xff]  ;;  %v6134_v0 = vcombine.high %v142_v56, %v146_v57  ;;  %v6133_v6 = vcombine.low %v142_v56, %v146_v57  ;;  %v202_v56 = vld [vmem:[%s10013_s1 + $0x528] sm:$0xff] }
  0x5c   :  { %2968 = vmatprep.subr.bf16.mxu1 %v6078_v2  ;;  %v6380_v55 = vcombine.high %v389_v48, %v393_v49  ;;  %v397_v59 = vld [vmem:[%s10013_s1 + $0xb40] sm:$0xff]  ;;  %v6379_v63 = vcombine.low %v389_v48, %v393_v49  ;;  %v150_v2 = vld [vmem:[%s10013_s1 + $0x388] sm:$0xff] }
  0x5d   :  { %2885 = vmatpush1.bf16.msra.mxu0 %v6323_v1  ;;  %v401_v60 = vld [vmem:[%s10013_s1 + $0xb60] sm:$0xff] }
  0x5e   :  { %2886 = vmatprep.subr.bf16.mxu0 %v6332_v3  ;;  %v6388_v1 = vcombine.high %v397_v59, %v401_v60  ;;  %v154_v3 = vld [vmem:[%s10013_s1 + $0x3a8] sm:$0xff]  ;;  %v405_v4 = vld [vmem:[%s10013_s1 + $0xb80] sm:$0xff]  ;;  %v6387_v7 = vcombine.low %v397_v59, %v401_v60 }
  0x5f   :  { %2969 = vmatpush1.bf16.msra.mxu1 %v6077_v8  ;;  %v409_v5 = vld [vmem:[%s10013_s1 + $0xba0] sm:$0xff]  ;;  %v6142_v8 = vcombine.high %v150_v2, %v154_v3  ;;  %v6141_v14 = vcombine.low %v150_v2, %v154_v3  ;;  %v210_v2 = vld [vmem:[%s10013_s1 + $0x568] sm:$0xff] }
  0x60   :  { %2970 = vmatprep.subr.bf16.mxu1 %v6086_v10  ;;  %v158_v10 = vld [vmem:[%s10013_s1 + $0x3c8] sm:$0xff]  ;;  %v413_v12 = vld [vmem:[%s10013_s1 + $0xbc0] sm:$0xff]  ;;  %v6395_v15 = vcombine.low %v405_v4, %v409_v5 }
  0x61   :  { %2887 = vmatpush1.bf16.msra.mxu0 %v6331_v9  ;;  %v6396_v9 = vcombine.high %v405_v4, %v409_v5  ;;  %v417_v13 = vld [vmem:[%s10013_s1 + $0xbe0] sm:$0xff] }
  0x62   :  { %2888 = vmatprep.subr.bf16.mxu0 %v6340_v11  ;;  %v162_v11 = vld [vmem:[%s10013_s1 + $0x3e8] sm:$0xff]  ;;  %v421_v22 = vld [vmem:[%s10013_s1 + $0xc00] sm:$0xff]  ;;  %v6403_v25 = vcombine.low %v413_v12, %v417_v13 }
  0x63   :  { %2971 = vmatpush1.bf16.msra.mxu1 %v6085_v17  ;;  %v6150_v17 = vcombine.high %v158_v10, %v162_v11  ;;  %v425_v23 = vld [vmem:[%s10013_s1 + $0xc20] sm:$0xff]  ;;  %v6149_v24 = vcombine.low %v158_v10, %v162_v11  ;;  %v218_v10 = vld [vmem:[%s10013_s1 + $0x5a8] sm:$0xff] }
  0x64   :  { %2972 = vmatprep.subr.bf16.mxu1 %v6094_v20  ;;  %v166_v20 = vld [vmem:[%s10013_s1 + $0x408] sm:$0xff]  ;;  %v429_v30 = vld [vmem:[%s10013_s1 + $0xc40] sm:$0xff] }
  0x65   :  { %2889 = vmatpush1.bf16.msra.mxu0 %v6339_v18  ;;  %v6404_v18 = vcombine.high %v413_v12, %v417_v13  ;;  %v433_v31 = vld [vmem:[%s10013_s1 + $0xc60] sm:$0xff] }
  0x66   :  { %2890 = vmatprep.subr.bf16.mxu0 %v6348_v53  ;;  %v170_v53 = vld [vmem:[%s10013_s1 + $0x428] sm:$0xff]  ;;  %v437_v19 = vld [vmem:[%s10013_s1 + $0xc80] sm:$0xff]  ;;  %v6419_v41 = vcombine.low %v429_v30, %v433_v31 }
  0x67   :  { %2973 = vmatpush1.bf16.msra.mxu1 %v6093_v54  ;;  %v6158_v54 = vcombine.high %v166_v20, %v170_v53  ;;  %v6157_v32 = vcombine.low %v166_v20, %v170_v53  ;;  %v441_v39 = vld [vmem:[%s10013_s1 + $0xca0] sm:$0xff]  ;;  %v226_v20 = vld [vmem:[%s10013_s1 + $0x5e8] sm:$0xff] }
  0x68   :  { %2974 = vmatprep.subr.bf16.mxu1 %v6102_v28  ;;  %v174_v28 = vld [vmem:[%s10013_s1 + $0x448] sm:$0xff]  ;;  %v445_v47 = vld [vmem:[%s10013_s1 + $0xcc0] sm:$0xff] }
  0x69   :  { %2891 = vmatpush1.bf16.msra.mxu0 %v6347_v27  ;;  %v6412_v27 = vcombine.high %v421_v22, %v425_v23  ;;  %v449_v48 = vld [vmem:[%s10013_s1 + $0xce0] sm:$0xff] }
  0x6a   :  { %2892 = vmatprep.subr.bf16.mxu0 %v6356_v29  ;;  %v178_v29 = vld [vmem:[%s10013_s1 + $0x468] sm:$0xff]  ;;  %v453_v57 = vld [vmem:[%s10013_s1 + $0xd00] sm:$0xff] }
  0x6b   :  { %2975 = vmatpush1.bf16.msra.mxu1 %v6101_v34  ;;  %v6411_v34 = vcombine.low %v421_v22, %v425_v23  ;;  %v6165_v40 = vcombine.low %v174_v28, %v178_v29  ;;  %v457_v59 = vld [vmem:[%s10013_s1 + $0xd20] sm:$0xff] }
  0x6c   :  { %2976 = vmatprep.subr.bf16.mxu1 %v6110_v36  ;;  %v6420_v36 = vcombine.high %v429_v30, %v433_v31  ;;  %v461_v3 = vld [vmem:[%s10013_s1 + $0xd40] sm:$0xff]  ;;  %v43_v30 = vld [vmem:[%s10013_s1 + $0x30] sm:$0xff] }
  0x6d   :  { %2893 = vmatpush1.bf16.msra.mxu0 %v6355_v35  ;;  %v6166_v35 = vcombine.high %v174_v28, %v178_v29  ;;  %v465_v4 = vld [vmem:[%s10013_s1 + $0xd60] sm:$0xff]  ;;  %v234_v28 = vld [vmem:[%s10013_s1 + $0x628] sm:$0xff]  ;;  %v39_v29 = vld [vmem:[%s10013_s1 + $0x10] sm:$0xff] }
  0x6e   :  { %2894 = vmatprep.subr.bf16.mxu0 %v6364_v37  ;;  %v182_v37 = vld [vmem:[%s10013_s1 + $0x488] sm:$0xff]  ;;  %v469_v11 = vld [vmem:[%s10013_s1 + $0xd80] sm:$0xff] }
  0x6f   :  { %2977 = vmatpush1.bf16.msra.mxu1 %v6109_v42  ;;  %v6174_v42 = vcombine.high %v182_v37, %v186_v38  ;;  %v6173_v49 = vcombine.low %v182_v37, %v186_v38  ;;  %v473_v12 = vld [vmem:[%s10013_s1 + $0xda0] sm:$0xff]  ;;  %v242_v37 = vld [vmem:[%s10013_s1 + $0x668] sm:$0xff]  ;;  %v47_v38 = vld [vmem:[%s10013_s1 + $0x50] sm:$0xff] }
  0x70   :  { %2978 = vmatprep.subr.bf16.mxu1 %v6118_v44  ;;  %v190_v44 = vld [vmem:[%s10013_s1 + $0x4c8] sm:$0xff]  ;;  %v477_v53 = vld [vmem:[%s10013_s1 + $0xdc0] sm:$0xff] }
  0x71   :  { %2895 = vmatpush1.bf16.msra.mxu0 %v6363_v43  ;;  %v6428_v43 = vcombine.high %v437_v19, %v441_v39  ;;  %v481_v22 = vld [vmem:[%s10013_s1 + $0xde0] sm:$0xff] }
  0x72   :  { %2896 = vmatprep.subr.bf16.mxu0 %v6372_v45  ;;  %v194_v45 = vld [vmem:[%s10013_s1 + $0x4e8] sm:$0xff] }
  0x73   :  { %2979 = vmatpush1.bf16.msra.mxu1 %v6117_v50  ;;  %v6427_v50 = vcombine.low %v437_v19, %v441_v39  ;;  %v6181_v60 = vcombine.low %v190_v44, %v194_v45  ;;  %v51_v19 = vld [vmem:[%s10013_s1 + $0x70] sm:$0xff]  ;;  %v8035_v39 = vld [vmem:[%s10014_s0 + $0x18] ss:$0 sps:$4 sm:$0xff]  }
  0x74   :  { %2980 = vmatprep.subr.bf16.mxu1 %v6126_v52  ;;  %v6436_v52 = vcombine.high %v445_v47, %v449_v48 }
  0x75   :  { %2897 = vmatpush1.bf16.msra.mxu0 %v6371_v51  ;;  %v6182_v51 = vcombine.high %v190_v44, %v194_v45  ;;  %v246_v44 = vld [vmem:[%s10013_s1 + $0x688] sm:$0xff] }
  0x76   :  { %2898 = vmatprep.subr.bf16.mxu0 %v6380_v55  ;;  %v198_v55 = vld [vmem:[%s10013_s1 + $0x508] sm:$0xff] }
  0x77   :  { %2981 = vmatpush1.bf16.msra.mxu1 %v6125_v62  ;;  %v6435_v62 = vcombine.low %v445_v47, %v449_v48  ;;  %v6189_v5 = vcombine.low %v198_v55, %v202_v56  ;;  %v250_v45 = vld [vmem:[%s10013_s1 + $0x6a8] sm:$0xff]  ;;  %v55_v47 = vld [vmem:[%s10013_s1 + $0x90] sm:$0xff] }
  0x78   :  { %2982 = vmatprep.subr.bf16.mxu1 %v6134_v0  ;;  %v6444_v0 = vcombine.high %v453_v57, %v457_v59  ;;  %v59_v48 = vld [vmem:[%s10013_s1 + $0xb0] sm:$0xff] }
  0x79   :  { %2899 = vmatpush1.bf16.msra.mxu0 %v6379_v63  ;;  %v6190_v63 = vcombine.high %v198_v55, %v202_v56  ;;  %v254_v55 = vld [vmem:[%s10013_s1 + $0x6c8] sm:$0xff] }
  0x7a   :  { %2900 = vmatprep.subr.bf16.mxu0 %v6388_v1  ;;  %v206_v1 = vld [vmem:[%s10013_s1 + $0x548] sm:$0xff] }
  0x7b   :  { %2983 = vmatpush1.bf16.msra.mxu1 %v6133_v6  ;;  %v6443_v6 = vcombine.low %v453_v57, %v457_v59  ;;  %v6197_v13 = vcombine.low %v206_v1, %v210_v2  ;;  %v258_v56 = vld [vmem:[%s10013_s1 + $0x6e8] sm:$0xff]  ;;  %v63_v57 = vld [vmem:[%s10013_s1 + $0xd0] sm:$0xff] }
  0x7c   :  { %2984 = vmatprep.subr.bf16.mxu1 %v6142_v8  ;;  %v6452_v8 = vcombine.high %v461_v3, %v465_v4  ;;  %v67_v59 = vld [vmem:[%s10013_s1 + $0xf0] sm:$0xff] }
  0x7d   :  { %2901 = vmatpush1.bf16.msra.mxu0 %v6387_v7  ;;  %v6198_v7 = vcombine.high %v206_v1, %v210_v2  ;;  %v262_v1 = vld [vmem:[%s10013_s1 + $0x708] sm:$0xff] }
  0x7e   :  { %2902 = vmatprep.subr.bf16.mxu0 %v6396_v9  ;;  %v214_v9 = vld [vmem:[%s10013_s1 + $0x588] sm:$0xff] }
  0x7f   :  { %2985 = vmatpush1.bf16.msra.mxu1 %v6141_v14  ;;  %v6451_v14 = vcombine.low %v461_v3, %v465_v4  ;;  %v6205_v23 = vcombine.low %v214_v9, %v218_v10  ;;  %v266_v2 = vld [vmem:[%s10013_s1 + $0x728] sm:$0xff]  ;;  %v71_v3 = vld [vmem:[%s10013_s1 + $0x110] sm:$0xff] }
  0x80   :  { %2986 = vmatprep.subr.bf16.mxu1 %v6150_v17  ;;  %v6460_v17 = vcombine.high %v469_v11, %v473_v12  ;;  %v75_v4 = vld [vmem:[%s10013_s1 + $0x130] sm:$0xff] }
  0x81   :  { %2903 = vmatpush1.bf16.msra.mxu0 %v6395_v15  ;;  %v6206_v15 = vcombine.high %v214_v9, %v218_v10  ;;  %v270_v9 = vld [vmem:[%s10013_s1 + $0x748] sm:$0xff] }
  0x82   :  { %2904 = vmatprep.subr.bf16.mxu0 %v6404_v18  ;;  %v222_v18 = vld [vmem:[%s10013_s1 + $0x5c8] sm:$0xff] }
  0x83   :  { %2987 = vmatpush1.bf16.msra.mxu1 %v6149_v24  ;;  %v6459_v24 = vcombine.low %v469_v11, %v473_v12  ;;  %v6213_v31 = vcombine.low %v222_v18, %v226_v20  ;;  %v274_v10 = vld [vmem:[%s10013_s1 + $0x768] sm:$0xff]  ;;  %v79_v11 = vld [vmem:[%s10013_s1 + $0x150] sm:$0xff] }
  0x84   :  { %2997 = vmatprep.subr.bf16.mxu1 %v6158_v54  ;;  %v6468_v54 = vcombine.high %v477_v53, %v481_v22  ;;  %v83_v12 = vld [vmem:[%s10013_s1 + $0x170] sm:$0xff] }
  0x85   :  { %2905 = vmatpush1.bf16.msra.mxu0 %v6403_v25  ;;  %v6214_v25 = vcombine.high %v222_v18, %v226_v20  ;;  %v278_v18 = vld [vmem:[%s10013_s1 + $0x788] sm:$0xff] }
  0x86   :  { %2915 = vmatprep.subr.bf16.mxu0 %v6412_v27  ;;  %2989 = vmatmul.mubr.bf16.vlgmr.msra.gmra.mrb[4].mxu1 %v7711_v16  ;;  %v230_v27 = vld [vmem:[%s10013_s1 + $0x608] sm:$0xff] }
  0x87   :  { %2998 = vmatpush1.bf16.msra.mxu1 %v6157_v32  ;;  %3029 = vmatprep.mubr.bf16.mxu1 %v7591_v61  ;;  %v6467_v32 = vcombine.low %v477_v53, %v481_v22  ;;  %v282_v20 = vld [vmem:[%s10013_s1 + $0x7a8] sm:$0xff]  ;;  %v87_v53 = vld [vmem:[%s10013_s1 + $0x190] sm:$0xff] }
  0x88   :  { %2907 = vmatmul.mubr.bf16.vlgmr.msra.gmra.mrb[0].mxu0 %v7930_v33  ;;  %2999 = vmatprep.subr.bf16.mxu1 %v6166_v35  ;;  %v6032_v35 = vcombine.high %v39_v29, %v43_v30  ;;  %v91_v22 = vld [vmem:[%s10013_s1 + $0x1b0] sm:$0xff] }
  0x89   :  { %2916 = vmatpush1.bf16.msra.mxu0 %v6411_v34  ;;  %2947 = vmatprep.mubr.bf16.mxu0 %v7428_v46  ;;  %v6222_v34 = vcombine.high %v230_v27, %v234_v28 }
  0x8a   :  { %2917 = vmatprep.subr.bf16.mxu0 %v6420_v36  ;;  %v238_v36 = vld [vmem:[%s10013_s1 + $0x648] sm:$0xff] }
  0x8b   :  { %3000 = vmatpush1.bf16.msra.mxu1 %v6165_v40  ;;  %v6221_v40 = vcombine.low %v230_v27, %v234_v28  ;;  %v286_v27 = vld [vmem:[%s10013_s1 + $0x7c8] sm:$0xff] }
  0x8c   :  { %3001 = vmatprep.subr.bf16.mxu1 %v6174_v42  ;;  %v6230_v42 = vcombine.high %v238_v36, %v242_v37  ;;  %v290_v28 = vld [vmem:[%s10013_s1 + $0x7e8] sm:$0xff] }
  0x8d   :  { %2918 = vmatpush1.bf16.msra.mxu0 %v6419_v41  ;;  %v6031_v41 = vcombine.low %v39_v29, %v43_v30  ;;  %v95_v29 = vld [vmem:[%s10013_s1 + $0x1d0] sm:$0xff] }
  0x8e   :  { %2919 = vmatprep.subr.bf16.mxu0 %v6428_v43  ;;  %v6040_v43 = vcombine.high %v47_v38, %v51_v19  ;;  %v99_v30 = vld [vmem:[%s10013_s1 + $0x1f0] sm:$0xff] }
  0x8f   :  { %3002 = vmatpush1.bf16.msra.mxu1 %v6173_v49  ;;  %v6229_v49 = vcombine.low %v238_v36, %v242_v37  ;;  %v294_v36 = vld [vmem:[%s10013_s1 + $0x808] sm:$0xff] }
  0x90   :  { %3003 = vmatprep.subr.bf16.mxu1 %v6182_v51  ;;  %v6238_v51 = vcombine.high %v246_v44, %v250_v45  ;;  %v298_v37 = vld [vmem:[%s10013_s1 + $0x828] sm:$0xff] }
  0x91   :  { %2920 = vmatpush1.bf16.msra.mxu0 %v6427_v50  ;;  %v6039_v50 = vcombine.low %v47_v38, %v51_v19  ;;  %v103_v38 = vld [vmem:[%s10013_s1 + $0x210] sm:$0xff] }
  0x92   :  { %2921 = vmatprep.subr.bf16.mxu0 %v6436_v52  ;;  %v6048_v52 = vcombine.high %v55_v47, %v59_v48  ;;  %v107_v19 = vld [vmem:[%s10013_s1 + $0x230] sm:$0xff] }
  0x93   :  { %3004 = vmatpush1.bf16.msra.mxu1 %v6181_v60  ;;  %v6237_v60 = vcombine.low %v246_v44, %v250_v45  ;;  %v302_v44 = vld [vmem:[%s10013_s1 + $0x848] sm:$0xff] }
  0x94   :  { %3005 = vmatprep.subr.bf16.mxu1 %v6190_v63  ;;  %v6246_v63 = vcombine.high %v254_v55, %v258_v56  ;;  %v306_v45 = vld [vmem:[%s10013_s1 + $0x868] sm:$0xff] }
  0x95   :  { %2922 = vmatpush1.bf16.msra.mxu0 %v6435_v62  ;;  %v6047_v62 = vcombine.low %v55_v47, %v59_v48  ;;  %v111_v47 = vld [vmem:[%s10013_s1 + $0x250] sm:$0xff] }
  0x96   :  { %2923 = vmatprep.subr.bf16.mxu0 %v6444_v0  ;;  %v6056_v0 = vcombine.high %v63_v57, %v67_v59  ;;  %v115_v48 = vld [vmem:[%s10013_s1 + $0x270] sm:$0xff] }
  0x97   :  { %3006 = vmatpush1.bf16.msra.mxu1 %v6189_v5  ;;  %v6245_v5 = vcombine.low %v254_v55, %v258_v56  ;;  %v310_v55 = vld [vmem:[%s10013_s1 + $0x888] sm:$0xff] }
  0x98   :  { %3007 = vmatprep.subr.bf16.mxu1 %v6198_v7  ;;  %v6254_v7 = vcombine.high %v262_v1, %v266_v2  ;;  %v314_v56 = vld [vmem:[%s10013_s1 + $0x8a8] sm:$0xff] }
  0x99   :  { %2924 = vmatpush1.bf16.msra.mxu0 %v6443_v6  ;;  %v6055_v6 = vcombine.low %v63_v57, %v67_v59  ;;  %v119_v57 = vld [vmem:[%s10013_s1 + $0x290] sm:$0xff] }
  0x9a   :  { %2925 = vmatprep.subr.bf16.mxu0 %v6452_v8  ;;  %v6064_v8 = vcombine.high %v71_v3, %v75_v4  ;;  %v123_v59 = vld [vmem:[%s10013_s1 + $0x2b0] sm:$0xff] }
  0x9b   :  { %3008 = vmatpush1.bf16.msra.mxu1 %v6197_v13  ;;  %v6253_v13 = vcombine.low %v262_v1, %v266_v2  ;;  %v318_v1 = vld [vmem:[%s10013_s1 + $0x8c8] sm:$0xff] }
  0x9c   :  { %3009 = vmatprep.subr.bf16.mxu1 %v6206_v15  ;;  %v6262_v15 = vcombine.high %v270_v9, %v274_v10  ;;  %v322_v2 = vld [vmem:[%s10013_s1 + $0x8e8] sm:$0xff] }
  0x9d   :  { %2926 = vmatpush1.bf16.msra.mxu0 %v6451_v14  ;;  %v6063_v14 = vcombine.low %v71_v3, %v75_v4  ;;  %v127_v3 = vld [vmem:[%s10013_s1 + $0x2d0] sm:$0xff] }
  0x9e   :  { %2927 = vmatprep.subr.bf16.mxu0 %v6460_v17  ;;  %v6072_v17 = vcombine.high %v79_v11, %v83_v12  ;;  %v131_v4 = vld [vmem:[%s10013_s1 + $0x2f0] sm:$0xff] }
  0x9f   :  { %3010 = vmatpush1.bf16.msra.mxu1 %v6205_v23  ;;  %v6261_v23 = vcombine.low %v270_v9, %v274_v10  ;;  %v326_v9 = vld [vmem:[%s10013_s1 + $0x908] sm:$0xff] }
  0xa0   :  { %3011 = vmatprep.subr.bf16.mxu1 %v6214_v25  ;;  %v6270_v25 = vcombine.high %v278_v18, %v282_v20  ;;  %v330_v10 = vld [vmem:[%s10013_s1 + $0x928] sm:$0xff] }
  0xa1   :  { %2928 = vmatpush1.bf16.msra.mxu0 %v6459_v24  ;;  %v6071_v24 = vcombine.low %v79_v11, %v83_v12  ;;  %v135_v11 = vld [vmem:[%s10013_s1 + $0x310] sm:$0xff] }
  0xa2   :  { %2929 = vmatprep.subr.bf16.mxu0 %v6468_v54  ;;  %v6080_v54 = vcombine.high %v87_v53, %v91_v22  ;;  %v139_v12 = vld [vmem:[%s10013_s1 + $0x330] sm:$0xff] }
  0xa3   :  { %3012 = vmatpush1.bf16.msra.mxu1 %v6213_v31  ;;  %v6269_v31 = vcombine.low %v278_v18, %v282_v20  ;;  %v334_v18 = vld [vmem:[%s10013_s1 + $0x948] sm:$0xff] }
  0xa4   :  { %3013 = vmatprep.subr.bf16.mxu1 %v6222_v34  ;;  %v6278_v34 = vcombine.high %v286_v27, %v290_v28  ;;  %v338_v20 = vld [vmem:[%s10013_s1 + $0x968] sm:$0xff] }
  0xa5   :  { %2930 = vmatpush1.bf16.msra.mxu0 %v6467_v32  ;;  %v6079_v32 = vcombine.low %v87_v53, %v91_v22  ;;  %v143_v53 = vld [vmem:[%s10013_s1 + $0x350] sm:$0xff] }
  0xa6   :  { %3120 = vmatprep.subr.bf16.mxu0 %v6032_v35  ;;  %v6088_v35 = vcombine.high %v95_v29, %v99_v30  ;;  %v147_v22 = vld [vmem:[%s10013_s1 + $0x370] sm:$0xff] }
  0xa7   :  { %3014 = vmatpush1.bf16.msra.mxu1 %v6221_v40  ;;  %v6277_v40 = vcombine.low %v286_v27, %v290_v28  ;;  %v342_v27 = vld [vmem:[%s10013_s1 + $0x988] sm:$0xff] }
  0xa8   :  { %2948 = vmatmul.mubr.bf16.vlgmr.msra.gmra.mrb[0].mxu0 %v8035_v39  ;;  %3015 = vmatprep.subr.bf16.mxu1 %v6230_v42  ;;  %v6286_v42 = vcombine.high %v294_v36, %v298_v37  ;;  %v346_v28 = vld [vmem:[%s10013_s1 + $0x9a8] sm:$0xff] }
  0xa9   :  { %3121 = vmatpush1.bf16.msra.mxu0 %v6031_v41  ;;  %3152 = vmatprep.mubr.bf16.mxu0 %v7581_v58  ;;  %v6087_v41 = vcombine.low %v95_v29, %v99_v30  ;;  %v151_v29 = vld [vmem:[%s10013_s1 + $0x390] sm:$0xff] }
  0xaa   :  { %3122 = vmatprep.subr.bf16.mxu0 %v6040_v43  ;;  %v6096_v43 = vcombine.high %v103_v38, %v107_v19  ;;  %v155_v30 = vld [vmem:[%s10013_s1 + $0x3b0] sm:$0xff] }
  0xab   :  { %3016 = vmatpush1.bf16.msra.mxu1 %v6229_v49  ;;  %v6285_v49 = vcombine.low %v294_v36, %v298_v37  ;;  %v350_v36 = vld [vmem:[%s10013_s1 + $0x9c8] sm:$0xff] }
  0xac   :  { %3017 = vmatprep.subr.bf16.mxu1 %v6238_v51  ;;  %v6294_v51 = vcombine.high %v302_v44, %v306_v45  ;;  %v354_v37 = vld [vmem:[%s10013_s1 + $0x9e8] sm:$0xff] }
  0xad   :  { %3123 = vmatpush1.bf16.msra.mxu0 %v6039_v50  ;;  %v6095_v50 = vcombine.low %v103_v38, %v107_v19  ;;  %v159_v38 = vld [vmem:[%s10013_s1 + $0x3d0] sm:$0xff] }
  0xae   :  { %3124 = vmatprep.subr.bf16.mxu0 %v6048_v52  ;;  %v6104_v52 = vcombine.high %v111_v47, %v115_v48  ;;  %v163_v19 = vld [vmem:[%s10013_s1 + $0x3f0] sm:$0xff] }
  0xaf   :  { %3018 = vmatpush1.bf16.msra.mxu1 %v6237_v60  ;;  %v6293_v60 = vcombine.low %v302_v44, %v306_v45  ;;  %v358_v44 = vld [vmem:[%s10013_s1 + $0xa08] sm:$0xff] }
  0xb0   :  { %3019 = vmatprep.subr.bf16.mxu1 %v6246_v63  ;;  %v6302_v63 = vcombine.high %v310_v55, %v314_v56  ;;  %v362_v45 = vld [vmem:[%s10013_s1 + $0xa28] sm:$0xff] }
  0xb1   :  { %3125 = vmatpush1.bf16.msra.mxu0 %v6047_v62  ;;  %v6103_v62 = vcombine.low %v111_v47, %v115_v48  ;;  %v167_v47 = vld [vmem:[%s10013_s1 + $0x410] sm:$0xff] }
  0xb2   :  { %3126 = vmatprep.subr.bf16.mxu0 %v6056_v0  ;;  %v6112_v0 = vcombine.high %v119_v57, %v123_v59  ;;  %v171_v48 = vld [vmem:[%s10013_s1 + $0x430] sm:$0xff] }
  0xb3   :  { %3020 = vmatpush1.bf16.msra.mxu1 %v6245_v5  ;;  %v6301_v5 = vcombine.low %v310_v55, %v314_v56  ;;  %v366_v55 = vld [vmem:[%s10013_s1 + $0xa48] sm:$0xff] }
  0xb4   :  { %3021 = vmatprep.subr.bf16.mxu1 %v6254_v7  ;;  %v6310_v7 = vcombine.high %v318_v1, %v322_v2  ;;  %v370_v56 = vld [vmem:[%s10013_s1 + $0xa68] sm:$0xff] }
  0xb5   :  { %3127 = vmatpush1.bf16.msra.mxu0 %v6055_v6  ;;  %v6111_v6 = vcombine.low %v119_v57, %v123_v59  ;;  %v175_v57 = vld [vmem:[%s10013_s1 + $0x450] sm:$0xff] }
  0xb6   :  { %3128 = vmatprep.subr.bf16.mxu0 %v6064_v8  ;;  %v6120_v8 = vcombine.high %v127_v3, %v131_v4  ;;  %v179_v59 = vld [vmem:[%s10013_s1 + $0x470] sm:$0xff] }
  0xb7   :  { %3022 = vmatpush1.bf16.msra.mxu1 %v6253_v13  ;;  %v6309_v13 = vcombine.low %v318_v1, %v322_v2  ;;  %v374_v1 = vld [vmem:[%s10013_s1 + $0xa88] sm:$0xff] }
  0xb8   :  { %3023 = vmatprep.subr.bf16.mxu1 %v6262_v15  ;;  %v6318_v15 = vcombine.high %v326_v9, %v330_v10  ;;  %v378_v2 = vld [vmem:[%s10013_s1 + $0xaa8] sm:$0xff] }
  0xb9   :  { %3129 = vmatpush1.bf16.msra.mxu0 %v6063_v14  ;;  %v6119_v14 = vcombine.low %v127_v3, %v131_v4  ;;  %v183_v3 = vld [vmem:[%s10013_s1 + $0x490] sm:$0xff] }
  0xba   :  { %3130 = vmatprep.subr.bf16.mxu0 %v6072_v17  ;;  %v6128_v17 = vcombine.high %v135_v11, %v139_v12  ;;  %v187_v4 = vld [vmem:[%s10013_s1 + $0x4b0] sm:$0xff] }
  0xbb   :  { %3024 = vmatpush1.bf16.msra.mxu1 %v6261_v23  ;;  %v6317_v23 = vcombine.low %v326_v9, %v330_v10  ;;  %v382_v9 = vld [vmem:[%s10013_s1 + $0xac8] sm:$0xff] }
  0xbc   :  { %3025 = vmatprep.subr.bf16.mxu1 %v6270_v25  ;;  %v6326_v25 = vcombine.high %v334_v18, %v338_v20  ;;  %v386_v10 = vld [vmem:[%s10013_s1 + $0xae8] sm:$0xff] }
  0xbd   :  { %3131 = vmatpush1.bf16.msra.mxu0 %v6071_v24  ;;  %v6127_v24 = vcombine.low %v135_v11, %v139_v12  ;;  %v191_v11 = vld [vmem:[%s10013_s1 + $0x4d0] sm:$0xff] }
  0xbe   :  { %3132 = vmatprep.subr.bf16.mxu0 %v6080_v54  ;;  %v6136_v54 = vcombine.high %v143_v53, %v147_v22  ;;  %v195_v12 = vld [vmem:[%s10013_s1 + $0x4f0] sm:$0xff] }
  0xbf   :  { %3026 = vmatpush1.bf16.msra.mxu1 %v6269_v31  ;;  %v6325_v31 = vcombine.low %v334_v18, %v338_v20  ;;  %v390_v18 = vld [vmem:[%s10013_s1 + $0xb08] sm:$0xff] }
  0xc0   :  { %3027 = vmatprep.subr.bf16.mxu1 %v6278_v34  ;;  %v6334_v34 = vcombine.high %v342_v27, %v346_v28  ;;  %v394_v20 = vld [vmem:[%s10013_s1 + $0xb28] sm:$0xff] }
  0xc1   :  { %3133 = vmatpush1.bf16.msra.mxu0 %v6079_v32  ;;  %v6135_v32 = vcombine.low %v143_v53, %v147_v22  ;;  %v199_v53 = vld [vmem:[%s10013_s1 + $0x510] sm:$0xff] }
  0xc2   :  { %3134 = vmatprep.subr.bf16.mxu0 %v6088_v35  ;;  %v6144_v35 = vcombine.high %v151_v29, %v155_v30  ;;  %v203_v22 = vld [vmem:[%s10013_s1 + $0x530] sm:$0xff] }
  0xc3   :  { %3028 = vmatpush1.bf16.msra.mxu1 %v6277_v40  ;;  %v6333_v40 = vcombine.low %v342_v27, %v346_v28  ;;  %v398_v27 = vld [vmem:[%s10013_s1 + $0xb48] sm:$0xff] }
  0xc4   :  { %3038 = vmatprep.subr.bf16.mxu1 %v6286_v42  ;;  %v6342_v42 = vcombine.high %v350_v36, %v354_v37  ;;  %v402_v28 = vld [vmem:[%s10013_s1 + $0xb68] sm:$0xff] }
  0xc5   :  { %3135 = vmatpush1.bf16.msra.mxu0 %v6087_v41  ;;  %v6143_v41 = vcombine.low %v151_v29, %v155_v30  ;;  %v207_v29 = vld [vmem:[%s10013_s1 + $0x550] sm:$0xff] }
  0xc6   :  { %3136 = vmatprep.subr.bf16.mxu0 %v6096_v43  ;;  %3030 = vmatmul.mubr.bf16.vlgmr.msra.gmra.mrb[4].mxu1 %v7726_v21  ;;  %v6152_v43 = vcombine.high %v159_v38, %v163_v19  ;;  %v211_v30 = vld [vmem:[%s10013_s1 + $0x570] sm:$0xff] }
  0xc7   :  { %3039 = vmatpush1.bf16.msra.mxu1 %v6285_v49  ;;  %3070 = vmatprep.mubr.bf16.mxu1 %v7736_v26  ;;  %v6341_v49 = vcombine.low %v350_v36, %v354_v37  ;;  %v406_v36 = vld [vmem:[%s10013_s1 + $0xb88] sm:$0xff] }
  0xc8   :  { %3040 = vmatprep.subr.bf16.mxu1 %v6294_v51  ;;  %v6350_v51 = vcombine.high %v358_v44, %v362_v45  ;;  %v410_v37 = vld [vmem:[%s10013_s1 + $0xba8] sm:$0xff] }
  0xc9   :  { %3137 = vmatpush1.bf16.msra.mxu0 %v6095_v50  ;;  %v6151_v50 = vcombine.low %v159_v38, %v163_v19  ;;  %v215_v38 = vld [vmem:[%s10013_s1 + $0x590] sm:$0xff] }
  0xca   :  { %3138 = vmatprep.subr.bf16.mxu0 %v6104_v52  ;;  %v6160_v52 = vcombine.high %v167_v47, %v171_v48  ;;  %v219_v19 = vld [vmem:[%s10013_s1 + $0x5b0] sm:$0xff] }
  0xcb   :  { %3041 = vmatpush1.bf16.msra.mxu1 %v6293_v60  ;;  %v6349_v60 = vcombine.low %v358_v44, %v362_v45  ;;  %v414_v44 = vld [vmem:[%s10013_s1 + $0xbc8] sm:$0xff] }
  0xcc   :  { %3042 = vmatprep.subr.bf16.mxu1 %v6302_v63  ;;  %v6358_v63 = vcombine.high %v366_v55, %v370_v56  ;;  %v418_v45 = vld [vmem:[%s10013_s1 + $0xbe8] sm:$0xff] }
  0xcd   :  { %3139 = vmatpush1.bf16.msra.mxu0 %v6103_v62  ;;  %v6159_v62 = vcombine.low %v167_v47, %v171_v48  ;;  %v223_v47 = vld [vmem:[%s10013_s1 + $0x5d0] sm:$0xff] }
  0xce   :  { %3140 = vmatprep.subr.bf16.mxu0 %v6112_v0  ;;  %v6168_v0 = vcombine.high %v175_v57, %v179_v59  ;;  %v227_v48 = vld [vmem:[%s10013_s1 + $0x5f0] sm:$0xff] }
  0xcf   :  { %3043 = vmatpush1.bf16.msra.mxu1 %v6301_v5  ;;  %v6357_v5 = vcombine.low %v366_v55, %v370_v56  ;;  %v422_v55 = vld [vmem:[%s10013_s1 + $0xc08] sm:$0xff] }
  0xd0   :  { %3044 = vmatprep.subr.bf16.mxu1 %v6310_v7  ;;  %v6366_v7 = vcombine.high %v374_v1, %v378_v2  ;;  %v426_v56 = vld [vmem:[%s10013_s1 + $0xc28] sm:$0xff] }
  0xd1   :  { %3141 = vmatpush1.bf16.msra.mxu0 %v6111_v6  ;;  %v6167_v6 = vcombine.low %v175_v57, %v179_v59  ;;  %v231_v57 = vld [vmem:[%s10013_s1 + $0x610] sm:$0xff] }
  0xd2   :  { %3142 = vmatprep.subr.bf16.mxu0 %v6120_v8  ;;  %v6176_v8 = vcombine.high %v183_v3, %v187_v4  ;;  %v235_v59 = vld [vmem:[%s10013_s1 + $0x630] sm:$0xff] }
  0xd3   :  { %3045 = vmatpush1.bf16.msra.mxu1 %v6309_v13  ;;  %v6365_v13 = vcombine.low %v374_v1, %v378_v2  ;;  %v430_v1 = vld [vmem:[%s10013_s1 + $0xc48] sm:$0xff] }
  0xd4   :  { %3046 = vmatprep.subr.bf16.mxu1 %v6318_v15  ;;  %v6374_v15 = vcombine.high %v382_v9, %v386_v10  ;;  %v434_v2 = vld [vmem:[%s10013_s1 + $0xc68] sm:$0xff] }
  0xd5   :  { %3143 = vmatpush1.bf16.msra.mxu0 %v6119_v14  ;;  %v6175_v14 = vcombine.low %v183_v3, %v187_v4  ;;  %v239_v3 = vld [vmem:[%s10013_s1 + $0x650] sm:$0xff] }
  0xd6   :  { %3144 = vmatprep.subr.bf16.mxu0 %v6128_v17  ;;  %v6184_v17 = vcombine.high %v191_v11, %v195_v12  ;;  %v243_v4 = vld [vmem:[%s10013_s1 + $0x670] sm:$0xff] }
  0xd7   :  { %3047 = vmatpush1.bf16.msra.mxu1 %v6317_v23  ;;  %v6373_v23 = vcombine.low %v382_v9, %v386_v10  ;;  %v442_v9 = vld [vmem:[%s10013_s1 + $0xca8] sm:$0xff]  ;;  %v6232_v10 = vcombine.high %v239_v3, %v243_v4 }
  0xd8   :  { %3048 = vmatprep.subr.bf16.mxu1 %v6326_v25  ;;  %v6382_v25 = vcombine.high %v390_v18, %v394_v20 }
  0xd9   :  { %3145 = vmatpush1.bf16.msra.mxu0 %v6127_v24  ;;  %v6183_v24 = vcombine.low %v191_v11, %v195_v12  ;;  %v247_v11 = vld [vmem:[%s10013_s1 + $0x690] sm:$0xff] }
  0xda   :  { %3146 = vmatprep.subr.bf16.mxu0 %v6136_v54  ;;  %v6192_v54 = vcombine.high %v199_v53, %v203_v22  ;;  %v251_v12 = vld [vmem:[%s10013_s1 + $0x6b0] sm:$0xff] }
  0xdb   :  { %3049 = vmatpush1.bf16.msra.mxu1 %v6325_v31  ;;  %v6381_v31 = vcombine.low %v390_v18, %v394_v20  ;;  %v450_v18 = vld [vmem:[%s10013_s1 + $0xce8] sm:$0xff]  ;;  %v6240_v20 = vcombine.high %v247_v11, %v251_v12 }
  0xdc   :  { %3050 = vmatprep.subr.bf16.mxu1 %v6334_v34  ;;  %v6390_v34 = vcombine.high %v398_v27, %v402_v28 }
  0xdd   :  { %3147 = vmatpush1.bf16.msra.mxu0 %v6135_v32  ;;  %v6191_v32 = vcombine.low %v199_v53, %v203_v22  ;;  %v255_v53 = vld [vmem:[%s10013_s1 + $0x6d0] sm:$0xff] }
  0xde   :  { %3148 = vmatprep.subr.bf16.mxu0 %v6144_v35  ;;  %v6200_v35 = vcombine.high %v207_v29, %v211_v30  ;;  %v259_v22 = vld [vmem:[%s10013_s1 + $0x6f0] sm:$0xff] }
  0xdf   :  { %3051 = vmatpush1.bf16.msra.mxu1 %v6333_v40  ;;  %v6389_v40 = vcombine.low %v398_v27, %v402_v28  ;;  %v458_v27 = vld [vmem:[%s10013_s1 + $0xd28] sm:$0xff]  ;;  %v263_v28 = vld [vmem:[%s10013_s1 + $0x710] sm:$0xff] }
  0xe0   :  { %3052 = vmatprep.subr.bf16.mxu1 %v6342_v42  ;;  %v6398_v42 = vcombine.high %v406_v36, %v410_v37 }
  0xe1   :  { %3149 = vmatpush1.bf16.msra.mxu0 %v6143_v41  ;;  %v6199_v41 = vcombine.low %v207_v29, %v211_v30  ;;  %v6248_v29 = vcombine.high %v255_v53, %v259_v22  ;;  %v267_v30 = vld [vmem:[%s10013_s1 + $0x730] sm:$0xff] }
  0xe2   :  { %3150 = vmatprep.subr.bf16.mxu0 %v6152_v43  ;;  %v6208_v43 = vcombine.high %v215_v38, %v219_v19 }
  0xe3   :  { %3053 = vmatpush1.bf16.msra.mxu1 %v6341_v49  ;;  %v6397_v49 = vcombine.low %v406_v36, %v410_v37  ;;  %v466_v36 = vld [vmem:[%s10013_s1 + $0xd68] sm:$0xff]  ;;  %v271_v37 = vld [vmem:[%s10013_s1 + $0x750] sm:$0xff] }
  0xe4   :  { %3054 = vmatprep.subr.bf16.mxu1 %v6350_v51  ;;  %v6406_v51 = vcombine.high %v414_v44, %v418_v45 }
  0xe5   :  { %3151 = vmatpush1.bf16.msra.mxu0 %v6151_v50  ;;  %v6207_v50 = vcombine.low %v215_v38, %v219_v19  ;;  %v6256_v38 = vcombine.high %v263_v28, %v267_v30  ;;  %v275_v19 = vld [vmem:[%s10013_s1 + $0x770] sm:$0xff] }
  0xe6   :  { %3161 = vmatprep.subr.bf16.mxu0 %v6160_v52  ;;  %v6216_v52 = vcombine.high %v223_v47, %v227_v48 }
  0xe7   :  { %3055 = vmatpush1.bf16.msra.mxu1 %v6349_v60  ;;  %v6405_v60 = vcombine.low %v414_v44, %v418_v45  ;;  %v474_v44 = vld [vmem:[%s10013_s1 + $0xda8] sm:$0xff]  ;;  %v279_v45 = vld [vmem:[%s10013_s1 + $0x790] sm:$0xff] }
  0xe8   :  { %3153 = vmatmul.mubr.bf16.vlgmr.msra.gmra.mrb[4].mxu0 %v7711_v16  ;;  %3056 = vmatprep.subr.bf16.mxu1 %v6358_v63  ;;  %v6414_v63 = vcombine.high %v422_v55, %v426_v56 }
  0xe9   :  { %3162 = vmatpush1.bf16.msra.mxu0 %v6159_v62  ;;  %3193 = vmatprep.mubr.bf16.mxu0 %v7591_v61  ;;  %v6215_v62 = vcombine.low %v223_v47, %v227_v48  ;;  %v6264_v47 = vcombine.high %v271_v37, %v275_v19  ;;  %v283_v48 = vld [vmem:[%s10013_s1 + $0x7b0] sm:$0xff] }
  0xea   :  { %3163 = vmatprep.subr.bf16.mxu0 %v6168_v0  ;;  %v6224_v0 = vcombine.high %v231_v57, %v235_v59 }
  0xeb   :  { %3057 = vmatpush1.bf16.msra.mxu1 %v6357_v5  ;;  %v6413_v5 = vcombine.low %v422_v55, %v426_v56  ;;  %v482_v55 = vld [vmem:[%s10013_s1 + $0xde8] sm:$0xff]  ;;  %v287_v56 = vld [vmem:[%s10013_s1 + $0x7d0] sm:$0xff] }
  0xec   :  { %3058 = vmatprep.subr.bf16.mxu1 %v6366_v7  ;;  %v6422_v7 = vcombine.high %v430_v1, %v434_v2 }
  0xed   :  { %3164 = vmatpush1.bf16.msra.mxu0 %v6167_v6  ;;  %v6223_v6 = vcombine.low %v231_v57, %v235_v59  ;;  %v6272_v59 = vcombine.high %v279_v45, %v283_v48 }
  0xee   :  { %3165 = vmatprep.subr.bf16.mxu0 %v6176_v8  ;;  %v438_v8 = vld [vmem:[%s10013_s1 + $0xc88] sm:$0xff] }
  0xef   :  { %3059 = vmatpush1.bf16.msra.mxu1 %v6365_v13  ;;  %v6421_v13 = vcombine.low %v430_v1, %v434_v2  ;;  %v6271_v2 = vcombine.low %v279_v45, %v283_v48  ;;  %v335_v45 = vld [vmem:[%s10013_s1 + $0x950] sm:$0xff]  ;;  %v80_v48 = vld [vmem:[%s10013_s1 + $0x158] sm:$0xff] }
  0xf0   :  { %3060 = vmatprep.subr.bf16.mxu1 %v6374_v15  ;;  %v6430_v15 = vcombine.high %v438_v8, %v442_v9 }
  0xf1   :  { %3166 = vmatpush1.bf16.msra.mxu0 %v6175_v14  ;;  %v6231_v14 = vcombine.low %v239_v3, %v243_v4  ;;  %v295_v4 = vld [vmem:[%s10013_s1 + $0x810] sm:$0xff] }
  0xf2   :  { %3167 = vmatprep.subr.bf16.mxu0 %v6184_v17  ;;  %v446_v17 = vld [vmem:[%s10013_s1 + $0xcc8] sm:$0xff] }
  0xf3   :  { %3061 = vmatpush1.bf16.msra.mxu1 %v6373_v23  ;;  %v6429_v23 = vcombine.low %v438_v8, %v442_v9  ;;  %v44_v8 = vld [vmem:[%s10013_s1 + $0x38] sm:$0xff] }
  0xf4   :  { %3062 = vmatprep.subr.bf16.mxu1 %v6382_v25  ;;  %v6438_v25 = vcombine.high %v446_v17, %v450_v18 }
  0xf5   :  { %3168 = vmatpush1.bf16.msra.mxu0 %v6183_v24  ;;  %v6239_v24 = vcombine.low %v247_v11, %v251_v12  ;;  %v303_v12 = vld [vmem:[%s10013_s1 + $0x850] sm:$0xff] }
  0xf6   :  { %3169 = vmatprep.subr.bf16.mxu0 %v6192_v54  ;;  %v454_v54 = vld [vmem:[%s10013_s1 + $0xd08] sm:$0xff] }
  0xf7   :  { %3063 = vmatpush1.bf16.msra.mxu1 %v6381_v31  ;;  %v6437_v31 = vcombine.low %v446_v17, %v450_v18  ;;  %v52_v17 = vld [vmem:[%s10013_s1 + $0x78] sm:$0xff] }
  0xf8   :  { %3064 = vmatprep.subr.bf16.mxu1 %v6390_v34  ;;  %v6446_v34 = vcombine.high %v454_v54, %v458_v27 }
  0xf9   :  { %3170 = vmatpush1.bf16.msra.mxu0 %v6191_v32  ;;  %v6247_v32 = vcombine.low %v255_v53, %v259_v22  ;;  %v311_v22 = vld [vmem:[%s10013_s1 + $0x890] sm:$0xff] }
  0xfa   :  { %3171 = vmatprep.subr.bf16.mxu0 %v6200_v35  ;;  %v462_v35 = vld [vmem:[%s10013_s1 + $0xd48] sm:$0xff] }
  0xfb   :  { %3065 = vmatpush1.bf16.msra.mxu1 %v6389_v40  ;;  %v6445_v40 = vcombine.low %v454_v54, %v458_v27  ;;  %v60_v54 = vld [vmem:[%s10013_s1 + $0xb8] sm:$0xff] }
  0xfc   :  { %3066 = vmatprep.subr.bf16.mxu1 %v6398_v42  ;;  %v6454_v42 = vcombine.high %v462_v35, %v466_v36 }
  0xfd   :  { %3172 = vmatpush1.bf16.msra.mxu0 %v6199_v41  ;;  %v6255_v41 = vcombine.low %v263_v28, %v267_v30  ;;  %v319_v30 = vld [vmem:[%s10013_s1 + $0x8d0] sm:$0xff] }
  0xfe   :  { %3173 = vmatprep.subr.bf16.mxu0 %v6208_v43  ;;  %v470_v43 = vld [vmem:[%s10013_s1 + $0xd88] sm:$0xff] }
  0xff   :  { %3067 = vmatpush1.bf16.msra.mxu1 %v6397_v49  ;;  %v6453_v49 = vcombine.low %v462_v35, %v466_v36 }
 0x100   :  { %3068 = vmatprep.subr.bf16.mxu1 %v6406_v51  ;;  %v6462_v51 = vcombine.high %v470_v43, %v474_v44 }
 0x101   :  { %3174 = vmatpush1.bf16.msra.mxu0 %v6207_v50  ;;  %v6263_v50 = vcombine.low %v271_v37, %v275_v19  ;;  %v331_v19 = vld [vmem:[%s10013_s1 + $0x930] sm:$0xff] }
 0x102   :  { %3175 = vmatprep.subr.bf16.mxu0 %v6216_v52  ;;  %v478_v52 = vld [vmem:[%s10013_s1 + $0xdc8] sm:$0xff] }
 0x103   :  { %3069 = vmatpush1.bf16.msra.mxu1 %v6405_v60  ;;  %v291_v60 = vld [vmem:[%s10013_s1 + $0x7f0] sm:$0xff]  ;;  %v6470_v3 = vcombine.high %v478_v52, %v482_v55  ;;  %v6469_v9 = vcombine.low %v478_v52, %v482_v55 }
 0x104   :  { %3079 = vmatprep.subr.bf16.mxu1 %v6414_v63 }
 0x105   :  { %3176 = vmatpush1.bf16.msra.mxu0 %v6215_v62 }
 0x106   :  { %3177 = vmatprep.subr.bf16.mxu0 %v6224_v0  ;;  %3071 = vmatmul.mubr.bf16.vlgmr.msra.gmra.mrb[4].mxu1 %v7930_v33  ;;  %v6461_v0 = vcombine.low %v470_v43, %v474_v44 }
 0x107   :  { %3080 = vmatpush1.bf16.msra.mxu1 %v6413_v5  ;;  %3111 = vmatprep.mubr.bf16.mxu1 %v7428_v46  ;;  %v299_v5 = vld [vmem:[%s10013_s1 + $0x830] sm:$0xff] }
 0x108   :  { %3081 = vmatprep.subr.bf16.mxu1 %v6422_v7  ;;  %v6280_v7 = vcombine.high %v287_v56, %v291_v60 }
 0x109   :  { %3178 = vmatpush1.bf16.msra.mxu0 %v6223_v6  ;;  %v40_v6 = vld [vmem:[%s10013_s1 + $0x18] sm:$0xff] }
 0x10a   :  { %3179 = vmatprep.subr.bf16.mxu0 %v6232_v10  ;;  %v6279_v10 = vcombine.low %v287_v56, %v291_v60  ;;  %v6034_v11 = vcombine.high %v40_v6, %v44_v8  ;;  %v6033_v18 = vcombine.low %v40_v6, %v44_v8  ;;  %v343_v56 = vld [vmem:[%s10013_s1 + $0x990] sm:$0xff]  ;;  %v88_v60 = vld [vmem:[%s10013_s1 + $0x198] sm:$0xff] }
 0x10b   :  { %3082 = vmatpush1.bf16.msra.mxu1 %v6421_v13  ;;  %v307_v13 = vld [vmem:[%s10013_s1 + $0x870] sm:$0xff]  ;;  %v96_v6 = vld [vmem:[%s10013_s1 + $0x1d8] sm:$0xff] }
 0x10c   :  { %3083 = vmatprep.subr.bf16.mxu1 %v6430_v15  ;;  %v6288_v15 = vcombine.high %v295_v4, %v299_v5  ;;  %v6295_v28 = vcombine.low %v303_v12, %v307_v13  ;;  %v100_v8 = vld [vmem:[%s10013_s1 + $0x1f8] sm:$0xff] }
 0x10d   :  { %3180 = vmatpush1.bf16.msra.mxu0 %v6231_v14  ;;  %v48_v14 = vld [vmem:[%s10013_s1 + $0x58] sm:$0xff] }
 0x10e   :  { %3181 = vmatprep.subr.bf16.mxu0 %v6240_v20  ;;  %v6287_v20 = vcombine.low %v295_v4, %v299_v5  ;;  %v6042_v53 = vcombine.high %v48_v14, %v52_v17  ;;  %v6041_v27 = vcombine.low %v48_v14, %v52_v17  ;;  %v351_v4 = vld [vmem:[%s10013_s1 + $0x9d0] sm:$0xff]  ;;  %v104_v14 = vld [vmem:[%s10013_s1 + $0x218] sm:$0xff] }
 0x10f   :  { %3084 = vmatpush1.bf16.msra.mxu1 %v6429_v23  ;;  %v315_v23 = vld [vmem:[%s10013_s1 + $0x8b0] sm:$0xff]  ;;  %v108_v17 = vld [vmem:[%s10013_s1 + $0x238] sm:$0xff] }
 0x110   :  { %3085 = vmatprep.subr.bf16.mxu1 %v6438_v25  ;;  %v6296_v25 = vcombine.high %v303_v12, %v307_v13  ;;  %v6303_v36 = vcombine.low %v311_v22, %v315_v23  ;;  %v355_v5 = vld [vmem:[%s10013_s1 + $0x9f0] sm:$0xff] }
 0x111   :  { %3182 = vmatpush1.bf16.msra.mxu0 %v6239_v24  ;;  %v56_v24 = vld [vmem:[%s10013_s1 + $0x98] sm:$0xff]  ;;  %v359_v12 = vld [vmem:[%s10013_s1 + $0xa10] sm:$0xff] }
 0x112   :  { %3183 = vmatprep.subr.bf16.mxu0 %v6248_v29  ;;  %v6050_v29 = vcombine.high %v56_v24, %v60_v54  ;;  %v6049_v35 = vcombine.low %v56_v24, %v60_v54  ;;  %v363_v13 = vld [vmem:[%s10013_s1 + $0xa30] sm:$0xff]  ;;  %v112_v24 = vld [vmem:[%s10013_s1 + $0x258] sm:$0xff] }
 0x113   :  { %3086 = vmatpush1.bf16.msra.mxu1 %v6437_v31  ;;  %v323_v31 = vld [vmem:[%s10013_s1 + $0x8f0] sm:$0xff]  ;;  %v116_v54 = vld [vmem:[%s10013_s1 + $0x278] sm:$0xff] }
 0x114   :  { %3087 = vmatprep.subr.bf16.mxu1 %v6446_v34  ;;  %v68_v34 = vld [vmem:[%s10013_s1 + $0xf8] sm:$0xff]  ;;  %v6311_v43 = vcombine.low %v319_v30, %v323_v31 }
 0x115   :  { %3184 = vmatpush1.bf16.msra.mxu0 %v6247_v32  ;;  %v6304_v32 = vcombine.high %v311_v22, %v315_v23  ;;  %v367_v22 = vld [vmem:[%s10013_s1 + $0xa50] sm:$0xff] }
 0x116   :  { %3185 = vmatprep.subr.bf16.mxu0 %v6256_v38  ;;  %v327_v38 = vld [vmem:[%s10013_s1 + $0x910] sm:$0xff] }
 0x117   :  { %3088 = vmatpush1.bf16.msra.mxu1 %v6445_v40  ;;  %v72_v40 = vld [vmem:[%s10013_s1 + $0x118] sm:$0xff]  ;;  %v6319_v52 = vcombine.low %v327_v38, %v331_v19  ;;  %v371_v23 = vld [vmem:[%s10013_s1 + $0xa70] sm:$0xff] }
 0x118   :  { %3089 = vmatprep.subr.bf16.mxu1 %v6454_v42 }
 0x119   :  { %3186 = vmatpush1.bf16.msra.mxu0 %v6255_v41  ;;  %v8402_v57 = vpop.f32.mrb[0].mxu1  ;;  %v76_v41 = vld [vmem:[%s10013_s1 + $0x138] sm:$0xff] }
 0x11a   :  { %3187 = vmatprep.subr.bf16.mxu0 %v6264_v47  ;;  %v8407_v62 = vpop.f32.mrb[1].mxu1  ;;  %v6066_v44 = vcombine.high %v72_v40, %v76_v41  ;;  %v339_v47 = vld [vmem:[%s10013_s1 + $0x970] sm:$0xff] }
 0x11b   :  { %v2830_v63 = vpop.f32.mrb[2].mxu1  ;;  %3090 = vmatpush1.bf16.msra.mxu1 %v6453_v49  ;;  %v6320_v49 = vcombine.high %v327_v38, %v331_v19  ;;  %v383_v38 = vld [vmem:[%s10013_s1 + $0xad0] sm:$0xff] }
 0x11c   :  { %v2831_v1 = vpop.f32.mrb[3].mxu1  ;;  %3091 = vmatprep.subr.bf16.mxu1 %v6462_v51  ;;  %v6065_v51 = vcombine.low %v72_v40, %v76_v41  ;;  %v6328_v63 = vcombine.high %v335_v45, %v339_v47  ;;  %v387_v19 = vld [vmem:[%s10013_s1 + $0xaf0] sm:$0xff]  ;;  %v128_v40 = vld [vmem:[%s10013_s1 + $0x2d8] sm:$0xff] }
 0x11d   :  { %3188 = vmatpush1.bf16.msra.mxu0 %v6263_v50  ;;  %v84_v50 = vld [vmem:[%s10013_s1 + $0x178] sm:$0xff] }
 0x11e   :  { %3189 = vmatprep.subr.bf16.mxu0 %v6272_v59  ;;  %v6074_v55 = vcombine.high %v80_v48, %v84_v50  ;;  %v347_v59 = vld [vmem:[%s10013_s1 + $0x9b0] sm:$0xff]  ;;  %v6073_v1 = vcombine.low %v80_v48, %v84_v50  ;;  %v132_v41 = vld [vmem:[%s10013_s1 + $0x2f8] sm:$0xff] }
 0x11f   :  { %3092 = vmatpush1.bf16.msra.mxu1 %v6461_v0  ;;  %v92_v0 = vld [vmem:[%s10013_s1 + $0x1b8] sm:$0xff] }
 0x120   :  { %3093 = vmatprep.subr.bf16.mxu1 %v6470_v3  ;;  %v6082_v3 = vcombine.high %v88_v60, %v92_v0  ;;  %v136_v48 = vld [vmem:[%s10013_s1 + $0x318] sm:$0xff] }
 0x121   :  { %3190 = vmatpush1.bf16.msra.mxu0 %v6271_v2  ;;  %v6327_v2 = vcombine.low %v335_v45, %v339_v47  ;;  %v391_v45 = vld [vmem:[%s10013_s1 + $0xb10] sm:$0xff]  ;;  %v140_v50 = vld [vmem:[%s10013_s1 + $0x338] sm:$0xff] }
 0x122   :  { %3191 = vmatprep.subr.bf16.mxu0 %v6280_v7  ;;  %v6336_v7 = vcombine.high %v343_v56, %v347_v59  ;;  %v395_v47 = vld [vmem:[%s10013_s1 + $0xb30] sm:$0xff] }
 0x123   :  { %3094 = vmatpush1.bf16.msra.mxu1 %v6469_v9  ;;  %v6081_v9 = vcombine.low %v88_v60, %v92_v0  ;;  %v144_v60 = vld [vmem:[%s10013_s1 + $0x358] sm:$0xff] }
 0x124   :  { %3284 = vmatprep.subr.bf16.mxu1 %v6034_v11  ;;  %v6090_v11 = vcombine.high %v96_v6, %v100_v8  ;;  %v148_v0 = vld [vmem:[%s10013_s1 + $0x378] sm:$0xff] }
 0x125   :  { %3192 = vmatpush1.bf16.msra.mxu0 %v6279_v10  ;;  %v6335_v10 = vcombine.low %v343_v56, %v347_v59  ;;  %v399_v56 = vld [vmem:[%s10013_s1 + $0xb50] sm:$0xff] }
 0x126   :  { %3202 = vmatprep.subr.bf16.mxu0 %v6288_v15  ;;  %3112 = vmatmul.mubr.bf16.vlgmr.msra.gmra.mrb[4].mxu1 %v8035_v39  ;;  %v64_v39 = vld [vmem:[%s10013_s1 + $0xd8] sm:$0xff]  ;;  %v6344_v15 = vcombine.high %v351_v4, %v355_v5  ;;  %v403_v59 = vld [vmem:[%s10013_s1 + $0xb70] sm:$0xff] }
 0x127   :  { %3285 = vmatpush1.bf16.msra.mxu1 %v6033_v18  ;;  %3316 = vmatprep.mubr.bf16.mxu1 %v7581_v58  ;;  %v6058_v37 = vcombine.high %v64_v39, %v68_v34  ;;  %v6312_v58 = vcombine.high %v319_v30, %v323_v31  ;;  %v6057_v42 = vcombine.low %v64_v39, %v68_v34  ;;  %v375_v30 = vld [vmem:[%s10013_s1 + $0xa90] sm:$0xff]  ;;  %v120_v31 = vld [vmem:[%s10013_s1 + $0x298] sm:$0xff] }
 0x128   :  { %3194 = vmatmul.mubr.bf16.vlgmr.msra.gmra.mrb[4].mxu0 %v7726_v21  ;;  %3286 = vmatprep.subr.bf16.mxu1 %v6042_v53  ;;  %v6089_v18 = vcombine.low %v96_v6, %v100_v8  ;;  %v6098_v53 = vcombine.high %v104_v14, %v108_v17  ;;  %v6360_v39 = vcombine.high %v367_v22, %v371_v23  ;;  %v379_v34 = vld [vmem:[%s10013_s1 + $0xab0] sm:$0xff]  ;;  %v152_v6 = vld [vmem:[%s10013_s1 + $0x398] sm:$0xff] }
 0x129   :  { %3203 = vmatpush1.bf16.msra.mxu0 %v6287_v20  ;;  %3234 = vmatprep.mubr.bf16.mxu0 %v7736_v26  ;;  %v6343_v20 = vcombine.low %v351_v4, %v355_v5  ;;  %v407_v4 = vld [vmem:[%s10013_s1 + $0xb90] sm:$0xff]  ;;  %v156_v8 = vld [vmem:[%s10013_s1 + $0x3b8] sm:$0xff] }
 0x12a   :  { %3204 = vmatprep.subr.bf16.mxu0 %v6296_v25  ;;  %v6352_v25 = vcombine.high %v359_v12, %v363_v13  ;;  %v411_v5 = vld [vmem:[%s10013_s1 + $0xbb0] sm:$0xff] }
 0x12b   :  { %3287 = vmatpush1.bf16.msra.mxu1 %v6041_v27  ;;  %v6097_v27 = vcombine.low %v104_v14, %v108_v17  ;;  %v160_v14 = vld [vmem:[%s10013_s1 + $0x3d8] sm:$0xff] }
 0x12c   :  { %3288 = vmatprep.subr.bf16.mxu1 %v6050_v29  ;;  %v6106_v29 = vcombine.high %v112_v24, %v116_v54  ;;  %v164_v17 = vld [vmem:[%s10013_s1 + $0x3f8] sm:$0xff] }
 0x12d   :  { %3205 = vmatpush1.bf16.msra.mxu0 %v6295_v28  ;;  %v6351_v28 = vcombine.low %v359_v12, %v363_v13  ;;  %v415_v12 = vld [vmem:[%s10013_s1 + $0xbd0] sm:$0xff] }
 0x12e   :  { %3206 = vmatprep.subr.bf16.mxu0 %v6304_v32  ;;  %v124_v32 = vld [vmem:[%s10013_s1 + $0x2b8] sm:$0xff]  ;;  %v419_v13 = vld [vmem:[%s10013_s1 + $0xbf0] sm:$0xff] }
 0x12f   :  { %3289 = vmatpush1.bf16.msra.mxu1 %v6049_v35  ;;  %v6105_v35 = vcombine.low %v112_v24, %v116_v54  ;;  %v168_v24 = vld [vmem:[%s10013_s1 + $0x418] sm:$0xff] }
 0x130   :  { %3290 = vmatprep.subr.bf16.mxu1 %v6058_v37  ;;  %v6114_v37 = vcombine.high %v120_v31, %v124_v32  ;;  %v172_v54 = vld [vmem:[%s10013_s1 + $0x438] sm:$0xff] }
 0x131   :  { %3207 = vmatpush1.bf16.msra.mxu0 %v6303_v36  ;;  %v6359_v36 = vcombine.low %v367_v22, %v371_v23  ;;  %v423_v22 = vld [vmem:[%s10013_s1 + $0xc10] sm:$0xff] }
 0x132   :  { %3208 = vmatprep.subr.bf16.mxu0 %v6312_v58  ;;  %v6368_v58 = vcombine.high %v375_v30, %v379_v34  ;;  %v427_v23 = vld [vmem:[%s10013_s1 + $0xc30] sm:$0xff] }
 0x133   :  { %3291 = vmatpush1.bf16.msra.mxu1 %v6057_v42  ;;  %v6113_v42 = vcombine.low %v120_v31, %v124_v32  ;;  %v435_v31 = vld [vmem:[%s10013_s1 + $0xc70] sm:$0xff]  ;;  %v6416_v32 = vcombine.high %v423_v22, %v427_v23 }
 0x134   :  { %3292 = vmatprep.subr.bf16.mxu1 %v6066_v44  ;;  %v6122_v44 = vcombine.high %v128_v40, %v132_v41 }
 0x135   :  { %3209 = vmatpush1.bf16.msra.mxu0 %v6311_v43  ;;  %v6367_v43 = vcombine.low %v375_v30, %v379_v34  ;;  %v431_v30 = vld [vmem:[%s10013_s1 + $0xc50] sm:$0xff]  ;;  %v180_v34 = vld [vmem:[%s10013_s1 + $0x478] sm:$0xff] }
 0x136   :  { %3210 = vmatprep.subr.bf16.mxu0 %v6320_v49  ;;  %v6376_v49 = vcombine.high %v383_v38, %v387_v19 }
 0x137   :  { %3293 = vmatpush1.bf16.msra.mxu1 %v6065_v51  ;;  %v6121_v51 = vcombine.low %v128_v40, %v132_v41  ;;  %v184_v40 = vld [vmem:[%s10013_s1 + $0x498] sm:$0xff] }
 0x138   :  { %3294 = vmatprep.subr.bf16.mxu1 %v6074_v55  ;;  %v6130_v55 = vcombine.high %v136_v48, %v140_v50  ;;  %v188_v41 = vld [vmem:[%s10013_s1 + $0x4b8] sm:$0xff] }
 0x139   :  { %3211 = vmatpush1.bf16.msra.mxu0 %v6319_v52  ;;  %v6375_v52 = vcombine.low %v383_v38, %v387_v19  ;;  %v439_v38 = vld [vmem:[%s10013_s1 + $0xc90] sm:$0xff] }
 0x13a   :  { %3212 = vmatprep.subr.bf16.mxu0 %v6328_v63  ;;  %v6384_v63 = vcombine.high %v391_v45, %v395_v47  ;;  %v443_v19 = vld [vmem:[%s10013_s1 + $0xcb0] sm:$0xff] }
 0x13b   :  { %3295 = vmatpush1.bf16.msra.mxu1 %v6073_v1  ;;  %v6129_v1 = vcombine.low %v136_v48, %v140_v50  ;;  %v487_v48 = vlaneseq  ;;  %v196_v50 = vld [vmem:[%s10013_s1 + $0x4f8] sm:$0xff] }
 0x13c   :  { %3296 = vmatprep.subr.bf16.mxu1 %v6082_v3  ;;  %v6138_v3 = vcombine.high %v144_v60, %v148_v0 }
 0x13d   :  { %3213 = vmatpush1.bf16.msra.mxu0 %v6327_v2  ;;  %v6383_v2 = vcombine.low %v391_v45, %v395_v47  ;;  %v447_v45 = vld [vmem:[%s10013_s1 + $0xcd0] sm:$0xff] }
 0x13e   :  { %3214 = vmatprep.subr.bf16.mxu0 %v6336_v7  ;;  %v6392_v7 = vcombine.high %v399_v56, %v403_v59  ;;  %v451_v47 = vld [vmem:[%s10013_s1 + $0xcf0] sm:$0xff] }
 0x13f   :  { %3297 = vmatpush1.bf16.msra.mxu1 %v6081_v9  ;;  %v6137_v9 = vcombine.low %v144_v60, %v148_v0  ;;  %v200_v60 = vld [vmem:[%s10013_s1 + $0x518] sm:$0xff] }
 0x140   :  { %3298 = vmatprep.subr.bf16.mxu1 %v6090_v11  ;;  %v6146_v11 = vcombine.high %v152_v6, %v156_v8  ;;  %v204_v0 = vld [vmem:[%s10013_s1 + $0x538] sm:$0xff] }
 0x141   :  { %3215 = vmatpush1.bf16.msra.mxu0 %v6335_v10  ;;  %v6391_v10 = vcombine.low %v399_v56, %v403_v59  ;;  %v455_v56 = vld [vmem:[%s10013_s1 + $0xd10] sm:$0xff] }
 0x142   :  { %3216 = vmatprep.subr.bf16.mxu0 %v6344_v15  ;;  %v6400_v15 = vcombine.high %v407_v4, %v411_v5  ;;  %v459_v59 = vld [vmem:[%s10013_s1 + $0xd30] sm:$0xff] }
 0x143   :  { %3299 = vmatpush1.bf16.msra.mxu1 %v6089_v18  ;;  %v6145_v18 = vcombine.low %v152_v6, %v156_v8  ;;  %v467_v6 = vld [vmem:[%s10013_s1 + $0xd70] sm:$0xff] }
 0x144   :  { %3300 = vmatprep.subr.bf16.mxu1 %v6098_v53  ;;  %v6154_v53 = vcombine.high %v160_v14, %v164_v17 }
 0x145   :  { %3217 = vmatpush1.bf16.msra.mxu0 %v6343_v20  ;;  %v6399_v20 = vcombine.low %v407_v4, %v411_v5  ;;  %v6194_v4 = vcombine.high %v200_v60, %v204_v0  ;;  %v463_v5 = vld [vmem:[%s10013_s1 + $0xd50] sm:$0xff] }
 0x146   :  { %3218 = vmatprep.subr.bf16.mxu0 %v6352_v25  ;;  %v6408_v25 = vcombine.high %v415_v12, %v419_v13 }
 0x147   :  { %3301 = vmatpush1.bf16.msra.mxu1 %v6097_v27  ;;  %v6153_v27 = vcombine.low %v160_v14, %v164_v17  ;;  %v475_v17 = vld [vmem:[%s10013_s1 + $0xdb0] sm:$0xff] }
 0x148   :  { %3302 = vmatprep.subr.bf16.mxu1 %v6106_v29  ;;  %v6162_v29 = vcombine.high %v168_v24, %v172_v54 }
 0x149   :  { %3219 = vmatpush1.bf16.msra.mxu0 %v6351_v28  ;;  %v6407_v28 = vcombine.low %v415_v12, %v419_v13  ;;  %v6193_v12 = vcombine.low %v200_v60, %v204_v0  ;;  %v6447_v13 = vcombine.low %v455_v56, %v459_v59 }
 0x14a   :  { %3220 = vmatprep.subr.bf16.mxu0 %v6360_v39  ;;  %v176_v39 = vld [vmem:[%s10013_s1 + $0x458] sm:$0xff] }
 0x14b   :  { %3303 = vmatpush1.bf16.msra.mxu1 %v6105_v35  ;;  %v6161_v35 = vcombine.low %v168_v24, %v172_v54 }
 0x14c   :  { %3304 = vmatprep.subr.bf16.mxu1 %v6114_v37  ;;  %v6170_v37 = vcombine.high %v176_v39, %v180_v34 }
 0x14d   :  { %3221 = vmatpush1.bf16.msra.mxu0 %v6359_v36  ;;  %v6415_v36 = vcombine.low %v423_v22, %v427_v23  ;;  %v220_v22 = vld [vmem:[%s10013_s1 + $0x5b8] sm:$0xff] }
 0x14e   :  { %3222 = vmatprep.subr.bf16.mxu0 %v6368_v58  ;;  %v6424_v58 = vcombine.high %v431_v30, %v435_v31 }
 0x14f   :  { %3305 = vmatpush1.bf16.msra.mxu1 %v6113_v42  ;;  %v6169_v42 = vcombine.low %v176_v39, %v180_v34  ;;  %v483_v34 = vld [vmem:[%s10013_s1 + $0xdf0] sm:$0xff] }
 0x150   :  { %3306 = vmatprep.subr.bf16.mxu1 %v6122_v44  ;;  %v6178_v44 = vcombine.high %v184_v40, %v188_v41 }
 0x151   :  { %3223 = vmatpush1.bf16.msra.mxu0 %v6367_v43  ;;  %v6423_v43 = vcombine.low %v431_v30, %v435_v31  ;;  %v228_v31 = vld [vmem:[%s10013_s1 + $0x5f8] sm:$0xff] }
 0x152   :  { %3224 = vmatprep.subr.bf16.mxu0 %v6376_v49  ;;  %v6432_v49 = vcombine.high %v439_v38, %v443_v19 }
 0x153   :  { %3307 = vmatpush1.bf16.msra.mxu1 %v6121_v51  ;;  %v6177_v51 = vcombine.low %v184_v40, %v188_v41 }
 0x154   :  { %3308 = vmatprep.subr.bf16.mxu1 %v6130_v55 }
 0x155   :  { %3225 = vmatpush1.bf16.msra.mxu0 %v6375_v52  ;;  %v6431_v52 = vcombine.low %v439_v38, %v443_v19 }
 0x156   :  { %3226 = vmatprep.subr.bf16.mxu0 %v6384_v63  ;;  %v8666_v63 = vshrl.u32 %v487_v48, 7  ;;  %v244_v48 = vld [vmem:[%s10013_s1 + $0x678] sm:$0xff] }
 0x157   :  { %3309 = vmatpush1.bf16.msra.mxu1 %v6129_v1 }
 0x158   :  { %3310 = vmatprep.subr.bf16.mxu1 %v6138_v3  ;;  %v6439_v3 = vcombine.low %v447_v45, %v451_v47  ;;  %v8686_v8 = vsub.s32 0, %v8666_v63 }
 0x159   :  { %3227 = vmatpush1.bf16.msra.mxu0 %v6383_v2  ;;  %v8674_v2 = vld [vmem:[%s10016_s2] sm:$0xff] }
 0x15a   :  { %3228 = vmatprep.subr.bf16.mxu0 %v6392_v7  ;;  %v208_v7 = vld [vmem:[%s10013_s1 + $0x558] sm:$0xff] }
 0x15b   :  { %3311 = vmatpush1.bf16.msra.mxu1 %v6137_v9  ;;  %v6448_v9 = vcombine.high %v455_v56, %v459_v59  ;;  %v248_v56 = vld [vmem:[%s10013_s1 + $0x698] sm:$0xff] }
 0x15c   :  { %3312 = vmatprep.subr.bf16.mxu1 %v6146_v11  ;;  %v8692_v11 = vsub.s32 1, %v8666_v63  ;;  %v252_v59 = vld [vmem:[%s10013_s1 + $0x6b8] sm:$0xff] }
 0x15d   :  { %3229 = vmatpush1.bf16.msra.mxu0 %v6391_v10  ;;  %v212_v10 = vld [vmem:[%s10013_s1 + $0x578] sm:$0xff] }
 0x15e   :  { %3230 = vmatprep.subr.bf16.mxu0 %v6400_v15  ;;  %v6202_v14 = vcombine.high %v208_v7, %v212_v10  ;;  %v471_v15 = vld [vmem:[%s10013_s1 + $0xd90] sm:$0xff]  ;;  %v494_v23 = vrot.slane %v8674_v2, %v8692_v11  ;;  %v6201_v24 = vcombine.low %v208_v7, %v212_v10  ;;  %v6241_v7 = vcombine.low %v248_v56, %v252_v59 }
 0x15f   :  { %3313 = vmatpush1.bf16.msra.mxu1 %v6145_v18  ;;  %v216_v18 = vld [vmem:[%s10013_s1 + $0x598] sm:$0xff]  ;;  %v6464_v30 = vcombine.high %v471_v15, %v475_v17  ;;  %v6463_v19 = vcombine.low %v471_v15, %v475_v17  ;;  %v6939_v17 = vld [vmem:[%s10015_s3 + $0x60] ss:$16 sps:$4 sm:$0xff]  }
 0x160   :  { %3314 = vmatprep.subr.bf16.mxu1 %v6154_v53  ;;  %v6456_v53 = vcombine.high %v463_v5, %v467_v6  ;;  %v6210_v54 = vcombine.high %v216_v18, %v220_v22  ;;  %v2829_v39 = vadd.f32 %v8407_v62, %v494_v23  ;;  %v232_v62 = vld [vmem:[%s10013_s1 + $0x618] sm:$0xff] }
 0x161   :  { %3231 = vmatpush1.bf16.msra.mxu0 %v6399_v20  ;;  %v490_v20 = vrot.slane %v8674_v2, %v8686_v8 }
 0x162   :  { %3232 = vmatprep.subr.bf16.mxu0 %v6408_v25  ;;  %v6455_v25 = vcombine.low %v463_v5, %v467_v6  ;;  %v256_v5 = vld [vmem:[%s10013_s1 + $0x6d8] sm:$0xff] }
 0x163   :  { %3315 = vmatpush1.bf16.msra.mxu1 %v6153_v27  ;;  %v479_v27 = vld [vmem:[%s10013_s1 + $0xdd0] sm:$0xff]  ;;  %v260_v6 = vld [vmem:[%s10013_s1 + $0x6f8] sm:$0xff] }
 0x164   :  { %3325 = vmatprep.subr.bf16.mxu1 %v6162_v29  ;;  %v2827_v29 = vadd.f32 %v8402_v57, %v490_v20  ;;  %v6472_v41 = vcombine.high %v479_v27, %v483_v34  ;;  %v6250_v10 = vcombine.high %v256_v5, %v260_v6  ;;  %v6249_v15 = vcombine.low %v256_v5, %v260_v6  ;;  %v6944_v20 = vld [vmem:[%s10015_s3 + $0x84] ss:$16 sps:$4 sm:$0xff]   ;;  %v332_v5 = vld [vmem:[%s10013_s1 + $0x938] sm:$0xff] }
 0x165   :  { %3233 = vmatpush1.bf16.msra.mxu0 %v6407_v28  ;;  %v224_v28 = vld [vmem:[%s10013_s1 + $0x5d8] sm:$0xff] }
 0x166   :  { %3243 = vmatprep.subr.bf16.mxu0 %v6416_v32  ;;  %3317 = vmatmul.mubr.bf16.vlgmr.msra.gmra.mrb[8].mxu1 %v7711_v16  ;;  %v192_v16 = vld [vmem:[%s10013_s1 + $0x4d8] sm:$0xff]  ;;  %v6218_v40 = vcombine.high %v224_v28, %v228_v31 }
 0x167   :  { %3326 = vmatpush1.bf16.msra.mxu1 %v6161_v35  ;;  %3357 = vmatprep.mubr.bf16.mxu1 %v7591_v61  ;;  %v6186_v55 = vcombine.high %v192_v16, %v196_v50  ;;  %v6440_v61 = vcombine.high %v447_v45, %v451_v47  ;;  %v6185_v1 = vcombine.low %v192_v16, %v196_v50  ;;  %v6932_v47 = vld [vmem:[%s10015_s3 + $0x4] ss:$16 sps:$4 sm:$0xff]   ;;  %v240_v16 = vld [vmem:[%s10013_s1 + $0x658] sm:$0xff] }
 0x168   :  { %3235 = vmatmul.mubr.bf16.vlgmr.msra.gmra.mrb[4].mxu0 %v7930_v33  ;;  %3327 = vmatprep.subr.bf16.mxu1 %v6170_v37  ;;  %v6209_v37 = vcombine.low %v216_v18, %v220_v22  ;;  %v6233_v0 = vcombine.low %v240_v16, %v244_v48  ;;  %v276_v22 = vld [vmem:[%s10013_s1 + $0x778] sm:$0xff] }
 0x169   :  { %3244 = vmatpush1.bf16.msra.mxu0 %v6415_v36  ;;  %3275 = vmatprep.mubr.bf16.mxu0 %v7428_v46 }
 0x16a   :  { %3245 = vmatprep.subr.bf16.mxu0 %v6424_v58 }
 0x16b   :  { %3328 = vmatpush1.bf16.msra.mxu1 %v6169_v42  ;;  %v236_v42 = vld [vmem:[%s10013_s1 + $0x638] sm:$0xff] }
 0x16c   :  { %3329 = vmatprep.subr.bf16.mxu1 %v6178_v44  ;;  %v6471_v44 = vcombine.low %v479_v27, %v483_v34  ;;  %v6226_v45 = vcombine.high %v232_v62, %v236_v42  ;;  %v6225_v50 = vcombine.low %v232_v62, %v236_v42  ;;  %v280_v27 = vld [vmem:[%s10013_s1 + $0x798] sm:$0xff]  ;;  %v6956_v42 = vld [vmem:[%s10015_s3 + $0x104] ss:$16 sps:$4 sm:$0xff]  }
 0x16d   :  { %3246 = vmatpush1.bf16.msra.mxu0 %v6423_v43  ;;  %v6217_v43 = vcombine.low %v224_v28, %v228_v31  ;;  %v284_v28 = vld [vmem:[%s10013_s1 + $0x7b8] sm:$0xff] }
 0x16e   :  { %3247 = vmatprep.subr.bf16.mxu0 %v6432_v49  ;;  %v6274_v31 = vcombine.high %v280_v27, %v284_v28  ;;  %v292_v34 = vld [vmem:[%s10013_s1 + $0x7f8] sm:$0xff] }
 0x16f   :  { %3330 = vmatpush1.bf16.msra.mxu1 %v6177_v51  ;;  %v6930_v51 = vld [vmem:[%s10015_s3] ss:$16 sps:$4 sm:$0xff]  }
 0x170   :  { %3331 = vmatprep.subr.bf16.mxu1 %v6186_v55  ;;  %v6935_v55 = vld [vmem:[%s10015_s3 + $0x24] ss:$16 sps:$4 sm:$0xff]  }
 0x171   :  { %3248 = vmatpush1.bf16.msra.mxu0 %v6431_v52  ;;  %v6234_v52 = vcombine.high %v240_v16, %v244_v48  ;;  %v6959_v48 = vld [vmem:[%s10015_s3 + $0x124] ss:$16 sps:$4 sm:$0xff]  }
 0x172   :  { %3249 = vmatprep.subr.bf16.mxu0 %v6440_v61  ;;  %v8758_v61 = vld [vmem:[%s10014_s0 + $0x18] ss:$0 sps:$4 sm:$0xff]  }
 0x173   :  { %3332 = vmatpush1.bf16.msra.mxu1 %v6185_v1  ;;  %v6933_v1 = vld [vmem:[%s10015_s3 + $0x20] ss:$16 sps:$4 sm:$0xff]  }
 0x174   :  { %3333 = vmatprep.subr.bf16.mxu1 %v6194_v4  ;;  %v6938_v4 = vld [vmem:[%s10015_s3 + $0x44] ss:$16 sps:$4 sm:$0xff]  }
 0x175   :  { %3250 = vmatpush1.bf16.msra.mxu0 %v6439_v3  ;;  %v6242_v3 = vcombine.high %v248_v56, %v252_v59  ;;  %v6962_v56 = vld [vmem:[%s10015_s3 + $0x144] ss:$16 sps:$4 sm:$0xff]  }
 0x176   :  { %3251 = vmatprep.subr.bf16.mxu0 %v6448_v9  ;;  %v6936_v9 = vld [vmem:[%s10015_s3 + $0x40] ss:$16 sps:$4 sm:$0xff]  }
 0x177   :  { %3334 = vmatpush1.bf16.msra.mxu1 %v6193_v12  ;;  %v6941_v12 = vld [vmem:[%s10015_s3 + $0x64] ss:$16 sps:$4 sm:$0xff]  }
 0x178   :  { %3335 = vmatprep.subr.bf16.mxu1 %v6202_v14  ;;  %v268_v14 = vld [vmem:[%s10013_s1 + $0x738] sm:$0xff] }
 0x179   :  { %3252 = vmatpush1.bf16.msra.mxu0 %v6447_v13  ;;  %v264_v13 = vld [vmem:[%s10013_s1 + $0x718] sm:$0xff] }
 0x17a   :  { %3253 = vmatprep.subr.bf16.mxu0 %v6456_v53  ;;  %v6258_v18 = vcombine.high %v264_v13, %v268_v14  ;;  %v272_v53 = vld [vmem:[%s10013_s1 + $0x758] sm:$0xff]  ;;  %v6257_v23 = vcombine.low %v264_v13, %v268_v14 }
 0x17b   :  { %v2949_v32 = vpop.f32.mrb[0].mxu0  ;;  %3336 = vmatpush1.bf16.msra.mxu1 %v6201_v24  ;;  %v6942_v24 = vld [vmem:[%s10015_s3 + $0x80] ss:$16 sps:$4 sm:$0xff]   ;;  %v340_v13 = vld [vmem:[%s10013_s1 + $0x978] sm:$0xff] }
 0x17c   :  { %v8724_v35 = vadd.f32 %v2949_v32, %v2827_v29  ;;  %v2951_v36 = vpop.f32.mrb[1].mxu0  ;;  %3337 = vmatprep.subr.bf16.mxu1 %v6210_v54  ;;  %v6947_v54 = vld [vmem:[%s10015_s3 + $0xa4] ss:$16 sps:$4 sm:$0xff]   ;;  %v6265_v29 = vcombine.low %v272_v53, %v276_v22  ;;  %v288_v32 = vld [vmem:[%s10013_s1 + $0x7d8] sm:$0xff] }
 0x17d   :  { %v6837_v38 = vadd.f32 %v2951_v36, %v2829_v39  ;;  %v2953_v57 = vpop.f32.mrb[2].mxu0  ;;  %3254 = vmatpush1.bf16.msra.mxu0 %v6455_v25  ;;  %v6266_v25 = vcombine.high %v272_v53, %v276_v22  ;;  %v6950_v39 = vld [vmem:[%s10015_s3 + $0xc4] ss:$16 sps:$4 sm:$0xff]   ;;  %v6273_v36 = vcombine.low %v280_v27, %v284_v28  ;;  %v6281_v62 = vcombine.low %v288_v32, %v292_v34  ;;  %v348_v53 = vld [vmem:[%s10013_s1 + $0x9b8] sm:$0xff] }
 0x17e   :  { %v2954_v58 = vpop.f32.mrb[3].mxu0  ;;  %3255 = vmatprep.subr.bf16.mxu0 %v6464_v30  ;;  %v6945_v30 = vld [vmem:[%s10015_s3 + $0xa0] ss:$16 sps:$4 sm:$0xff]   ;;  %v6953_v57 = vld [vmem:[%s10015_s3 + $0xe4] ss:$16 sps:$4 sm:$0xff]   ;;  %v356_v27 = vld [vmem:[%s10013_s1 + $0x9f8] sm:$0xff] }
 0x17f   :  { %3338 = vmatpush1.bf16.msra.mxu1 %v6209_v37  ;;  %v3449_v49 = vmax.f32 %v6837_v38, 0.0  ;;  %v6948_v37 = vld [vmem:[%s10015_s3 + $0xc0] ss:$16 sps:$4 sm:$0xff]   ;;  %v6282_v38 = vcombine.high %v288_v32, %v292_v34  ;;  %v364_v32 = vld [vmem:[%s10013_s1 + $0xa38] sm:$0xff] }
 0x180   :  { %3339 = vmatprep.subr.bf16.mxu1 %v6218_v40  ;;  %v300_v40 = vld [vmem:[%s10013_s1 + $0x838] sm:$0xff]  ;;  %v6951_v58 = vld [vmem:[%s10015_s3 + $0xe0] ss:$16 sps:$4 sm:$0xff]  }
 0x181   :  { %3256 = vmatpush1.bf16.msra.mxu0 %v6463_v19  ;;  %v8753_v60 = vpack.c.bf16 %v3449_v49, %v3449_v49  ;;  %v296_v19 = vld [vmem:[%s10013_s1 + $0x818] sm:$0xff] }
 0x182   :  { %3257 = vmatprep.subr.bf16.mxu0 %v6472_v41  ;;  %v6290_v41 = vcombine.high %v296_v19, %v300_v40  ;;  %v312_v49 = vld [vmem:[%s10013_s1 + $0x898] sm:$0xff] }
 0x183   :  { %3340 = vmatpush1.bf16.msra.mxu1 %v6217_v43  ;;  %v304_v43 = vld [vmem:[%s10013_s1 + $0x858] sm:$0xff] }
 0x184   :  { %3341 = vmatprep.subr.bf16.mxu1 %v6226_v45  ;;  %v6289_v45 = vcombine.low %v296_v19, %v300_v40  ;;  %v368_v19 = vld [vmem:[%s10013_s1 + $0xa58] sm:$0xff] }
 0x185   :  { %3258 = vmatpush1.bf16.msra.mxu0 %v6471_v44  ;;  %v308_v44 = vld [vmem:[%s10013_s1 + $0x878] sm:$0xff] }
 0x186   :  { %5022 = vmatprep.subr.bf16.mxu0 %v6932_v47  ;;  %v6954_v47 = vld [vmem:[%s10015_s3 + $0x100] ss:$16 sps:$4 sm:$0xff]   ;;  %v6298_v16 = vcombine.high %v304_v43, %v308_v44  ;;  %v372_v40 = vld [vmem:[%s10013_s1 + $0xa78] sm:$0xff] }
 0x187   :  { %3342 = vmatpush1.bf16.msra.mxu1 %v6225_v50  ;;  %v316_v50 = vld [vmem:[%s10013_s1 + $0x8b8] sm:$0xff] }
 0x188   :  { %3276 = vmatmul.mubr.bf16.vlgmr.msra.gmra.mrb[4].mxu0 %v8758_v61  ;;  %3343 = vmatprep.subr.bf16.mxu1 %v6234_v52  ;;  %v6957_v52 = vld [vmem:[%s10015_s3 + $0x120] ss:$16 sps:$4 sm:$0xff]   ;;  %v6305_v59 = vcombine.low %v312_v49, %v316_v50 }
 0x189   :  { %5023 = vmatpush1.bf16.msra.mxu0 %v6930_v51  ;;  %5054 = vmatprep.mubr.bf16.mxu0 %v8753_v60  ;;  %v6297_v51 = vcombine.low %v304_v43, %v308_v44  ;;  %v376_v43 = vld [vmem:[%s10013_s1 + $0xa98] sm:$0xff] }
 0x18a   :  { %5024 = vmatprep.subr.bf16.mxu0 %v6935_v55  ;;  %v6306_v55 = vcombine.high %v312_v49, %v316_v50  ;;  %v380_v44 = vld [vmem:[%s10013_s1 + $0xab8] sm:$0xff] }
 0x18b   :  { %3344 = vmatpush1.bf16.msra.mxu1 %v6233_v0  ;;  %v6960_v0 = vld [vmem:[%s10015_s3 + $0x140] ss:$16 sps:$4 sm:$0xff]   ;;  %v384_v49 = vld [vmem:[%s10013_s1 + $0xad8] sm:$0xff] }
 0x18c   :  { %3345 = vmatprep.subr.bf16.mxu1 %v6242_v3  ;;  %v6965_v3 = vld [vmem:[%s10015_s3 + $0x164] ss:$16 sps:$4 sm:$0xff]   ;;  %v388_v50 = vld [vmem:[%s10013_s1 + $0xaf8] sm:$0xff] }
 0x18d   :  { %5025 = vmatpush1.bf16.msra.mxu0 %v6933_v1 }
 0x18e   :  { %5026 = vmatprep.subr.bf16.mxu0 %v6938_v4  ;;  %v328_v4 = vld [vmem:[%s10013_s1 + $0x918] sm:$0xff] }
 0x18f   :  { %3346 = vmatpush1.bf16.msra.mxu1 %v6241_v7  ;;  %v6963_v7 = vld [vmem:[%s10015_s3 + $0x160] ss:$16 sps:$4 sm:$0xff]   ;;  %v6321_v14 = vcombine.low %v328_v4, %v332_v5 }
 0x190   :  { %3347 = vmatprep.subr.bf16.mxu1 %v6250_v10  ;;  %v6968_v10 = vld [vmem:[%s10015_s3 + $0x184] ss:$16 sps:$4 sm:$0xff]  }
 0x191   :  { %5027 = vmatpush1.bf16.msra.mxu0 %v6936_v9  ;;  %v6322_v9 = vcombine.high %v328_v4, %v332_v5  ;;  %v400_v4 = vld [vmem:[%s10013_s1 + $0xb58] sm:$0xff] }
 0x192   :  { %5028 = vmatprep.subr.bf16.mxu0 %v6941_v12  ;;  %v336_v12 = vld [vmem:[%s10013_s1 + $0x958] sm:$0xff] }
 0x193   :  { %3348 = vmatpush1.bf16.msra.mxu1 %v6249_v15  ;;  %v6966_v15 = vld [vmem:[%s10015_s3 + $0x180] ss:$16 sps:$4 sm:$0xff]   ;;  %v6329_v22 = vcombine.low %v336_v12, %v340_v13  ;;  %v404_v5 = vld [vmem:[%s10013_s1 + $0xb78] sm:$0xff] }
 0x194   :  { %3349 = vmatprep.subr.bf16.mxu1 %v6258_v18  ;;  %v6971_v18 = vld [vmem:[%s10015_s3 + $0x1a4] ss:$16 sps:$4 sm:$0xff]  }
 0x195   :  { %5029 = vmatpush1.bf16.msra.mxu0 %v6939_v17  ;;  %v6330_v17 = vcombine.high %v336_v12, %v340_v13  ;;  %v408_v12 = vld [vmem:[%s10013_s1 + $0xb98] sm:$0xff] }
 0x196   :  { %5030 = vmatprep.subr.bf16.mxu0 %v6944_v20  ;;  %v344_v20 = vld [vmem:[%s10013_s1 + $0x998] sm:$0xff] }
 0x197   :  { %3350 = vmatpush1.bf16.msra.mxu1 %v6257_v23  ;;  %v6969_v23 = vld [vmem:[%s10015_s3 + $0x1a0] ss:$16 sps:$4 sm:$0xff]   ;;  %v6337_v28 = vcombine.low %v344_v20, %v348_v53  ;;  %v412_v13 = vld [vmem:[%s10013_s1 + $0xbb8] sm:$0xff] }
 0x198   :  { %3351 = vmatprep.subr.bf16.mxu1 %v6266_v25  ;;  %v6974_v25 = vld [vmem:[%s10015_s3 + $0x1c4] ss:$16 sps:$4 sm:$0xff]  }
 0x199   :  { %5031 = vmatpush1.bf16.msra.mxu0 %v6942_v24  ;;  %v6338_v24 = vcombine.high %v344_v20, %v348_v53  ;;  %v416_v20 = vld [vmem:[%s10013_s1 + $0xbd8] sm:$0xff] }
 0x19a   :  { %5032 = vmatprep.subr.bf16.mxu0 %v6947_v54  ;;  %v352_v54 = vld [vmem:[%s10013_s1 + $0x9d8] sm:$0xff] }
 0x19b   :  { %3352 = vmatpush1.bf16.msra.mxu1 %v6265_v29  ;;  %v6972_v29 = vld [vmem:[%s10015_s3 + $0x1c0] ss:$16 sps:$4 sm:$0xff]   ;;  %v6345_v34 = vcombine.low %v352_v54, %v356_v27  ;;  %v420_v53 = vld [vmem:[%s10013_s1 + $0xbf8] sm:$0xff] }
 0x19c   :  { %3353 = vmatprep.subr.bf16.mxu1 %v6274_v31  ;;  %v6977_v31 = vld [vmem:[%s10015_s3 + $0x1e4] ss:$16 sps:$4 sm:$0xff]  }
 0x19d   :  { %5033 = vmatpush1.bf16.msra.mxu0 %v6945_v30  ;;  %v6346_v30 = vcombine.high %v352_v54, %v356_v27  ;;  %v424_v54 = vld [vmem:[%s10013_s1 + $0xc18] sm:$0xff] }
 0x19e   :  { %5034 = vmatprep.subr.bf16.mxu0 %v6950_v39  ;;  %v360_v39 = vld [vmem:[%s10013_s1 + $0xa18] sm:$0xff] }
 0x19f   :  { %3354 = vmatpush1.bf16.msra.mxu1 %v6273_v36  ;;  %v6975_v36 = vld [vmem:[%s10015_s3 + $0x1e0] ss:$16 sps:$4 sm:$0xff]   ;;  %v428_v27 = vld [vmem:[%s10013_s1 + $0xc38] sm:$0xff] }
 0x1a0   :  { %3355 = vmatprep.subr.bf16.mxu1 %v6282_v38  ;;  %v3448_v38 = vmax.f32 %v8724_v35, 0.0  ;;  %v6978_v35 = vld [vmem:[%s10015_s3 + $0x200] ss:$16 sps:$4 sm:$0xff]  }
 0x1a1   :  { %5035 = vmatpush1.bf16.msra.mxu0 %v6948_v37  ;;  %v6354_v37 = vcombine.high %v360_v39, %v364_v32 }
 0x1a2   :  { %5036 = vmatprep.subr.bf16.mxu0 %v6953_v57  ;;  %v6980_v57 = vld [vmem:[%s10015_s3 + $0x204] ss:$16 sps:$4 sm:$0xff]  }
 0x1a3   :  { %3356 = vmatpush1.bf16.msra.mxu1 %v6281_v62  ;;  %v6353_v62 = vcombine.low %v360_v39, %v364_v32  ;;  %v432_v39 = vld [vmem:[%s10013_s1 + $0xc58] sm:$0xff] }
 0x1a4   :  { %3366 = vmatprep.subr.bf16.mxu1 %v6290_v41  ;;  %v8948_v41 = vpack.c.bf16 %v3448_v38, %v3448_v38  ;;  %v436_v32 = vld [vmem:[%s10013_s1 + $0xc78] sm:$0xff]  ;;  %v7007_v38 = vld [vmem:[%s10015_s3 + $0x324] ss:$16 sps:$4 sm:$0xff]  }
 0x1a5   :  { %5037 = vmatpush1.bf16.msra.mxu0 %v6951_v58  ;;  %v6362_v58 = vcombine.high %v368_v19, %v372_v40 }
 0x1a6   :  { %5038 = vmatprep.subr.bf16.mxu0 %v6956_v42  ;;  %3358 = vmatmul.mubr.bf16.vlgmr.msra.gmra.mrb[8].mxu1 %v7726_v21  ;;  %v320_v21 = vld [vmem:[%s10013_s1 + $0x8d8] sm:$0xff]  ;;  %v6983_v42 = vld [vmem:[%s10015_s3 + $0x224] ss:$16 sps:$4 sm:$0xff]  }
 0x1a7   :  { %3367 = vmatpush1.bf16.msra.mxu1 %v6289_v45  ;;  %3398 = vmatprep.mubr.bf16.mxu1 %v7736_v26  ;;  %v324_v26 = vld [vmem:[%s10013_s1 + $0x8f8] sm:$0xff]  ;;  %v6361_v45 = vcombine.low %v368_v19, %v372_v40  ;;  %v6425_v40 = vcombine.low %v432_v39, %v436_v32 }
 0x1a8   :  { %3368 = vmatprep.subr.bf16.mxu1 %v6298_v16  ;;  %v6314_v1 = vcombine.high %v320_v21, %v324_v26  ;;  %v6313_v6 = vcombine.low %v320_v21, %v324_v26  ;;  %v6370_v16 = vcombine.high %v376_v43, %v380_v44  ;;  %v392_v21 = vld [vmem:[%s10013_s1 + $0xb18] sm:$0xff] }
 0x1a9   :  { %5039 = vmatpush1.bf16.msra.mxu0 %v6954_v47  ;;  %v6981_v47 = vld [vmem:[%s10015_s3 + $0x220] ss:$16 sps:$4 sm:$0xff]   ;;  %v396_v26 = vld [vmem:[%s10013_s1 + $0xb38] sm:$0xff] }
 0x1aa   :  { %5040 = vmatprep.subr.bf16.mxu0 %v6959_v48  ;;  %v6986_v48 = vld [vmem:[%s10015_s3 + $0x244] ss:$16 sps:$4 sm:$0xff]   ;;  %v444_v19 = vld [vmem:[%s10013_s1 + $0xcb8] sm:$0xff] }
 0x1ab   :  { %3369 = vmatpush1.bf16.msra.mxu1 %v6297_v51  ;;  %v6369_v51 = vcombine.low %v376_v43, %v380_v44  ;;  %v7008_v43 = vld [vmem:[%s10015_s3 + $0x340] ss:$16 sps:$4 sm:$0xff]  }
 0x1ac   :  { %3370 = vmatprep.subr.bf16.mxu1 %v6306_v55  ;;  %v6378_v55 = vcombine.high %v384_v49, %v388_v50 }
 0x1ad   :  { %5041 = vmatpush1.bf16.msra.mxu0 %v6957_v52  ;;  %v6984_v52 = vld [vmem:[%s10015_s3 + $0x240] ss:$16 sps:$4 sm:$0xff]  }
 0x1ae   :  { %5042 = vmatprep.subr.bf16.mxu0 %v6962_v56  ;;  %v6989_v56 = vld [vmem:[%s10015_s3 + $0x264] ss:$16 sps:$4 sm:$0xff]  }
 0x1af   :  { %3371 = vmatpush1.bf16.msra.mxu1 %v6305_v59  ;;  %v6377_v59 = vcombine.low %v384_v49, %v388_v50  ;;  %v7011_v49 = vld [vmem:[%s10015_s3 + $0x360] ss:$16 sps:$4 sm:$0xff]  }
 0x1b0   :  { %3372 = vmatprep.subr.bf16.mxu1 %v6314_v1  ;;  %v6386_v1 = vcombine.high %v392_v21, %v396_v26 }
 0x1b1   :  { %5043 = vmatpush1.bf16.msra.mxu0 %v6960_v0  ;;  %v6987_v0 = vld [vmem:[%s10015_s3 + $0x260] ss:$16 sps:$4 sm:$0xff]  }
 0x1b2   :  { %5044 = vmatprep.subr.bf16.mxu0 %v6965_v3  ;;  %v6992_v3 = vld [vmem:[%s10015_s3 + $0x284] ss:$16 sps:$4 sm:$0xff]  }
 0x1b3   :  { %3373 = vmatpush1.bf16.msra.mxu1 %v6313_v6  ;;  %v6385_v6 = vcombine.low %v392_v21, %v396_v26  ;;  %v501_v21 = vsub.s32 3, %v8666_v63  ;;  %v7014_v26 = vld [vmem:[%s10015_s3 + $0x380] ss:$16 sps:$4 sm:$0xff]  }
 0x1b4   :  { %3374 = vmatprep.subr.bf16.mxu1 %v6322_v9  ;;  %v6394_v9 = vcombine.high %v400_v4, %v404_v5 }
 0x1b5   :  { %5045 = vmatpush1.bf16.msra.mxu0 %v6963_v7  ;;  %v6990_v7 = vld [vmem:[%s10015_s3 + $0x280] ss:$16 sps:$4 sm:$0xff]  }
 0x1b6   :  { %5046 = vmatprep.subr.bf16.mxu0 %v6968_v10  ;;  %v6995_v10 = vld [vmem:[%s10015_s3 + $0x2a4] ss:$16 sps:$4 sm:$0xff]  }
 0x1b7   :  { %3375 = vmatpush1.bf16.msra.mxu1 %v6321_v14  ;;  %v6393_v14 = vcombine.low %v400_v4, %v404_v5  ;;  %v476_v4 = vld [vmem:[%s10013_s1 + $0xdb8] sm:$0xff]  ;;  %v502_v5 = vrot.slane %v8674_v2, %v501_v21 }
 0x1b8   :  { %3376 = vmatprep.subr.bf16.mxu1 %v6330_v17  ;;  %v6402_v17 = vcombine.high %v408_v12, %v412_v13 }
 0x1b9   :  { %5047 = vmatpush1.bf16.msra.mxu0 %v6966_v15  ;;  %v6993_v15 = vld [vmem:[%s10015_s3 + $0x2a0] ss:$16 sps:$4 sm:$0xff]  }
 0x1ba   :  { %5048 = vmatprep.subr.bf16.mxu0 %v6971_v18  ;;  %v6998_v18 = vld [vmem:[%s10015_s3 + $0x2c4] ss:$16 sps:$4 sm:$0xff]  }
 0x1bb   :  { %3377 = vmatpush1.bf16.msra.mxu1 %v6329_v22  ;;  %v6401_v22 = vcombine.low %v408_v12, %v412_v13  ;;  %v7022_v13 = vld [vmem:[%s10015_s3 + $0x3c4] ss:$16 sps:$4 sm:$0xff]  }
 0x1bc   :  { %3378 = vmatprep.subr.bf16.mxu1 %v6338_v24  ;;  %v6410_v24 = vcombine.high %v416_v20, %v420_v53 }
 0x1bd   :  { %5049 = vmatpush1.bf16.msra.mxu0 %v6969_v23  ;;  %v6996_v23 = vld [vmem:[%s10015_s3 + $0x2c0] ss:$16 sps:$4 sm:$0xff]  }
 0x1be   :  { %5050 = vmatprep.subr.bf16.mxu0 %v6974_v25  ;;  %v7001_v25 = vld [vmem:[%s10015_s3 + $0x2e4] ss:$16 sps:$4 sm:$0xff]  }
 0x1bf   :  { %3379 = vmatpush1.bf16.msra.mxu1 %v6337_v28  ;;  %v6409_v28 = vcombine.low %v416_v20, %v420_v53 }
 0x1c0   :  { %3380 = vmatprep.subr.bf16.mxu1 %v6346_v30  ;;  %v6418_v30 = vcombine.high %v424_v54, %v428_v27 }
 0x1c1   :  { %5051 = vmatpush1.bf16.msra.mxu0 %v6972_v29  ;;  %v6999_v29 = vld [vmem:[%s10015_s3 + $0x2e0] ss:$16 sps:$4 sm:$0xff]  }
 0x1c2   :  { %5052 = vmatprep.subr.bf16.mxu0 %v6977_v31  ;;  %v7004_v31 = vld [vmem:[%s10015_s3 + $0x304] ss:$16 sps:$4 sm:$0xff]  }
 0x1c3   :  { %3381 = vmatpush1.bf16.msra.mxu1 %v6345_v34  ;;  %v6417_v34 = vcombine.low %v424_v54, %v428_v27  ;;  %v7025_v54 = vld [vmem:[%s10015_s3 + $0x3e4] ss:$16 sps:$4 sm:$0xff]  }
 0x1c4   :  { %3382 = vmatprep.subr.bf16.mxu1 %v6354_v37  ;;  %v6426_v37 = vcombine.high %v432_v39, %v436_v32  ;;  %v7049_v39 = vld [vmem:[%s10015_s3 + $0x404] ss:$16 sps:$4 sm:$0xff]   ;;  %v7026_v32 = vld [vmem:[%s10015_s3 + $0x8] ss:$16 sps:$4 sm:$0xff]  }
 0x1c5   :  { %5053 = vmatpush1.bf16.msra.mxu0 %v6975_v36  ;;  %v7002_v36 = vld [vmem:[%s10015_s3 + $0x300] ss:$16 sps:$4 sm:$0xff]  }
 0x1c6   :  { %5063 = vmatprep.subr.bf16.mxu0 %v6980_v57  ;;  %v440_v57 = vld [vmem:[%s10013_s1 + $0xc98] sm:$0xff] }
 0x1c7   :  { %3383 = vmatpush1.bf16.msra.mxu1 %v6353_v62  ;;  %v7005_v62 = vld [vmem:[%s10015_s3 + $0x320] ss:$16 sps:$4 sm:$0xff]  }
 0x1c8   :  { %5055 = vmatmul.mubr.bf16.vlgmr.msra.gmra.mrb[8].mxu0 %v8948_v41  ;;  %3384 = vmatprep.subr.bf16.mxu1 %v6362_v58  ;;  %v7010_v58 = vld [vmem:[%s10015_s3 + $0x344] ss:$16 sps:$4 sm:$0xff]  }
 0x1c9   :  { %5064 = vmatpush1.bf16.msra.mxu0 %v6978_v35  ;;  %v6434_v35 = vcombine.high %v440_v57, %v444_v19 }
 0x1ca   :  { %5065 = vmatprep.subr.bf16.mxu0 %v6983_v42  ;;  %v6433_v42 = vcombine.low %v440_v57, %v444_v19  ;;  %v7029_v57 = vld [vmem:[%s10015_s3 + $0x28] ss:$16 sps:$4 sm:$0xff]   ;;  %v7034_v19 = vld [vmem:[%s10015_s3 + $0x4c] ss:$16 sps:$4 sm:$0xff]  }
 0x1cb   :  { %3385 = vmatpush1.bf16.msra.mxu1 %v6361_v45  ;;  %v7013_v45 = vld [vmem:[%s10015_s3 + $0x364] ss:$16 sps:$4 sm:$0xff]  }
 0x1cc   :  { %3386 = vmatprep.subr.bf16.mxu1 %v6370_v16  ;;  %v460_v16 = vld [vmem:[%s10013_s1 + $0xd38] sm:$0xff] }
 0x1cd   :  { %5066 = vmatpush1.bf16.msra.mxu0 %v6981_v47  ;;  %v456_v47 = vld [vmem:[%s10013_s1 + $0xd18] sm:$0xff] }
 0x1ce   :  { %5067 = vmatprep.subr.bf16.mxu0 %v6986_v48  ;;  %v6450_v50 = vcombine.high %v456_v47, %v460_v16 }
 0x1cf   :  { %3387 = vmatpush1.bf16.msra.mxu1 %v6369_v51  ;;  %v7016_v51 = vld [vmem:[%s10015_s3 + $0x384] ss:$16 sps:$4 sm:$0xff]  }
 0x1d0   :  { %3388 = vmatprep.subr.bf16.mxu1 %v6378_v55  ;;  %v468_v55 = vld [vmem:[%s10013_s1 + $0xd78] sm:$0xff] }
 0x1d1   :  { %5068 = vmatpush1.bf16.msra.mxu0 %v6984_v52  ;;  %v464_v52 = vld [vmem:[%s10013_s1 + $0xd58] sm:$0xff] }
 0x1d2   :  { %5069 = vmatprep.subr.bf16.mxu0 %v6989_v56  ;;  %v6449_v56 = vcombine.low %v456_v47, %v460_v16  ;;  %v7071_v47 = vld [vmem:[%s10015_s3 + $0x480] ss:$16 sps:$4 sm:$0xff]   ;;  %v7079_v16 = vld [vmem:[%s10015_s3 + $0x4a4] ss:$16 sps:$4 sm:$0xff]  }
 0x1d3   :  { %3389 = vmatpush1.bf16.msra.mxu1 %v6377_v59  ;;  %v6458_v59 = vcombine.high %v464_v52, %v468_v55 }
 0x1d4   :  { %3390 = vmatprep.subr.bf16.mxu1 %v6386_v1  ;;  %v7019_v1 = vld [vmem:[%s10015_s3 + $0x3a4] ss:$16 sps:$4 sm:$0xff]  }
 0x1d5   :  { %5070 = vmatpush1.bf16.msra.mxu0 %v6987_v0  ;;  %v497_v0 = vsub.s32 2, %v8666_v63 }
 0x1d6   :  { %5071 = vmatprep.subr.bf16.mxu0 %v6992_v3  ;;  %v472_v3 = vld [vmem:[%s10013_s1 + $0xd98] sm:$0xff] }
 0x1d7   :  { %3391 = vmatpush1.bf16.msra.mxu1 %v6385_v6  ;;  %v6457_v6 = vcombine.low %v464_v52, %v468_v55  ;;  %v6465_v53 = vcombine.low %v472_v3, %v476_v4  ;;  %v7044_v52 = vld [vmem:[%s10015_s3 + $0xc8] ss:$16 sps:$4 sm:$0xff]   ;;  %v7052_v55 = vld [vmem:[%s10015_s3 + $0xec] ss:$16 sps:$4 sm:$0xff]  }
 0x1d8   :  { %3392 = vmatprep.subr.bf16.mxu1 %v6394_v9  ;;  %v6466_v9 = vcombine.high %v472_v3, %v476_v4  ;;  %v7089_v3 = vld [vmem:[%s10015_s3 + $0x4e0] ss:$16 sps:$4 sm:$0xff]   ;;  %v7097_v4 = vld [vmem:[%s10015_s3 + $0x504] ss:$16 sps:$4 sm:$0xff]  }
 0x1d9   :  { %5072 = vmatpush1.bf16.msra.mxu0 %v6990_v7  ;;  %v7017_v7 = vld [vmem:[%s10015_s3 + $0x3a0] ss:$16 sps:$4 sm:$0xff]  }
 0x1da   :  { %5073 = vmatprep.subr.bf16.mxu0 %v6995_v10  ;;  %v498_v10 = vrot.slane %v8674_v2, %v497_v0 }
 0x1db   :  { %3393 = vmatpush1.bf16.msra.mxu1 %v6393_v14  ;;  %v480_v14 = vld [vmem:[%s10013_s1 + $0xdd8] sm:$0xff] }
 0x1dc   :  { %3394 = vmatprep.subr.bf16.mxu1 %v6402_v17 }
 0x1dd   :  { %5074 = vmatpush1.bf16.msra.mxu0 %v6993_v15  ;;  %v484_v15 = vld [vmem:[%s10013_s1 + $0xdf8] sm:$0xff] }
 0x1de   :  { %5075 = vmatprep.subr.bf16.mxu0 %v6998_v18 }
 0x1df   :  { %3395 = vmatpush1.bf16.msra.mxu1 %v6401_v22  ;;  %v7020_v22 = vld [vmem:[%s10015_s3 + $0x3c0] ss:$16 sps:$4 sm:$0xff]  }
 0x1e0   :  { %3396 = vmatprep.subr.bf16.mxu1 %v6410_v24 }
 0x1e1   :  { %5076 = vmatpush1.bf16.msra.mxu0 %v6996_v23  ;;  %v6474_v23 = vcombine.high %v480_v14, %v484_v15 }
 0x1e2   :  { %5077 = vmatprep.subr.bf16.mxu0 %v7001_v25 }
 0x1e3   :  { %3397 = vmatpush1.bf16.msra.mxu1 %v6409_v28  ;;  %v6473_v28 = vcombine.low %v480_v14, %v484_v15  ;;  %v7109_v14 = vld [vmem:[%s10015_s3 + $0x544] ss:$16 sps:$4 sm:$0xff]   ;;  %v7068_v15 = vld [vmem:[%s10015_s3 + $0x148] ss:$16 sps:$4 sm:$0xff]  }
 0x1e4   :  { %3407 = vmatprep.subr.bf16.mxu1 %v6418_v30  ;;  %v7028_v30 = vld [vmem:[%s10015_s3 + $0xc] ss:$16 sps:$4 sm:$0xff]  }
 0x1e5   :  { %5078 = vmatpush1.bf16.msra.mxu0 %v6999_v29  ;;  %v7023_v29 = vld [vmem:[%s10015_s3 + $0x3e0] ss:$16 sps:$4 sm:$0xff]  }
 0x1e6   :  { %5079 = vmatprep.subr.bf16.mxu0 %v7004_v31  ;;  %3399 = vmatmul.mubr.bf16.vlgmr.msra.gmra.mrb[8].mxu1 %v7930_v33  ;;  %v448_v33 = vld [vmem:[%s10013_s1 + $0xcd8] sm:$0xff] }
 0x1e7   :  { %3408 = vmatpush1.bf16.msra.mxu1 %v6417_v34  ;;  %3439 = vmatprep.mubr.bf16.mxu1 %v7428_v46  ;;  %v452_v46 = vld [vmem:[%s10013_s1 + $0xcf8] sm:$0xff] }
 0x1e8   :  { %3409 = vmatprep.subr.bf16.mxu1 %v6426_v37  ;;  %v6442_v44 = vcombine.high %v448_v33, %v452_v46  ;;  %v6441_v48 = vcombine.low %v448_v33, %v452_v46  ;;  %v7031_v34 = vld [vmem:[%s10015_s3 + $0x2c] ss:$16 sps:$4 sm:$0xff]   ;;  %v7047_v37 = vld [vmem:[%s10015_s3 + $0x400] ss:$16 sps:$4 sm:$0xff]   ;;  %v7035_v33 = vld [vmem:[%s10015_s3 + $0x68] ss:$16 sps:$4 sm:$0xff]  }
 0x1e9   :  { %5080 = vmatpush1.bf16.msra.mxu0 %v7002_v36  ;;  %v7040_v46 = vld [vmem:[%s10015_s3 + $0x8c] ss:$16 sps:$4 sm:$0xff]  }
 0x1ea   :  { %5081 = vmatprep.subr.bf16.mxu0 %v7007_v38  ;;  %v7055_v38 = vld [vmem:[%s10015_s3 + $0x424] ss:$16 sps:$4 sm:$0xff]  }
 0x1eb   :  { %3410 = vmatpush1.bf16.msra.mxu1 %v6425_v40  ;;  %v7061_v40 = vld [vmem:[%s10015_s3 + $0x444] ss:$16 sps:$4 sm:$0xff]  }
 0x1ec   :  { %3411 = vmatprep.subr.bf16.mxu1 %v6434_v35  ;;  %v7059_v35 = vld [vmem:[%s10015_s3 + $0x440] ss:$16 sps:$4 sm:$0xff]  }
 0x1ed   :  { %5082 = vmatpush1.bf16.msra.mxu0 %v7005_v62  ;;  %v7037_v62 = vld [vmem:[%s10015_s3 + $0x6c] ss:$16 sps:$4 sm:$0xff]  }
 0x1ee   :  { %5083 = vmatprep.subr.bf16.mxu0 %v7010_v58  ;;  %v7067_v58 = vld [vmem:[%s10015_s3 + $0x464] ss:$16 sps:$4 sm:$0xff]  }
 0x1ef   :  { %3412 = vmatpush1.bf16.msra.mxu1 %v6433_v42  ;;  %v7065_v42 = vld [vmem:[%s10015_s3 + $0x460] ss:$16 sps:$4 sm:$0xff]  }
 0x1f0   :  { %3413 = vmatprep.subr.bf16.mxu1 %v6442_v44  ;;  %v7038_v44 = vld [vmem:[%s10015_s3 + $0x88] ss:$16 sps:$4 sm:$0xff]  }
 0x1f1   :  { %5084 = vmatpush1.bf16.msra.mxu0 %v7008_v43  ;;  %v7073_v43 = vld [vmem:[%s10015_s3 + $0x484] ss:$16 sps:$4 sm:$0xff]  }
 0x1f2   :  { %5085 = vmatprep.subr.bf16.mxu0 %v7013_v45  ;;  %v7043_v45 = vld [vmem:[%s10015_s3 + $0xac] ss:$16 sps:$4 sm:$0xff]  }
 0x1f3   :  { %3414 = vmatpush1.bf16.msra.mxu1 %v6441_v48  ;;  %v7041_v48 = vld [vmem:[%s10015_s3 + $0xa8] ss:$16 sps:$4 sm:$0xff]  }
 0x1f4   :  { %3415 = vmatprep.subr.bf16.mxu1 %v6450_v50  ;;  %v7077_v50 = vld [vmem:[%s10015_s3 + $0x4a0] ss:$16 sps:$4 sm:$0xff]  }
 0x1f5   :  { %5086 = vmatpush1.bf16.msra.mxu0 %v7011_v49  ;;  %v7046_v49 = vld [vmem:[%s10015_s3 + $0xcc] ss:$16 sps:$4 sm:$0xff]  }
 0x1f6   :  { %5087 = vmatprep.subr.bf16.mxu0 %v7016_v51  ;;  %v7085_v51 = vld [vmem:[%s10015_s3 + $0x4c4] ss:$16 sps:$4 sm:$0xff]  }
 0x1f7   :  { %3416 = vmatpush1.bf16.msra.mxu1 %v6449_v56  ;;  %v7083_v56 = vld [vmem:[%s10015_s3 + $0x4c0] ss:$16 sps:$4 sm:$0xff]  }
 0x1f8   :  { %3417 = vmatprep.subr.bf16.mxu1 %v6458_v59  ;;  %v7050_v59 = vld [vmem:[%s10015_s3 + $0xe8] ss:$16 sps:$4 sm:$0xff]  }
 0x1f9   :  { %5088 = vmatpush1.bf16.msra.mxu0 %v7014_v26  ;;  %v3113_v12 = vpop.f32.mrb[4].mxu1  ;;  %v7091_v26 = vld [vmem:[%s10015_s3 + $0x4e4] ss:$16 sps:$4 sm:$0xff]  }
 0x1fa   :  { %5089 = vmatprep.subr.bf16.mxu0 %v7019_v1  ;;  %v3115_v17 = vpop.f32.mrb[5].mxu1  ;;  %v6838_v24 = vadd.f32 %v3113_v12, %v498_v10  ;;  %v7058_v1 = vld [vmem:[%s10015_s3 + $0x10c] ss:$16 sps:$4 sm:$0xff]   ;;  %v7062_v10 = vld [vmem:[%s10015_s3 + $0x128] ss:$16 sps:$4 sm:$0xff]  }
 0x1fb   :  { %v6839_v18 = vadd.f32 %v3115_v17, %v502_v5  ;;  %v3117_v20 = vpop.f32.mrb[6].mxu1  ;;  %3418 = vmatpush1.bf16.msra.mxu1 %v6457_v6  ;;  %v7056_v5 = vld [vmem:[%s10015_s3 + $0x108] ss:$16 sps:$4 sm:$0xff]   ;;  %v7064_v6 = vld [vmem:[%s10015_s3 + $0x12c] ss:$16 sps:$4 sm:$0xff]  }
 0x1fc   :  { %v3118_v2 = vpop.f32.mrb[7].mxu1  ;;  %3419 = vmatprep.subr.bf16.mxu1 %v6466_v9  ;;  %v3450_v31 = vmax.f32 %v6838_v24, 0.0  ;;  %v7103_v9 = vld [vmem:[%s10015_s3 + $0x524] ss:$16 sps:$4 sm:$0xff]   ;;  %v7070_v12 = vld [vmem:[%s10015_s3 + $0x14c] ss:$16 sps:$4 sm:$0xff]  }
 0x1fd   :  { %5090 = vmatpush1.bf16.msra.mxu0 %v7017_v7  ;;  %v3451_v25 = vmax.f32 %v6839_v18, 0.0  ;;  %v7095_v7 = vld [vmem:[%s10015_s3 + $0x500] ss:$16 sps:$4 sm:$0xff]   ;;  %v7076_v17 = vld [vmem:[%s10015_s3 + $0x16c] ss:$16 sps:$4 sm:$0xff]  }
 0x1fe   :  { %5091 = vmatprep.subr.bf16.mxu0 %v7022_v13  ;;  %v9150_v36 = vpack.c.bf16 %v3450_v31, %v3450_v31  ;;  %v7101_v13 = vld [vmem:[%s10015_s3 + $0x520] ss:$16 sps:$4 sm:$0xff]   ;;  %v7115_v20 = vld [vmem:[%s10015_s3 + $0x564] ss:$16 sps:$4 sm:$0xff]   ;;  %v7082_v2 = vld [vmem:[%s10015_s3 + $0x18c] ss:$16 sps:$4 sm:$0xff]  }
 0x1ff   :  { %v9132_v27 = vpack.c.bf16 %v3451_v25, %v3451_v25  ;;  %3420 = vmatpush1.bf16.msra.mxu1 %v6465_v53  ;;  %v7107_v18 = vld [vmem:[%s10015_s3 + $0x540] ss:$16 sps:$4 sm:$0xff]   ;;  %v7074_v53 = vld [vmem:[%s10015_s3 + $0x168] ss:$16 sps:$4 sm:$0xff]   ;;  %v7088_v25 = vld [vmem:[%s10015_s3 + $0x1ac] ss:$16 sps:$4 sm:$0xff]  }
 0x200   :  { %3421 = vmatprep.subr.bf16.mxu1 %v6474_v23  ;;  %v7121_v23 = vld [vmem:[%s10015_s3 + $0x584] ss:$16 sps:$4 sm:$0xff]   ;;  %v7080_v24 = vld [vmem:[%s10015_s3 + $0x188] ss:$16 sps:$4 sm:$0xff]   ;;  %v7125_v31 = vld [vmem:[%s10015_s3 + $0x5a0] ss:$16 sps:$4 sm:$0xff]  }
 0x201   :  { %5092 = vmatpush1.bf16.msra.mxu0 %v7020_v22  ;;  %5095 = vmatprep.mubr.bf16.mxu0 %v9132_v27  ;;  %v7113_v22 = vld [vmem:[%s10015_s3 + $0x560] ss:$16 sps:$4 sm:$0xff]  }
 0x202   :  { %5093 = vmatprep.subr.bf16.mxu0 %v7025_v54  ;;  %v7119_v54 = vld [vmem:[%s10015_s3 + $0x580] ss:$16 sps:$4 sm:$0xff]  }
 0x203   :  { %3422 = vmatpush1.bf16.msra.mxu1 %v6473_v28  ;;  %v7127_v28 = vld [vmem:[%s10015_s3 + $0x5a4] ss:$16 sps:$4 sm:$0xff]  }
 0x204   :  { %5186 = vmatprep.subr.bf16.mxu1 %v7028_v30  ;;  %v7094_v30 = vld [vmem:[%s10015_s3 + $0x1cc] ss:$16 sps:$4 sm:$0xff]  }
 0x205   :  { %5094 = vmatpush1.bf16.msra.mxu0 %v7023_v29  ;;  %v7086_v29 = vld [vmem:[%s10015_s3 + $0x1a8] ss:$16 sps:$4 sm:$0xff]  }
 0x206   :  { %5104 = vmatprep.subr.bf16.mxu0 %v7049_v39  ;;  %3440 = vmatmul.mubr.bf16.vlgmr.msra.gmra.mrb[8].mxu1 %v8758_v61  ;;  %v7053_v61 = vld [vmem:[%s10015_s3 + $0x420] ss:$16 sps:$4 sm:$0xff]   ;;  %v7133_v39 = vld [vmem:[%s10015_s3 + $0x5c4] ss:$16 sps:$4 sm:$0xff]  }
 0x207   :  { %5187 = vmatpush1.bf16.msra.mxu1 %v7026_v32  ;;  %5218 = vmatprep.mubr.bf16.mxu1 %v8753_v60  ;;  %v7032_v60 = vld [vmem:[%s10015_s3 + $0x48] ss:$16 sps:$4 sm:$0xff]  }
 0x208   :  { %5096 = vmatmul.mubr.bf16.vlgmr.msra.gmra.mrb[8].mxu0 %v9150_v36  ;;  %5188 = vmatprep.subr.bf16.mxu1 %v7031_v34  ;;  %v7092_v32 = vld [vmem:[%s10015_s3 + $0x1c8] ss:$16 sps:$4 sm:$0xff]   ;;  %v7100_v34 = vld [vmem:[%s10015_s3 + $0x1ec] ss:$16 sps:$4 sm:$0xff]  }
 0x209   :  { %5105 = vmatpush1.bf16.msra.mxu0 %v7047_v37  ;;  %v7131_v37 = vld [vmem:[%s10015_s3 + $0x5c0] ss:$16 sps:$4 sm:$0xff]  }
 0x20a   :  { %5106 = vmatprep.subr.bf16.mxu0 %v7055_v38  ;;  %v7139_v38 = vld [vmem:[%s10015_s3 + $0x5e4] ss:$16 sps:$4 sm:$0xff]  }
 0x20b   :  { %5189 = vmatpush1.bf16.msra.mxu1 %v7029_v57  ;;  %v7098_v57 = vld [vmem:[%s10015_s3 + $0x1e8] ss:$16 sps:$4 sm:$0xff]  }
 0x20c   :  { %5190 = vmatprep.subr.bf16.mxu1 %v7034_v19  ;;  %v7106_v19 = vld [vmem:[%s10015_s3 + $0x20c] ss:$16 sps:$4 sm:$0xff]  }
 0x20d   :  { %5107 = vmatpush1.bf16.msra.mxu0 %v7053_v61  ;;  %v7137_v61 = vld [vmem:[%s10015_s3 + $0x5e0] ss:$16 sps:$4 sm:$0xff]  }
 0x20e   :  { %5108 = vmatprep.subr.bf16.mxu0 %v7061_v40  ;;  %v7193_v40 = vld [vmem:[%s10015_s3 + $0x604] ss:$16 sps:$4 sm:$0xff]  }
 0x20f   :  { %5191 = vmatpush1.bf16.msra.mxu1 %v7032_v60  ;;  %v7104_v60 = vld [vmem:[%s10015_s3 + $0x208] ss:$16 sps:$4 sm:$0xff]  }
 0x210   :  { %5192 = vmatprep.subr.bf16.mxu1 %v7037_v62  ;;  %v7112_v62 = vld [vmem:[%s10015_s3 + $0x22c] ss:$16 sps:$4 sm:$0xff]  }
 0x211   :  { %5109 = vmatpush1.bf16.msra.mxu0 %v7059_v35  ;;  %v7110_v35 = vld [vmem:[%s10015_s3 + $0x228] ss:$16 sps:$4 sm:$0xff]  }
 0x212   :  { %5110 = vmatprep.subr.bf16.mxu0 %v7067_v58  ;;  %v7118_v58 = vld [vmem:[%s10015_s3 + $0x24c] ss:$16 sps:$4 sm:$0xff]  }
 0x213   :  { %5193 = vmatpush1.bf16.msra.mxu1 %v7035_v33  ;;  %v7116_v33 = vld [vmem:[%s10015_s3 + $0x248] ss:$16 sps:$4 sm:$0xff]  }
 0x214   :  { %5194 = vmatprep.subr.bf16.mxu1 %v7040_v46  ;;  %v7130_v46 = vld [vmem:[%s10015_s3 + $0x28c] ss:$16 sps:$4 sm:$0xff]  }
 0x215   :  { %5111 = vmatpush1.bf16.msra.mxu0 %v7065_v42  ;;  %v7128_v42 = vld [vmem:[%s10015_s3 + $0x288] ss:$16 sps:$4 sm:$0xff]  }
 0x216   :  { %5112 = vmatprep.subr.bf16.mxu0 %v7073_v43  ;;  %v505_v43 = vsub.s32 4, %v8666_v63 }
 0x217   :  { %5195 = vmatpush1.bf16.msra.mxu1 %v7038_v44  ;;  %v509_v44 = vsub.s32 5, %v8666_v63 }
 0x218   :  { %5196 = vmatprep.subr.bf16.mxu1 %v7043_v45  ;;  %v7136_v45 = vld [vmem:[%s10015_s3 + $0x2ac] ss:$16 sps:$4 sm:$0xff]  }
 0x219   :  { %5113 = vmatpush1.bf16.msra.mxu0 %v7071_v47  ;;  %v9378_v47 = vld [vmem:[%s10016_s2] sm:$0xff] }
 0x21a   :  { %5114 = vmatprep.subr.bf16.mxu0 %v7079_v16  ;;  %v506_v16 = vrot.slane %v9378_v47, %v505_v43  ;;  %v7245_v43 = vld [vmem:[%s10015_s3 + $0x720] ss:$16 sps:$4 sm:$0xff]  }
 0x21b   :  { %5197 = vmatpush1.bf16.msra.mxu1 %v7041_v48  ;;  %v7134_v48 = vld [vmem:[%s10015_s3 + $0x2a8] ss:$16 sps:$4 sm:$0xff]  }
 0x21c   :  { %5198 = vmatprep.subr.bf16.mxu1 %v7046_v49  ;;  %v510_v49 = vrot.slane %v9378_v47, %v509_v44  ;;  %v7253_v44 = vld [vmem:[%s10015_s3 + $0x744] ss:$16 sps:$4 sm:$0xff]  }
 0x21d   :  { %5115 = vmatpush1.bf16.msra.mxu0 %v7077_v50  ;;  %v7142_v50 = vld [vmem:[%s10015_s3 + $0x2cc] ss:$16 sps:$4 sm:$0xff]  }
 0x21e   :  { %5116 = vmatprep.subr.bf16.mxu0 %v7085_v51 }
 0x21f   :  { %5199 = vmatpush1.bf16.msra.mxu1 %v7044_v52 }
 0x220   :  { %5200 = vmatprep.subr.bf16.mxu1 %v7052_v55 }
 0x221   :  { %5117 = vmatpush1.bf16.msra.mxu0 %v7083_v56  ;;  %v7140_v56 = vld [vmem:[%s10015_s3 + $0x2c8] ss:$16 sps:$4 sm:$0xff]  }
 0x222   :  { %5118 = vmatprep.subr.bf16.mxu0 %v7091_v26 }
 0x223   :  { %5201 = vmatpush1.bf16.msra.mxu1 %v7050_v59 }
 0x224   :  { %5202 = vmatprep.subr.bf16.mxu1 %v7058_v1  ;;  %v7145_v1 = vld [vmem:[%s10015_s3 + $0x2ec] ss:$16 sps:$4 sm:$0xff]  }
 0x225   :  { %5119 = vmatpush1.bf16.msra.mxu0 %v7089_v3 }
 0x226   :  { %5120 = vmatprep.subr.bf16.mxu0 %v7097_v4 }
 0x227   :  { %5203 = vmatpush1.bf16.msra.mxu1 %v7056_v5 }
 0x228   :  { %5204 = vmatprep.subr.bf16.mxu1 %v7064_v6  ;;  %v7143_v6 = vld [vmem:[%s10015_s3 + $0x2e8] ss:$16 sps:$4 sm:$0xff]  }
 0x229   :  { %5121 = vmatpush1.bf16.msra.mxu0 %v7095_v7 }
 0x22a   :  { %5122 = vmatprep.subr.bf16.mxu0 %v7103_v9  ;;  %v7148_v9 = vld [vmem:[%s10015_s3 + $0x30c] ss:$16 sps:$4 sm:$0xff]  }
 0x22b   :  { %5205 = vmatpush1.bf16.msra.mxu1 %v7062_v10  ;;  %v7191_v10 = vld [vmem:[%s10015_s3 + $0x600] ss:$16 sps:$4 sm:$0xff]  }
 0x22c   :  { %5206 = vmatprep.subr.bf16.mxu1 %v7070_v12 }
 0x22d   :  { %5123 = vmatpush1.bf16.msra.mxu0 %v7101_v13  ;;  %v7199_v13 = vld [vmem:[%s10015_s3 + $0x624] ss:$16 sps:$4 sm:$0xff]  }
 0x22e   :  { %5124 = vmatprep.subr.bf16.mxu0 %v7109_v14  ;;  %v7146_v14 = vld [vmem:[%s10015_s3 + $0x308] ss:$16 sps:$4 sm:$0xff]  }
 0x22f   :  { %5207 = vmatpush1.bf16.msra.mxu1 %v7068_v15  ;;  %v7151_v15 = vld [vmem:[%s10015_s3 + $0x32c] ss:$16 sps:$4 sm:$0xff]  }
 0x230   :  { %5208 = vmatprep.subr.bf16.mxu1 %v7076_v17  ;;  %v7197_v17 = vld [vmem:[%s10015_s3 + $0x620] ss:$16 sps:$4 sm:$0xff]  }
 0x231   :  { %5125 = vmatpush1.bf16.msra.mxu0 %v7107_v18  ;;  %v7205_v18 = vld [vmem:[%s10015_s3 + $0x644] ss:$16 sps:$4 sm:$0xff]  }
 0x232   :  { %5126 = vmatprep.subr.bf16.mxu0 %v7115_v20  ;;  %v7149_v20 = vld [vmem:[%s10015_s3 + $0x328] ss:$16 sps:$4 sm:$0xff]  }
 0x233   :  { %5209 = vmatpush1.bf16.msra.mxu1 %v7074_v53  ;;  %v7154_v53 = vld [vmem:[%s10015_s3 + $0x34c] ss:$16 sps:$4 sm:$0xff]  }
 0x234   :  { %5210 = vmatprep.subr.bf16.mxu1 %v7082_v2  ;;  %v7203_v2 = vld [vmem:[%s10015_s3 + $0x640] ss:$16 sps:$4 sm:$0xff]  }
 0x235   :  { %5127 = vmatpush1.bf16.msra.mxu0 %v7113_v22  ;;  %v7211_v22 = vld [vmem:[%s10015_s3 + $0x664] ss:$16 sps:$4 sm:$0xff]  }
 0x236   :  { %5128 = vmatprep.subr.bf16.mxu0 %v7121_v23  ;;  %v7152_v23 = vld [vmem:[%s10015_s3 + $0x348] ss:$16 sps:$4 sm:$0xff]  }
 0x237   :  { %5211 = vmatpush1.bf16.msra.mxu1 %v7080_v24  ;;  %v7157_v24 = vld [vmem:[%s10015_s3 + $0x36c] ss:$16 sps:$4 sm:$0xff]  }
 0x238   :  { %5212 = vmatprep.subr.bf16.mxu1 %v7088_v25  ;;  %v7209_v25 = vld [vmem:[%s10015_s3 + $0x660] ss:$16 sps:$4 sm:$0xff]  }
 0x239   :  { %5129 = vmatpush1.bf16.msra.mxu0 %v7119_v54  ;;  %v7217_v54 = vld [vmem:[%s10015_s3 + $0x684] ss:$16 sps:$4 sm:$0xff]  }
 0x23a   :  { %5130 = vmatprep.subr.bf16.mxu0 %v7127_v28  ;;  %v7155_v28 = vld [vmem:[%s10015_s3 + $0x368] ss:$16 sps:$4 sm:$0xff]  }
 0x23b   :  { %5213 = vmatpush1.bf16.msra.mxu1 %v7086_v29  ;;  %v7160_v29 = vld [vmem:[%s10015_s3 + $0x38c] ss:$16 sps:$4 sm:$0xff]  }
 0x23c   :  { %5214 = vmatprep.subr.bf16.mxu1 %v7094_v30  ;;  %v7215_v30 = vld [vmem:[%s10015_s3 + $0x680] ss:$16 sps:$4 sm:$0xff]  }
 0x23d   :  { %5131 = vmatpush1.bf16.msra.mxu0 %v7125_v31  ;;  %v7223_v31 = vld [vmem:[%s10015_s3 + $0x6a4] ss:$16 sps:$4 sm:$0xff]  }
 0x23e   :  { %5132 = vmatprep.subr.bf16.mxu0 %v7133_v39  ;;  %v7158_v39 = vld [vmem:[%s10015_s3 + $0x388] ss:$16 sps:$4 sm:$0xff]  }
 0x23f   :  { %5215 = vmatpush1.bf16.msra.mxu1 %v7092_v32  ;;  %v7163_v32 = vld [vmem:[%s10015_s3 + $0x3ac] ss:$16 sps:$4 sm:$0xff]  }
 0x240   :  { %5216 = vmatprep.subr.bf16.mxu1 %v7100_v34  ;;  %v7221_v34 = vld [vmem:[%s10015_s3 + $0x6a0] ss:$16 sps:$4 sm:$0xff]  }
 0x241   :  { %5133 = vmatpush1.bf16.msra.mxu0 %v7131_v37  ;;  %v7229_v37 = vld [vmem:[%s10015_s3 + $0x6c4] ss:$16 sps:$4 sm:$0xff]  }
 0x242   :  { %5134 = vmatprep.subr.bf16.mxu0 %v7139_v38  ;;  %v7161_v38 = vld [vmem:[%s10015_s3 + $0x3a8] ss:$16 sps:$4 sm:$0xff]  }
 0x243   :  { %5217 = vmatpush1.bf16.msra.mxu1 %v7098_v57  ;;  %v7166_v57 = vld [vmem:[%s10015_s3 + $0x3cc] ss:$16 sps:$4 sm:$0xff]  }
 0x244   :  { %5227 = vmatprep.subr.bf16.mxu1 %v7106_v19  ;;  %v7227_v19 = vld [vmem:[%s10015_s3 + $0x6c0] ss:$16 sps:$4 sm:$0xff]  }
 0x245   :  { %5135 = vmatpush1.bf16.msra.mxu0 %v7137_v61  ;;  %v7235_v61 = vld [vmem:[%s10015_s3 + $0x6e4] ss:$16 sps:$4 sm:$0xff]  }
 0x246   :  { %5219 = vmatmul.mubr.bf16.vlgmr.msra.gmra.mrb[12].mxu1 %v8948_v41  ;;  %5145 = vmatprep.subr.bf16.mxu0 %v7193_v40  ;;  %v7124_v41 = vld [vmem:[%s10015_s3 + $0x26c] ss:$16 sps:$4 sm:$0xff]   ;;  %v7164_v40 = vld [vmem:[%s10015_s3 + $0x3c8] ss:$16 sps:$4 sm:$0xff]  }
 0x247   :  { %5228 = vmatpush1.bf16.msra.mxu1 %v7104_v60  ;;  %5259 = vmatprep.mubr.bf16.mxu1 %v9132_v27  ;;  %v7122_v27 = vld [vmem:[%s10015_s3 + $0x268] ss:$16 sps:$4 sm:$0xff]   ;;  %v7169_v60 = vld [vmem:[%s10015_s3 + $0x3ec] ss:$16 sps:$4 sm:$0xff]  }
 0x248   :  { %5229 = vmatprep.subr.bf16.mxu1 %v7112_v62  ;;  %v7233_v62 = vld [vmem:[%s10015_s3 + $0x6e0] ss:$16 sps:$4 sm:$0xff]  }
 0x24b   :  { %5230 = vmatpush1.bf16.msra.mxu1 %v7110_v35  ;;  %v7241_v35 = vld [vmem:[%s10015_s3 + $0x704] ss:$16 sps:$4 sm:$0xff]  }
 0x24c   :  { %5231 = vmatprep.subr.bf16.mxu1 %v7118_v58  ;;  %v7167_v58 = vld [vmem:[%s10015_s3 + $0x3e8] ss:$16 sps:$4 sm:$0xff]  }
 0x24f   :  { %5232 = vmatpush1.bf16.msra.mxu1 %v7116_v33  ;;  %v7172_v33 = vld [vmem:[%s10015_s3 + $0x40c] ss:$16 sps:$4 sm:$0xff]  }
 0x250   :  { %5233 = vmatprep.subr.bf16.mxu1 %v7124_v41  ;;  %v7239_v41 = vld [vmem:[%s10015_s3 + $0x700] ss:$16 sps:$4 sm:$0xff]  }
 0x253   :  { %5234 = vmatpush1.bf16.msra.mxu1 %v7122_v27  ;;  %v7247_v27 = vld [vmem:[%s10015_s3 + $0x724] ss:$16 sps:$4 sm:$0xff]  }
 0x254   :  { %5235 = vmatprep.subr.bf16.mxu1 %v7130_v46  ;;  %v7170_v46 = vld [vmem:[%s10015_s3 + $0x408] ss:$16 sps:$4 sm:$0xff]  }
 0x257   :  { %5236 = vmatpush1.bf16.msra.mxu1 %v7128_v42  ;;  %v7175_v42 = vld [vmem:[%s10015_s3 + $0x42c] ss:$16 sps:$4 sm:$0xff]  }
 0x258   :  { %5237 = vmatprep.subr.bf16.mxu1 %v7136_v45  ;;  %v7173_v45 = vld [vmem:[%s10015_s3 + $0x428] ss:$16 sps:$4 sm:$0xff]  }
 0x25b   :  { %v3277_v51 = vpop.f32.mrb[4].mxu0  ;;  %5238 = vmatpush1.bf16.msra.mxu1 %v7134_v48  ;;  %v7251_v48 = vld [vmem:[%s10015_s3 + $0x740] ss:$16 sps:$4 sm:$0xff]  }
 0x25c   :  { %v6840_v52 = vadd.f32 %v3277_v51, %v506_v16  ;;  %v3279_v55 = vpop.f32.mrb[5].mxu0  ;;  %5239 = vmatprep.subr.bf16.mxu1 %v7142_v50  ;;  %v7178_v16 = vld [vmem:[%s10015_s3 + $0x44c] ss:$16 sps:$4 sm:$0xff]   ;;  %v7257_v51 = vld [vmem:[%s10015_s3 + $0x760] ss:$16 sps:$4 sm:$0xff]  }
 0x25d   :  { %v6841_v26 = vadd.f32 %v3279_v55, %v510_v49  ;;  %v3281_v59 = vpop.f32.mrb[6].mxu0  ;;  %v7176_v49 = vld [vmem:[%s10015_s3 + $0x448] ss:$16 sps:$4 sm:$0xff]   ;;  %v7181_v50 = vld [vmem:[%s10015_s3 + $0x46c] ss:$16 sps:$4 sm:$0xff]  }
 0x25e   :  { %v3452_v3 = vmax.f32 %v6840_v52, 0.0  ;;  %v3282_v4 = vpop.f32.mrb[7].mxu0  ;;  %v7265_v52 = vld [vmem:[%s10015_s3 + $0x784] ss:$16 sps:$4 sm:$0xff]   ;;  %v7179_v55 = vld [vmem:[%s10015_s3 + $0x468] ss:$16 sps:$4 sm:$0xff]  }
 0x25f   :  { %v3453_v5 = vmax.f32 %v6841_v26, 0.0  ;;  %5240 = vmatpush1.bf16.msra.mxu1 %v7140_v56  ;;  %v7184_v56 = vld [vmem:[%s10015_s3 + $0x48c] ss:$16 sps:$4 sm:$0xff]   ;;  %v7263_v26 = vld [vmem:[%s10015_s3 + $0x780] ss:$16 sps:$4 sm:$0xff]  }
 0x260   :  { %5241 = vmatprep.subr.bf16.mxu1 %v7145_v1  ;;  %v9405_v12 = vpack.c.bf16 %v3452_v3, %v3452_v3  ;;  %v7271_v59 = vld [vmem:[%s10015_s3 + $0x7a4] ss:$16 sps:$4 sm:$0xff]   ;;  %v7182_v1 = vld [vmem:[%s10015_s3 + $0x488] ss:$16 sps:$4 sm:$0xff]   ;;  %v7187_v3 = vld [vmem:[%s10015_s3 + $0x4ac] ss:$16 sps:$4 sm:$0xff]  }
 0x261   :  { %v9397_v7 = vpack.c.bf16 %v3453_v5, %v3453_v5  ;;  %v7269_v4 = vld [vmem:[%s10015_s3 + $0x7a0] ss:$16 sps:$4 sm:$0xff]   ;;  %v7277_v5 = vld [vmem:[%s10015_s3 + $0x7c4] ss:$16 sps:$4 sm:$0xff]  }
 0x263   :  { %5136 = vmatprep.mubr.bf16.mxu0 %v9397_v7  ;;  %5242 = vmatpush1.bf16.msra.mxu1 %v7143_v6  ;;  %v7185_v6 = vld [vmem:[%s10015_s3 + $0x4a8] ss:$16 sps:$4 sm:$0xff]  }
 0x264   :  { %5137 = vmatmul.mubr.bf16.vlgmr.msra.gmra.mrb[8].mxu0 %v9405_v12  ;;  %5243 = vmatprep.subr.bf16.mxu1 %v7148_v9  ;;  %v7275_v9 = vld [vmem:[%s10015_s3 + $0x7c0] ss:$16 sps:$4 sm:$0xff]  }
 0x265   :  { %5146 = vmatpush1.bf16.msra.mxu0 %v7191_v10  ;;  %v7188_v10 = vld [vmem:[%s10015_s3 + $0x4c8] ss:$16 sps:$4 sm:$0xff]  }
 0x266   :  { %5147 = vmatprep.subr.bf16.mxu0 %v7199_v13  ;;  %v7283_v13 = vld [vmem:[%s10015_s3 + $0x7e4] ss:$16 sps:$4 sm:$0xff]  }
 0x267   :  { %5244 = vmatpush1.bf16.msra.mxu1 %v7146_v14  ;;  %v7196_v14 = vld [vmem:[%s10015_s3 + $0x4ec] ss:$16 sps:$4 sm:$0xff]  }
 0x268   :  { %5245 = vmatprep.subr.bf16.mxu1 %v7151_v15  ;;  %v7281_v15 = vld [vmem:[%s10015_s3 + $0x7e0] ss:$16 sps:$4 sm:$0xff]  }
 0x269   :  { %5148 = vmatpush1.bf16.msra.mxu0 %v7197_v17  ;;  %v7316_v17 = vld [vmem:[%s10017_s5 + $0x4] ss:$8 sps:$4 sm:$0xff]  }
 0x26a   :  { %5149 = vmatprep.subr.bf16.mxu0 %v7205_v18  ;;  %v7194_v18 = vld [vmem:[%s10015_s3 + $0x4e8] ss:$16 sps:$4 sm:$0xff]  }
 0x26b   :  { %5246 = vmatpush1.bf16.msra.mxu1 %v7149_v20  ;;  %v7202_v20 = vld [vmem:[%s10015_s3 + $0x50c] ss:$16 sps:$4 sm:$0xff]  }
 0x26c   :  { %5247 = vmatprep.subr.bf16.mxu1 %v7154_v53  ;;  %v7200_v53 = vld [vmem:[%s10015_s3 + $0x508] ss:$16 sps:$4 sm:$0xff]  }
 0x26d   :  { %5150 = vmatpush1.bf16.msra.mxu0 %v7203_v2  ;;  %v7208_v2 = vld [vmem:[%s10015_s3 + $0x52c] ss:$16 sps:$4 sm:$0xff]  }
 0x26e   :  { %5151 = vmatprep.subr.bf16.mxu0 %v7211_v22  ;;  %v7206_v22 = vld [vmem:[%s10015_s3 + $0x528] ss:$16 sps:$4 sm:$0xff]  }
 0x26f   :  { %5248 = vmatpush1.bf16.msra.mxu1 %v7152_v23  ;;  %v7214_v23 = vld [vmem:[%s10015_s3 + $0x54c] ss:$16 sps:$4 sm:$0xff]  }
 0x270   :  { %5249 = vmatprep.subr.bf16.mxu1 %v7157_v24  ;;  %v7212_v24 = vld [vmem:[%s10015_s3 + $0x548] ss:$16 sps:$4 sm:$0xff]  }
 0x271   :  { %5152 = vmatpush1.bf16.msra.mxu0 %v7209_v25  ;;  %v7220_v25 = vld [vmem:[%s10015_s3 + $0x56c] ss:$16 sps:$4 sm:$0xff]  }
 0x272   :  { %5153 = vmatprep.subr.bf16.mxu0 %v7217_v54  ;;  %v7218_v54 = vld [vmem:[%s10015_s3 + $0x568] ss:$16 sps:$4 sm:$0xff]  }
 0x273   :  { %5250 = vmatpush1.bf16.msra.mxu1 %v7155_v28  ;;  %v7226_v28 = vld [vmem:[%s10015_s3 + $0x58c] ss:$16 sps:$4 sm:$0xff]  }
 0x274   :  { %5251 = vmatprep.subr.bf16.mxu1 %v7160_v29  ;;  %v7224_v29 = vld [vmem:[%s10015_s3 + $0x588] ss:$16 sps:$4 sm:$0xff]  }
 0x275   :  { %5154 = vmatpush1.bf16.msra.mxu0 %v7215_v30  ;;  %v7232_v30 = vld [vmem:[%s10015_s3 + $0x5ac] ss:$16 sps:$4 sm:$0xff]  }
 0x276   :  { %5155 = vmatprep.subr.bf16.mxu0 %v7223_v31  ;;  %v7230_v31 = vld [vmem:[%s10015_s3 + $0x5a8] ss:$16 sps:$4 sm:$0xff]  }
 0x277   :  { %5252 = vmatpush1.bf16.msra.mxu1 %v7158_v39  ;;  %v7238_v39 = vld [vmem:[%s10015_s3 + $0x5cc] ss:$16 sps:$4 sm:$0xff]  }
 0x278   :  { %5253 = vmatprep.subr.bf16.mxu1 %v7163_v32  ;;  %v7236_v32 = vld [vmem:[%s10015_s3 + $0x5c8] ss:$16 sps:$4 sm:$0xff]  }
 0x279   :  { %5156 = vmatpush1.bf16.msra.mxu0 %v7221_v34  ;;  %v7244_v34 = vld [vmem:[%s10015_s3 + $0x5ec] ss:$16 sps:$4 sm:$0xff]  }
 0x27a   :  { %5157 = vmatprep.subr.bf16.mxu0 %v7229_v37  ;;  %v7242_v37 = vld [vmem:[%s10015_s3 + $0x5e8] ss:$16 sps:$4 sm:$0xff]  }
 0x27b   :  { %5254 = vmatpush1.bf16.msra.mxu1 %v7161_v38  ;;  %v7250_v38 = vld [vmem:[%s10015_s3 + $0x60c] ss:$16 sps:$4 sm:$0xff]  }
 0x27c   :  { %5255 = vmatprep.subr.bf16.mxu1 %v7166_v57  ;;  %v7248_v57 = vld [vmem:[%s10015_s3 + $0x608] ss:$16 sps:$4 sm:$0xff]  }
 0x27d   :  { %5158 = vmatpush1.bf16.msra.mxu0 %v7227_v19  ;;  %v7256_v19 = vld [vmem:[%s10015_s3 + $0x62c] ss:$16 sps:$4 sm:$0xff]  }
 0x27e   :  { %5159 = vmatprep.subr.bf16.mxu0 %v7235_v61  ;;  %v7254_v61 = vld [vmem:[%s10015_s3 + $0x628] ss:$16 sps:$4 sm:$0xff]  }
 0x27f   :  { %5256 = vmatpush1.bf16.msra.mxu1 %v7164_v40  ;;  %v7262_v40 = vld [vmem:[%s10015_s3 + $0x64c] ss:$16 sps:$4 sm:$0xff]  }
 0x280   :  { %5257 = vmatprep.subr.bf16.mxu1 %v7169_v60  ;;  %v7260_v60 = vld [vmem:[%s10015_s3 + $0x648] ss:$16 sps:$4 sm:$0xff]  }
 0x281   :  { %5160 = vmatpush1.bf16.msra.mxu0 %v7233_v62  ;;  %v7266_v62 = vld [vmem:[%s10015_s3 + $0x668] ss:$16 sps:$4 sm:$0xff]  }
 0x282   :  { %5161 = vmatprep.subr.bf16.mxu0 %v7241_v35  ;;  %v7274_v35 = vld [vmem:[%s10015_s3 + $0x68c] ss:$16 sps:$4 sm:$0xff]  }
 0x283   :  { %5258 = vmatpush1.bf16.msra.mxu1 %v7167_v58  ;;  %v513_v58 = vsub.s32 6, %v8666_v63 }
 0x284   :  { %5268 = vmatprep.subr.bf16.mxu1 %v7172_v33  ;;  %v7272_v33 = vld [vmem:[%s10015_s3 + $0x688] ss:$16 sps:$4 sm:$0xff]  }
 0x285   :  { %5162 = vmatpush1.bf16.msra.mxu0 %v7239_v41  ;;  %v517_v41 = vsub.s32 7, %v8666_v63  ;;  %v7407_v63 = vld [vmem:[%s10017_s5 + $0x1f0] ss:$8 sps:$4 sm:$0xff]  }
 0x286   :  { %5163 = vmatprep.subr.bf16.mxu0 %v7247_v27  ;;  %5260 = vmatmul.mubr.bf16.vlgmr.msra.gmra.mrb[12].mxu1 %v9150_v36  ;;  %v7259_v36 = vld [vmem:[%s10015_s3 + $0x764] ss:$16 sps:$4 sm:$0xff]   ;;  %v7280_v27 = vld [vmem:[%s10015_s3 + $0x6ac] ss:$16 sps:$4 sm:$0xff]  }
 0x287   :  { %5269 = vmatpush1.bf16.msra.mxu1 %v7170_v46  ;;  %5300 = vmatprep.mubr.bf16.mxu1 %v9397_v7  ;;  %v7190_v7 = vld [vmem:[%s10015_s3 + $0x4cc] ss:$16 sps:$4 sm:$0xff]   ;;  %v514_v46 = vrot.slane %v9378_v47, %v513_v58  ;;  %v7347_v58 = vld [vmem:[%s10017_s5 + $0xb0] ss:$8 sps:$4 sm:$0xff]  }
 0x288   :  { %5270 = vmatprep.subr.bf16.mxu1 %v7175_v42  ;;  %v518_v42 = vrot.slane %v9378_v47, %v517_v41  ;;  %v7350_v41 = vld [vmem:[%s10017_s5 + $0xc0] ss:$8 sps:$4 sm:$0xff]  }
 0x289   :  { %5164 = vmatpush1.bf16.msra.mxu0 %v7245_v43  ;;  %v7278_v43 = vld [vmem:[%s10015_s3 + $0x6a8] ss:$16 sps:$4 sm:$0xff]  }
 0x28a   :  { %5165 = vmatprep.subr.bf16.mxu0 %v7253_v44  ;;  %v7286_v44 = vld [vmem:[%s10015_s3 + $0x6cc] ss:$16 sps:$4 sm:$0xff]  }
 0x28b   :  { %5271 = vmatpush1.bf16.msra.mxu1 %v7173_v45 }
 0x28c   :  { %5272 = vmatprep.subr.bf16.mxu1 %v7178_v16 }
 0x28d   :  { %5166 = vmatpush1.bf16.msra.mxu0 %v7251_v48 }
 0x28e   :  { %5167 = vmatprep.subr.bf16.mxu0 %v7259_v36 }
 0x28f   :  { %5273 = vmatpush1.bf16.msra.mxu1 %v7176_v49 }
 0x290   :  { %5274 = vmatprep.subr.bf16.mxu1 %v7181_v50  ;;  %v7284_v50 = vld [vmem:[%s10015_s3 + $0x6c8] ss:$16 sps:$4 sm:$0xff]  }
 0x291   :  { %5168 = vmatpush1.bf16.msra.mxu0 %v7257_v51 }
 0x292   :  { %5169 = vmatprep.subr.bf16.mxu0 %v7265_v52  ;;  %v7289_v52 = vld [vmem:[%s10015_s3 + $0x6ec] ss:$16 sps:$4 sm:$0xff]  }
 0x293   :  { %5275 = vmatpush1.bf16.msra.mxu1 %v7179_v55 }
 0x294   :  { %5276 = vmatprep.subr.bf16.mxu1 %v7184_v56 }
 0x295   :  { %5170 = vmatpush1.bf16.msra.mxu0 %v7263_v26  ;;  %v7287_v26 = vld [vmem:[%s10015_s3 + $0x6e8] ss:$16 sps:$4 sm:$0xff]  }
 0x296   :  { %5171 = vmatprep.subr.bf16.mxu0 %v7271_v59  ;;  %v7314_v59 = vld [vmem:[%s10017_s5] ss:$8 sps:$4 sm:$0xff]  }
 0x297   :  { %5277 = vmatpush1.bf16.msra.mxu1 %v7182_v1 }
 0x298   :  { %5278 = vmatprep.subr.bf16.mxu1 %v7187_v3  ;;  %v7292_v3 = vld [vmem:[%s10015_s3 + $0x70c] ss:$16 sps:$4 sm:$0xff]  }
 0x299   :  { %5172 = vmatpush1.bf16.msra.mxu0 %v7269_v4  ;;  %v7319_v4 = vld [vmem:[%s10017_s5 + $0x14] ss:$8 sps:$4 sm:$0xff]  }
 0x29a   :  { %5173 = vmatprep.subr.bf16.mxu0 %v7277_v5  ;;  %v7290_v5 = vld [vmem:[%s10015_s3 + $0x708] ss:$16 sps:$4 sm:$0xff]  }
 0x29b   :  { %5279 = vmatpush1.bf16.msra.mxu1 %v7185_v6  ;;  %v7317_v6 = vld [vmem:[%s10017_s5 + $0x10] ss:$8 sps:$4 sm:$0xff]  }
 0x29c   :  { %5280 = vmatprep.subr.bf16.mxu1 %v7190_v7  ;;  %v7295_v7 = vld [vmem:[%s10015_s3 + $0x72c] ss:$16 sps:$4 sm:$0xff]  }
 0x29d   :  { %5174 = vmatpush1.bf16.msra.mxu0 %v7275_v9  ;;  %v7322_v9 = vld [vmem:[%s10017_s5 + $0x24] ss:$8 sps:$4 sm:$0xff]  }
 0x29e   :  { %5175 = vmatprep.subr.bf16.mxu0 %v7283_v13  ;;  %v7320_v13 = vld [vmem:[%s10017_s5 + $0x20] ss:$8 sps:$4 sm:$0xff]  }
 0x29f   :  { %5281 = vmatpush1.bf16.msra.mxu1 %v7188_v10  ;;  %v7293_v10 = vld [vmem:[%s10015_s3 + $0x728] ss:$16 sps:$4 sm:$0xff]  }
 0x2a0   :  { %5282 = vmatprep.subr.bf16.mxu1 %v7196_v14  ;;  %v7298_v14 = vld [vmem:[%s10015_s3 + $0x74c] ss:$16 sps:$4 sm:$0xff]  }
 0x2a1   :  { %5176 = vmatpush1.bf16.msra.mxu0 %v7281_v15  ;;  %v7325_v15 = vld [vmem:[%s10017_s5 + $0x34] ss:$8 sps:$4 sm:$0xff]  }
 0x2a2   :  { %5754 = vmatprep.subr.bf16.mxu0 %v7316_v17  ;;  %v7296_v17 = vld [vmem:[%s10015_s3 + $0x748] ss:$16 sps:$4 sm:$0xff]  }
 0x2a3   :  { %5283 = vmatpush1.bf16.msra.mxu1 %v7194_v18  ;;  %v7323_v18 = vld [vmem:[%s10017_s5 + $0x30] ss:$8 sps:$4 sm:$0xff]  }
 0x2a4   :  { %5284 = vmatprep.subr.bf16.mxu1 %v7202_v20  ;;  %v7301_v20 = vld [vmem:[%s10015_s3 + $0x76c] ss:$16 sps:$4 sm:$0xff]  }
 0x2a7   :  { %5285 = vmatpush1.bf16.msra.mxu1 %v7200_v53  ;;  %v7328_v53 = vld [vmem:[%s10017_s5 + $0x44] ss:$8 sps:$4 sm:$0xff]  }
 0x2a8   :  { %5286 = vmatprep.subr.bf16.mxu1 %v7208_v2  ;;  %v7299_v2 = vld [vmem:[%s10015_s3 + $0x768] ss:$16 sps:$4 sm:$0xff]  }
 0x2ab   :  { %5287 = vmatpush1.bf16.msra.mxu1 %v7206_v22  ;;  %v7326_v22 = vld [vmem:[%s10017_s5 + $0x40] ss:$8 sps:$4 sm:$0xff]  }
 0x2ac   :  { %5288 = vmatprep.subr.bf16.mxu1 %v7214_v23  ;;  %v7304_v23 = vld [vmem:[%s10015_s3 + $0x78c] ss:$16 sps:$4 sm:$0xff]  }
 0x2af   :  { %5289 = vmatpush1.bf16.msra.mxu1 %v7212_v24  ;;  %v7331_v24 = vld [vmem:[%s10017_s5 + $0x54] ss:$8 sps:$4 sm:$0xff]  }
 0x2b0   :  { %5290 = vmatprep.subr.bf16.mxu1 %v7220_v25  ;;  %v7302_v25 = vld [vmem:[%s10015_s3 + $0x788] ss:$16 sps:$4 sm:$0xff]  }
 0x2b3   :  { %5291 = vmatpush1.bf16.msra.mxu1 %v7218_v54  ;;  %v7329_v54 = vld [vmem:[%s10017_s5 + $0x50] ss:$8 sps:$4 sm:$0xff]  }
 0x2b4   :  { %5292 = vmatprep.subr.bf16.mxu1 %v7226_v28  ;;  %v7307_v28 = vld [vmem:[%s10015_s3 + $0x7ac] ss:$16 sps:$4 sm:$0xff]  }
 0x2b7   :  { %5293 = vmatpush1.bf16.msra.mxu1 %v7224_v29  ;;  %v7334_v29 = vld [vmem:[%s10017_s5 + $0x64] ss:$8 sps:$4 sm:$0xff]  }
 0x2b8   :  { %5294 = vmatprep.subr.bf16.mxu1 %v7232_v30  ;;  %v7305_v30 = vld [vmem:[%s10015_s3 + $0x7a8] ss:$16 sps:$4 sm:$0xff]  }
 0x2bb   :  { %5295 = vmatpush1.bf16.msra.mxu1 %v7230_v31  ;;  %v7332_v31 = vld [vmem:[%s10017_s5 + $0x60] ss:$8 sps:$4 sm:$0xff]  }
 0x2bc   :  { %5296 = vmatprep.subr.bf16.mxu1 %v7238_v39  ;;  %v7310_v39 = vld [vmem:[%s10015_s3 + $0x7cc] ss:$16 sps:$4 sm:$0xff]  }
 0x2bf   :  { %5297 = vmatpush1.bf16.msra.mxu1 %v7236_v32  ;;  %v7337_v32 = vld [vmem:[%s10017_s5 + $0x74] ss:$8 sps:$4 sm:$0xff]  }
 0x2c0   :  { %5298 = vmatprep.subr.bf16.mxu1 %v7244_v34  ;;  %v7308_v34 = vld [vmem:[%s10015_s3 + $0x7c8] ss:$16 sps:$4 sm:$0xff]  }
 0x2c3   :  { %5299 = vmatpush1.bf16.msra.mxu1 %v7242_v37  ;;  %v7335_v37 = vld [vmem:[%s10017_s5 + $0x70] ss:$8 sps:$4 sm:$0xff]  }
 0x2c4   :  { %5309 = vmatprep.subr.bf16.mxu1 %v7250_v38  ;;  %v7313_v38 = vld [vmem:[%s10015_s3 + $0x7ec] ss:$16 sps:$4 sm:$0xff]  }
 0x2c6   :  { %5301 = vmatmul.mubr.bf16.vlgmr.msra.gmra.mrb[12].mxu1 %v9405_v12  ;;  %v7268_v12 = vld [vmem:[%s10015_s3 + $0x66c] ss:$16 sps:$4 sm:$0xff]  }
 0x2c7   :  { %5310 = vmatpush1.bf16.msra.mxu1 %v7248_v57  ;;  %v7340_v57 = vld [vmem:[%s10017_s5 + $0x84] ss:$8 sps:$4 sm:$0xff]  }
 0x2c8   :  { %5311 = vmatprep.subr.bf16.mxu1 %v7256_v19  ;;  %v7311_v19 = vld [vmem:[%s10015_s3 + $0x7e8] ss:$16 sps:$4 sm:$0xff]  }
 0x2cb   :  { %5312 = vmatpush1.bf16.msra.mxu1 %v7254_v61  ;;  %v7338_v61 = vld [vmem:[%s10017_s5 + $0x80] ss:$8 sps:$4 sm:$0xff]  }
 0x2cc   :  { %5313 = vmatprep.subr.bf16.mxu1 %v7262_v40  ;;  %v7343_v40 = vld [vmem:[%s10017_s5 + $0x94] ss:$8 sps:$4 sm:$0xff]  }
 0x2cf   :  { %5314 = vmatpush1.bf16.msra.mxu1 %v7260_v60  ;;  %v7341_v60 = vld [vmem:[%s10017_s5 + $0x90] ss:$8 sps:$4 sm:$0xff]  }
 0x2d0   :  { %5315 = vmatprep.subr.bf16.mxu1 %v7268_v12  ;;  %v7346_v12 = vld [vmem:[%s10017_s5 + $0xa4] ss:$8 sps:$4 sm:$0xff]  }
 0x2d3   :  { %5316 = vmatpush1.bf16.msra.mxu1 %v7266_v62  ;;  %v7344_v62 = vld [vmem:[%s10017_s5 + $0xa0] ss:$8 sps:$4 sm:$0xff]  }
 0x2d4   :  { %5317 = vmatprep.subr.bf16.mxu1 %v7274_v35  ;;  %v7349_v35 = vld [vmem:[%s10017_s5 + $0xb4] ss:$8 sps:$4 sm:$0xff]  }
 0x2d7   :  { %5318 = vmatpush1.bf16.msra.mxu1 %v7272_v33  ;;  %v7352_v33 = vld [vmem:[%s10017_s5 + $0xc4] ss:$8 sps:$4 sm:$0xff]  }
 0x2d8   :  { %5319 = vmatprep.subr.bf16.mxu1 %v7280_v27  ;;  %v7355_v27 = vld [vmem:[%s10017_s5 + $0xd4] ss:$8 sps:$4 sm:$0xff]  }
 0x2d9   :  { %v3441_v45 = vpop.f32.mrb[8].mxu1 }
 0x2da   :  { %v6842_v16 = vadd.f32 %v3441_v45, %v514_v46  ;;  %v3443_v48 = vpop.f32.mrb[9].mxu1  ;;  %v7353_v46 = vld [vmem:[%s10017_s5 + $0xd0] ss:$8 sps:$4 sm:$0xff]  }
 0x2db   :  { %v6843_v36 = vadd.f32 %v3443_v48, %v518_v42  ;;  %v3445_v49 = vpop.f32.mrb[10].mxu1  ;;  %5320 = vmatpush1.bf16.msra.mxu1 %v7278_v43  ;;  %v7358_v42 = vld [vmem:[%s10017_s5 + $0xe4] ss:$8 sps:$4 sm:$0xff]   ;;  %v7356_v43 = vld [vmem:[%s10017_s5 + $0xe0] ss:$8 sps:$4 sm:$0xff]  }
 0x2dc   :  { %v3454_v47 = vmax.f32 %v6842_v16, 0.0  ;;  %v3446_v51 = vpop.f32.mrb[11].mxu1  ;;  %5321 = vmatprep.subr.bf16.mxu1 %v7286_v44  ;;  %v7361_v44 = vld [vmem:[%s10017_s5 + $0xf4] ss:$8 sps:$4 sm:$0xff]   ;;  %v7359_v45 = vld [vmem:[%s10017_s5 + $0xf0] ss:$8 sps:$4 sm:$0xff]  }
 0x2dd   :  { %v3455_v55 = vmax.f32 %v6843_v36, 0.0  ;;  %v7364_v16 = vld [vmem:[%s10017_s5 + $0x104] ss:$8 sps:$4 sm:$0xff]   ;;  %v7415_v51 = vld [vmem:[%s10018_s7 + $0x10] sm:$0xff]  }
 0x2de   :  { %v9701_v1 = vpack.c.bf16 %v3454_v47, %v3454_v47  ;;  %v7410_v48 = vld [vmem:[%s10018_s7 + $0x40] sm:$0xff]   ;;  %v7412_v49 = vld [vmem:[%s10018_s7 + $0x48] sm:$0xff]   ;;  %v7414_v47 = vld [vmem:[%s10018_s7 + $0x50] sm:$0xff]  }
 0x2df   :  { %v3463_v56 = vpack.c.bf16 %v3455_v55, %v3455_v55  ;;  %5322 = vmatpush1.bf16.msra.mxu1 %v7284_v50  ;;  %v7411_v36 = vld [vmem:[%s10018_s7] sm:$0xff]   ;;  %v7413_v50 = vld [vmem:[%s10018_s7 + $0x8] sm:$0xff]   ;;  %v7417_v55 = vld [vmem:[%s10018_s7 + $0x18] sm:$0xff]  }
 0x2e0   :  { %5323 = vmatprep.subr.bf16.mxu1 %v7289_v52  ;;  %v7416_v52 = vld [vmem:[%s10018_s7 + $0x58] sm:$0xff]  }
 0x2e1   :  { %5177 = vmatprep.mubr.bf16.mxu0 %v3463_v56  ;;  %5341 = vmatprep.mubr.bf16.mxu1 %v3463_v56  ;;  %v7418_v56 = vld [vmem:[%s10018_s7 + $0x60] sm:$0xff]  }
 0x2e2   :  { %5178 = vmatmul.mubr.bf16.vlgmr.msra.gmra.mrb[8].mxu0 %v9701_v1 }
 0x2e3   :  { %5324 = vmatpush1.bf16.msra.mxu1 %v7287_v26  ;;  %5755 = vmatpush1.bf16.msra.mxu0 %v7314_v59  ;;  %v7419_v26 = vld [vmem:[%s10018_s7 + $0x20] sm:$0xff]   ;;  %v7420_v59 = vld [vmem:[%s10018_s7 + $0x68] sm:$0xff]  }
 0x2e4   :  { %5325 = vmatprep.subr.bf16.mxu1 %v7292_v3  ;;  %5756 = vmatprep.subr.bf16.mxu0 %v7319_v4  ;;  %v9885_v3 = vld [vmem:[%s10019_s4] sm:$0xf] }
 0x2e5   :  { %v3725_v4 = vrot.slane %v9885_v3, %v8686_v8 }
 0x2e7   :  { %5326 = vmatpush1.bf16.msra.mxu1 %v7290_v5  ;;  %5757 = vmatpush1.bf16.msra.mxu0 %v7317_v6  ;;  %v3729_v5 = vrot.slane %v9885_v3, %v8692_v11 }
 0x2e8   :  { %5327 = vmatprep.subr.bf16.mxu1 %v7295_v7  ;;  %5758 = vmatprep.subr.bf16.mxu0 %v7322_v9 }
 0x2eb   :  { %5328 = vmatpush1.bf16.msra.mxu1 %v7293_v10  ;;  %5759 = vmatpush1.bf16.msra.mxu0 %v7320_v13 }
 0x2ec   :  { %5329 = vmatprep.subr.bf16.mxu1 %v7298_v14  ;;  %5760 = vmatprep.subr.bf16.mxu0 %v7325_v15 }
 0x2ef   :  { %5330 = vmatpush1.bf16.msra.mxu1 %v7296_v17  ;;  %5761 = vmatpush1.bf16.msra.mxu0 %v7323_v18 }
 0x2f0   :  { %5331 = vmatprep.subr.bf16.mxu1 %v7301_v20  ;;  %5762 = vmatprep.subr.bf16.mxu0 %v7328_v53  ;;  %v7362_v20 = vld [vmem:[%s10017_s5 + $0x100] ss:$8 sps:$4 sm:$0xff]  }
 0x2f3   :  { %5332 = vmatpush1.bf16.msra.mxu1 %v7299_v2  ;;  %5763 = vmatpush1.bf16.msra.mxu0 %v7326_v22  ;;  %v7367_v2 = vld [vmem:[%s10017_s5 + $0x114] ss:$8 sps:$4 sm:$0xff]   ;;  %v7365_v22 = vld [vmem:[%s10017_s5 + $0x110] ss:$8 sps:$4 sm:$0xff]  }
 0x2f4   :  { %5333 = vmatprep.subr.bf16.mxu1 %v7304_v23  ;;  %5764 = vmatprep.subr.bf16.mxu0 %v7331_v24  ;;  %v7370_v23 = vld [vmem:[%s10017_s5 + $0x124] ss:$8 sps:$4 sm:$0xff]   ;;  %v7368_v24 = vld [vmem:[%s10017_s5 + $0x120] ss:$8 sps:$4 sm:$0xff]  }
 0x2f7   :  { %5334 = vmatpush1.bf16.msra.mxu1 %v7302_v25  ;;  %5765 = vmatpush1.bf16.msra.mxu0 %v7329_v54  ;;  %v7373_v25 = vld [vmem:[%s10017_s5 + $0x134] ss:$8 sps:$4 sm:$0xff]   ;;  %v7371_v54 = vld [vmem:[%s10017_s5 + $0x130] ss:$8 sps:$4 sm:$0xff]  }
 0x2f8   :  { %5335 = vmatprep.subr.bf16.mxu1 %v7307_v28  ;;  %5766 = vmatprep.subr.bf16.mxu0 %v7334_v29  ;;  %v7376_v28 = vld [vmem:[%s10017_s5 + $0x144] ss:$8 sps:$4 sm:$0xff]   ;;  %v7374_v29 = vld [vmem:[%s10017_s5 + $0x140] ss:$8 sps:$4 sm:$0xff]  }
 0x2fb   :  { %5336 = vmatpush1.bf16.msra.mxu1 %v7305_v30  ;;  %5767 = vmatpush1.bf16.msra.mxu0 %v7332_v31  ;;  %v7379_v30 = vld [vmem:[%s10017_s5 + $0x154] ss:$8 sps:$4 sm:$0xff]   ;;  %v7377_v31 = vld [vmem:[%s10017_s5 + $0x150] ss:$8 sps:$4 sm:$0xff]  }
 0x2fc   :  { %5337 = vmatprep.subr.bf16.mxu1 %v7310_v39  ;;  %5768 = vmatprep.subr.bf16.mxu0 %v7337_v32  ;;  %v7382_v39 = vld [vmem:[%s10017_s5 + $0x164] ss:$8 sps:$4 sm:$0xff]   ;;  %v7380_v32 = vld [vmem:[%s10017_s5 + $0x160] ss:$8 sps:$4 sm:$0xff]  }
 0x2ff   :  { %5338 = vmatpush1.bf16.msra.mxu1 %v7308_v34  ;;  %5769 = vmatpush1.bf16.msra.mxu0 %v7335_v37  ;;  %v7385_v34 = vld [vmem:[%s10017_s5 + $0x174] ss:$8 sps:$4 sm:$0xff]   ;;  %v7383_v37 = vld [vmem:[%s10017_s5 + $0x170] ss:$8 sps:$4 sm:$0xff]  }
 0x300   :  { %5339 = vmatprep.subr.bf16.mxu1 %v7313_v38  ;;  %5770 = vmatprep.subr.bf16.mxu0 %v7340_v57  ;;  %v3737_v38 = vrot.slane %v9885_v3, %v501_v21  ;;  %v7388_v57 = vld [vmem:[%s10017_s5 + $0x184] ss:$8 sps:$4 sm:$0xff]   ;;  %v7391_v21 = vld [vmem:[%s10017_s5 + $0x194] ss:$8 sps:$4 sm:$0xff]  }
 0x303   :  { %5340 = vmatpush1.bf16.msra.mxu1 %v7311_v19  ;;  %5771 = vmatpush1.bf16.msra.mxu0 %v7338_v61 }
 0x304   :  { %5772 = vmatprep.subr.bf16.mxu0 %v7343_v40  ;;  %6812 = vmatprep.subr.bf16.mxu1 %v7410_v48  ;;  %v3733_v48 = vrot.slane %v9885_v3, %v497_v0 }
 0x306   :  { %5342 = vmatmul.mubr.bf16.vlgmr.msra.gmra.mrb[12].mxu1 %v9701_v1  ;;  %v7421_v1 = vld [vmem:[%s10018_s7 + $0x28] sm:$0xff]  }
 0x307   :  { %5773 = vmatpush1.bf16.msra.mxu0 %v7341_v60  ;;  %6813 = vmatpush3.bf16.msra.mxu1 %v7411_v36  ;;  %v7406_v36 = vld [vmem:[%s10017_s5 + $0x1e4] ss:$8 sps:$4 sm:$0xff]  }
 0x308   :  { %5774 = vmatprep.subr.bf16.mxu0 %v7346_v12  ;;  %6814 = vmatprep.subr.bf16.mxu1 %v7412_v49  ;;  %v7386_v12 = vld [vmem:[%s10017_s5 + $0x180] ss:$8 sps:$4 sm:$0xff]  }
 0x309   :  { %v7404_v49 = vld [vmem:[%s10017_s5 + $0x1e0] ss:$8 sps:$4 sm:$0xff]  }
 0x30b   :  { %5775 = vmatpush1.bf16.msra.mxu0 %v7344_v62  ;;  %6815 = vmatpush3.bf16.msra.mxu1 %v7413_v50 }
 0x30c   :  { %5776 = vmatprep.subr.bf16.mxu0 %v7349_v35  ;;  %6816 = vmatprep.subr.bf16.mxu1 %v7414_v47  ;;  %v7409_v47 = vld [vmem:[%s10017_s5 + $0x1f4] ss:$8 sps:$4 sm:$0xff]  }
 0x30f   :  { %5777 = vmatpush1.bf16.msra.mxu0 %v7347_v58  ;;  %6817 = vmatpush3.bf16.msra.mxu1 %v7415_v51 }
 0x310   :  { %5778 = vmatprep.subr.bf16.mxu0 %v7352_v33  ;;  %6818 = vmatprep.subr.bf16.mxu1 %v7416_v52  ;;  %v7389_v33 = vld [vmem:[%s10017_s5 + $0x190] ss:$8 sps:$4 sm:$0xff]  }
 0x311   :  { %v7422_v52 = vld [vmem:[%s10018_s7 + $0x70] sm:$0xff]  }
 0x313   :  { %5779 = vmatpush1.bf16.msra.mxu0 %v7350_v41  ;;  %6819 = vmatpush3.bf16.msra.mxu1 %v7417_v55  ;;  %v7394_v41 = vld [vmem:[%s10017_s5 + $0x1a4] ss:$8 sps:$4 sm:$0xff]   ;;  %v7423_v55 = vld [vmem:[%s10018_s7 + $0x30] sm:$0xff]  }
 0x314   :  { %5780 = vmatprep.subr.bf16.mxu0 %v7355_v27  ;;  %6820 = vmatprep.subr.bf16.mxu1 %v7418_v56  ;;  %v7392_v27 = vld [vmem:[%s10017_s5 + $0x1a0] ss:$8 sps:$4 sm:$0xff]   ;;  %v7424_v56 = vld [vmem:[%s10018_s7 + $0x78] sm:$0xff]  }
 0x317   :  { %5781 = vmatpush1.bf16.msra.mxu0 %v7353_v46  ;;  %6821 = vmatpush3.bf16.msra.mxu1 %v7419_v26  ;;  %v7397_v46 = vld [vmem:[%s10017_s5 + $0x1b4] ss:$8 sps:$4 sm:$0xff]  }
 0x318   :  { %5782 = vmatprep.subr.bf16.mxu0 %v7358_v42  ;;  %6822 = vmatprep.subr.bf16.mxu1 %v7420_v59  ;;  %v7395_v42 = vld [vmem:[%s10017_s5 + $0x1b0] ss:$8 sps:$4 sm:$0xff]   ;;  %v5422_v59 = vld [vmem:[%s10020_s6] sm:$0x3] }
 0x319   :  { %v7425_v26 = vld [vmem:[%s10018_s7 + $0x38] sm:$0xff]   ;;  %v5431_v3 = vrot.slane %v5422_v59, %v8692_v11 }
 0x31b   :  { %5783 = vmatpush1.bf16.msra.mxu0 %v7356_v43  ;;  %6823 = vmatpush3.bf16.msra.mxu1 %v7421_v1  ;;  %v7400_v43 = vld [vmem:[%s10017_s5 + $0x1c4] ss:$8 sps:$4 sm:$0xff]   ;;  %v5427_v1 = vrot.slane %v5422_v59, %v8686_v8 }
 0x31c   :  { %5784 = vmatprep.subr.bf16.mxu0 %v7361_v44  ;;  %v7398_v44 = vld [vmem:[%s10017_s5 + $0x1c0] ss:$8 sps:$4 sm:$0xff]   ;;  %6824 = vmatprep.subr.bf16.mxu1 %v7422_v52 }
 0x31f   :  { %5785 = vmatpush1.bf16.msra.mxu0 %v7359_v45  ;;  %v7403_v45 = vld [vmem:[%s10017_s5 + $0x1d4] ss:$8 sps:$4 sm:$0xff]   ;;  %6825 = vmatpush3.bf16.msra.mxu1 %v7423_v55 }
 0x320   :  { %5795 = vmatprep.subr.bf16.mxu0 %v7364_v16  ;;  %v7401_v16 = vld [vmem:[%s10017_s5 + $0x1d0] ss:$8 sps:$4 sm:$0xff]   ;;  %6826 = vmatprep.subr.bf16.mxu1 %v7424_v56 }
 0x323   :  { %6827 = vmatpush3.bf16.msra.mxu1 %v7425_v26 }
 0x3b5   :  { %v5179_v6 = vpop.f32.mrb[8].mxu0 }
 0x3b6   :  { %v6844_v7 = vadd.f32 %v5179_v6, %v3725_v4  ;;  %v5181_v9 = vpop.f32.mrb[9].mxu0 }
 0x3b7   :  { %v6845_v10 = vadd.f32 %v5181_v9, %v3729_v5  ;;  %v5183_v13 = vpop.f32.mrb[10].mxu0 }
 0x3b8   :  { %v5350_v14 = vmax.f32 %v6844_v7, 0.0  ;;  %v5184_v15 = vpop.f32.mrb[11].mxu0 }
 0x3b9   :  { %v5351_v17 = vmax.f32 %v6845_v10, 0.0 }
 0x3ba   :  { %v5354_v53 = vpack.c.bf16 %v5350_v14, %v5350_v14 }
 0x3bb   :  { %v5355_v18 = vpack.c.bf16 %v5351_v17, %v5351_v17 }
 0x3bd   :  { %5786 = vmatprep.mubr.bf16.mxu0 %v5355_v18 }
 0x3be   :  { %5787 = vmatmul.mubr.bf16.vlgmr.msra.gmra.mrb[12].mxu0 %v5354_v53 }
 0x3bf   :  { %5796 = vmatpush1.bf16.msra.mxu0 %v7362_v20  ;;  %v6795_v20 = vld [vmem:[%s10021_s8] ss:$0 sm:$0xff] }
 0x3c0   :  { %5797 = vmatprep.subr.bf16.mxu0 %v7367_v2 }
 0x3c3   :  { %5798 = vmatpush1.bf16.msra.mxu0 %v7365_v22 }
 0x3c4   :  { %5799 = vmatprep.subr.bf16.mxu0 %v7370_v23 }
 0x3c7   :  { %5800 = vmatpush1.bf16.msra.mxu0 %v7368_v24 }
 0x3c8   :  { %5801 = vmatprep.subr.bf16.mxu0 %v7373_v25 }
 0x3cb   :  { %5802 = vmatpush1.bf16.msra.mxu0 %v7371_v54 }
 0x3cc   :  { %5803 = vmatprep.subr.bf16.mxu0 %v7376_v28 }
 0x3cf   :  { %5804 = vmatpush1.bf16.msra.mxu0 %v7374_v29 }
 0x3d0   :  { %5805 = vmatprep.subr.bf16.mxu0 %v7379_v30 }
 0x3d3   :  { %5806 = vmatpush1.bf16.msra.mxu0 %v7377_v31 }
 0x3d4   :  { %5807 = vmatprep.subr.bf16.mxu0 %v7382_v39 }
 0x3d7   :  { %5808 = vmatpush1.bf16.msra.mxu0 %v7380_v32 }
 0x3d8   :  { %5809 = vmatprep.subr.bf16.mxu0 %v7385_v34 }
 0x3d9   :  { %v5343_v19 = vpop.f32.mrb[12].mxu1 }
 0x3da   :  { %v5345_v61 = vpop.f32.mrb[13].mxu1  ;;  %v6846_v50 = vadd.f32 %v5343_v19, %v3733_v48 }
 0x3db   :  { %v6847_v40 = vadd.f32 %v5345_v61, %v3737_v38  ;;  %5810 = vmatpush1.bf16.msra.mxu0 %v7383_v37  ;;  %v5347_v60 = vpop.f32.mrb[14].mxu1 }
 0x3dc   :  { %v5348_v62 = vpop.f32.mrb[15].mxu1  ;;  %5811 = vmatprep.subr.bf16.mxu0 %v7388_v57  ;;  %v5352_v0 = vmax.f32 %v6846_v50, 0.0 }
 0x3dd   :  { %v5353_v35 = vmax.f32 %v6847_v40, 0.0 }
 0x3de   :  { %v5356_v51 = vpack.c.bf16 %v5352_v0, %v5352_v0 }
 0x3df   :  { %v5357_v58 = vpack.c.bf16 %v5353_v35, %v5353_v35  ;;  %5812 = vmatpush1.bf16.msra.mxu0 %v7386_v12 }
 0x3e0   :  { %5813 = vmatprep.subr.bf16.mxu0 %v7391_v21 }
 0x3e1   :  { %5827 = vmatprep.mubr.bf16.mxu0 %v5357_v58 }
 0x3e3   :  { %5814 = vmatpush1.bf16.msra.mxu0 %v7389_v33 }
 0x3e4   :  { %5815 = vmatprep.subr.bf16.mxu0 %v7394_v41 }
 0x3e7   :  { %5816 = vmatpush1.bf16.msra.mxu0 %v7392_v27 }
 0x3e8   :  { %5817 = vmatprep.subr.bf16.mxu0 %v7397_v46 }
 0x3eb   :  { %5818 = vmatpush1.bf16.msra.mxu0 %v7395_v42 }
 0x3ec   :  { %5819 = vmatprep.subr.bf16.mxu0 %v7400_v43 }
 0x3ef   :  { %5820 = vmatpush1.bf16.msra.mxu0 %v7398_v44 }
 0x3f0   :  { %5821 = vmatprep.subr.bf16.mxu0 %v7403_v45 }
 0x3f3   :  { %5822 = vmatpush1.bf16.msra.mxu0 %v7401_v16 }
 0x3f4   :  { %5823 = vmatprep.subr.bf16.mxu0 %v7406_v36 }
 0x3f7   :  { %5824 = vmatpush1.bf16.msra.mxu0 %v7404_v49 }
 0x3f8   :  { %5825 = vmatprep.subr.bf16.mxu0 %v7409_v47 }
 0x3fb   :  { %5826 = vmatpush1.bf16.msra.mxu0 %v7407_v63 }
 0x3fe   :  { %5828 = vmatmul.mubr.bf16.vlgmr.msra.gmra.mrb[12].mxu0 %v5356_v51 }
 0x4d1   :  { %v5829_v4 = vpop.f32.mrb[12].mxu0 }
 0x4d2   :  { %v6848_v5 = vadd.f32 %v5829_v4, %v5427_v1  ;;  %v5831_v6 = vpop.f32.mrb[13].mxu0 }
 0x4d3   :  { %v6849_v7 = vadd.f32 %v5831_v6, %v5431_v3  ;;  %v5833_v9 = vpop.f32.mrb[14].mxu0 }
 0x4d4   :  { %v5836_v10 = vmax.f32 %v6848_v5, 0.0  ;;  %v5834_v13 = vpop.f32.mrb[15].mxu0 }
 0x4d5   :  { %v5837_v14 = vmax.f32 %v6849_v7, 0.0 }
 0x4d6   :  { %v5838_v17 = vpack.c.bf16 %v5836_v10, %v5836_v10 }
 0x4d7   :  { %v5839_v15 = vpack.c.bf16 %v5837_v14, %v5837_v14 }
 0x4d9   :  { %6007 = vmatprep.mubr.bf16.mxu1 %v5839_v15 }
 0x4da   :  { %6008 = vmatmul.mubr.bf16.vlgmr.msra.gmra.mrb[16].mxu1 %v5838_v17 }
 0x5ad   :  { %v6828_v18 = vpop.f32.mrb[16].mxu1 }
 0x5ae   :  { %v6829_v8 = vpop.f32.mrb[17].mxu1 }
 0x5af   :  { %v6830_v53 = vadd.f32 %v6829_v8, %v6828_v18  ;;  %v6831_v11 = vpop.f32.mrb[18].mxu1 }
 0x5b0   :  { %v6832_v2 = vpop.f32.mrb[19].mxu1 }
 0x5b1   :  { %v6010_v22 = vadd.f32 %v6830_v53, %v6795_v20 }
 0x5b3   :  { %6015 = vst [vmem:[%s10022_s9] sm:$0xff] %v6010_v22 }

</bundles_post_ra>
